<compile_context>
chip_gen: v7x
topology: tpu7x:2x2x1
jax: 0.10.0
libtpu: 0.0.40
codegen_flags: <defaults>
</compile_context>

<pallas_src>
import math

import jax
import jax.numpy as jnp
from jax.experimental import pallas as pl
from jax.experimental.pallas import tpu as pltpu

# ---------------- small synthetic DINOv2 config ----------------
IMG = 32                                   # input resolution (stand-in for 224)
PATCH = 8                                  # patch size (stand-in for 14)
CH = 3
HIDDEN = 256                               # hidden_size (stand-in for 768), lane-dense
HEADS = 2
HEAD_DIM = HIDDEN // HEADS                 # 128 -> lane-dense head dim
LAYERS = 2                                 # num_hidden_layers (stand-in for 12)
MLP = 4 * HIDDEN
EPS = 1e-6                                 # Dinov2 layer_norm_eps
SEQ = (IMG // PATCH) ** 2 + 1              # patches + CLS = 17
PATCH_K = CH * PATCH * PATCH               # 192
PATCH_K_PAD = ((PATCH_K + 127) // 128) * 128   # pad contraction dim to 256 lanes

IMAGENET_MEAN = jnp.array([0.485, 0.456, 0.406], jnp.float32)
IMAGENET_STD = jnp.array([0.229, 0.224, 0.225], jnp.float32)

_CPARAMS = pltpu.CompilerParams(
    dimension_semantics=("parallel",),      # batch grid axis -> megacore shard on v7x
    vmem_limit_bytes=32 * 1024 * 1024,      # explicit; safe on v5e/v6e/v7x at this scale
)


# ---------------- BlockSpec helpers ----------------
def _tok_spec(S, D):
    # one batch element's (S, D) token block; leading batch dim squeezed
    return pl.BlockSpec((None, S, D), lambda b: (b, 0, 0))


def _rep_spec(shape):
    # whole-array block replicated across the batch grid (weights / params);
    # constant block index -> DMA'd once, stays resident across grid steps.
    return pl.BlockSpec(shape, lambda b, _n=len(shape): (0,) * _n)


# ---------------- in-kernel helpers ----------------
def _layernorm_f32(x, g, b):
    mu = jnp.mean(x, axis=-1, keepdims=True)
    var = jnp.mean(jnp.square(x - mu), axis=-1, keepdims=True)
    return (x - mu) * jax.lax.rsqrt(var + EPS) * g + b


# ---------------- Pallas kernels ----------------
def _embed_kernel(p_ref, w_ref, add_ref, o_ref):
    # p: (S, Kp) bf16 -- row 0 is an all-zero "CLS patch"
    # w: (Kp, D) bf16, add: (S, D) f32 = pos + [cls | bias], o: (S, D) bf16
    emb = jnp.dot(p_ref[...], w_ref[...], preferred_element_type=jnp.float32)
    o_ref[...] = (emb + add_ref[...]).astype(o_ref.dtype)


def _attn_block_kernel(h_ref, g_ref, b_ref, wqkv_ref, bqkv_ref,
                       wproj_ref, bproj_ref, ls_ref, o_ref):
    # Fused: LN1 -> QKV -> per-head attention -> head-merge + out-proj -> LS + residual.
    x = h_ref[...].astype(jnp.float32)                                   # (S, D)
    n1 = _layernorm_f32(x, g_ref[...], b_ref[...])
    qkv = jnp.dot(n1.astype(jnp.bfloat16), wqkv_ref[...],
                  preferred_element_type=jnp.float32) + bqkv_ref[...]    # (S, 3D) f32

    scale = 1.0 / math.sqrt(HEAD_DIM)
    proj = jnp.zeros((x.shape[0], HIDDEN), jnp.float32)
    for hd in range(HEADS):                   # static unroll; 128-lane-aligned slices
        lo = hd * HEAD_DIM
        q = (qkv[:, lo:lo + HEAD_DIM] * scale).astype(jnp.bfloat16)      # scale folded into q
        k = qkv[:, HIDDEN + lo:HIDDEN + lo + HEAD_DIM].astype(jnp.bfloat16)
        v = qkv[:, 2 * HIDDEN + lo:2 * HIDDEN + lo + HEAD_DIM].astype(jnp.bfloat16)
        # q @ k^T on the MXU (contract last dim of both), f32 accumulation
        s = jax.lax.dot_general(q, k, (((1,), (1,)), ((), ())),
                                preferred_element_type=jnp.float32)      # (S, S)
        s = s - jnp.max(s, axis=-1, keepdims=True)
        p = jnp.exp(s)
        p = p * pl.reciprocal(jnp.sum(p, axis=-1, keepdims=True), approx=True)
        ctx = jnp.dot(p.astype(jnp.bfloat16), v,
                      preferred_element_type=jnp.float32)                # (S, Dh)
        # head-merge + output projection fused: accumulate ctx_h @ Wproj[rows of head h]
        proj = proj + jnp.dot(ctx.astype(jnp.bfloat16),
                              wproj_ref[lo:lo + HEAD_DIM, :],
                              preferred_element_type=jnp.float32)
    proj = proj + bproj_ref[...]
    o_ref[...] = (x + ls_ref[...] * proj).astype(o_ref.dtype)            # LS1 + residual


def _mlp_block_kernel(h_ref, g_ref, b_ref, w1_ref, b1_ref, w2_ref, b2_ref,
                      ls_ref, o_ref):
    # Fused: LN2 -> FC1 -> GELU -> FC2 -> LS + residual.
    x = h_ref[...].astype(jnp.float32)
    n2 = _layernorm_f32(x, g_ref[...], b_ref[...])
    f1 = jnp.dot(n2.astype(jnp.bfloat16), w1_ref[...],
                 preferred_element_type=jnp.float32) + b1_ref[...]
    # TODO(synk): HF Dinov2 uses the erf GELU ("gelu"); tanh approximation used here
    # to stay on guaranteed Mosaic lowerings (~1e-3 per-element drift).
    f1 = jax.nn.gelu(f1, approximate=True).astype(jnp.bfloat16)
    out = jnp.dot(f1, w2_ref[...], preferred_element_type=jnp.float32) + b2_ref[...]
    o_ref[...] = (x + ls_ref[...] * out).astype(o_ref.dtype)


def _final_ln_kernel(h_ref, g_ref, b_ref, o_ref):
    x = h_ref[...].astype(jnp.float32)
    o_ref[...] = _layernorm_f32(x, g_ref[...], b_ref[...]).astype(o_ref.dtype)


# ---------------- pallas_call wrappers ----------------
def patch_embed(patches, w, embed_add):
    B, S, Kp = patches.shape
    return pl.pallas_call(
        _embed_kernel,
        grid=(B,),
        in_specs=[
            pl.BlockSpec((None, S, Kp), lambda b: (b, 0, 0)),
            _rep_spec((Kp, HIDDEN)),
            _rep_spec((S, HIDDEN)),
        ],
        out_specs=_tok_spec(S, HIDDEN),
        out_shape=jax.ShapeDtypeStruct((B, S, HIDDEN), jnp.bfloat16),
        compiler_params=_CPARAMS,
    )(patches, w, embed_add)


def attn_block(h, lyr):
    B, S, D = h.shape
    return pl.pallas_call(
        _attn_block_kernel,
        grid=(B,),
        in_specs=[
            _tok_spec(S, D),              # hidden state (also the residual)
            _rep_spec((1, D)),            # ln1 gamma
            _rep_spec((1, D)),            # ln1 beta
            _rep_spec((D, 3 * D)),        # W_qkv (bf16)
            _rep_spec((1, 3 * D)),        # b_qkv
            _rep_spec((D, D)),            # W_proj (bf16)
            _rep_spec((1, D)),            # b_proj
            _rep_spec((1, D)),            # layer-scale 1
        ],
        out_specs=_tok_spec(S, D),
        out_shape=jax.ShapeDtypeStruct((B, S, D), jnp.bfloat16),
        input_output_aliases={0: 0},      # update hidden state in place (no new HBM buf)
        compiler_params=_CPARAMS,
    )(h, lyr["ln1_g"], lyr["ln1_b"], lyr["qkv_w"], lyr["qkv_b"],
      lyr["proj_w"], lyr["proj_b"], lyr["ls1"])


def mlp_block(h, lyr):
    B, S, D = h.shape
    return pl.pallas_call(
        _mlp_block_kernel,
        grid=(B,),
        in_specs=[
            _tok_spec(S, D),              # hidden state (also the residual)
            _rep_spec((1, D)),            # ln2 gamma
            _rep_spec((1, D)),            # ln2 beta
            _rep_spec((D, MLP)),          # W_fc1 (bf16)
            _rep_spec((1, MLP)),          # b_fc1
            _rep_spec((MLP, D)),          # W_fc2 (bf16)
            _rep_spec((1, D)),            # b_fc2
            _rep_spec((1, D)),            # layer-scale 2
        ],
        out_specs=_tok_spec(S, D),
        out_shape=jax.ShapeDtypeStruct((B, S, D), jnp.bfloat16),
        input_output_aliases={0: 0},
        compiler_params=_CPARAMS,
    )(h, lyr["ln2_g"], lyr["ln2_b"], lyr["fc1_w"], lyr["fc1_b"],
      lyr["fc2_w"], lyr["fc2_b"], lyr["ls2"])


def final_layernorm(h, g, b):
    B, S, D = h.shape
    return pl.pallas_call(
        _final_ln_kernel,
        grid=(B,),
        in_specs=[_tok_spec(S, D), _rep_spec((1, D)), _rep_spec((1, D))],
        out_specs=_tok_spec(S, D),
        out_shape=jax.ShapeDtypeStruct((B, S, D), jnp.float32),
        compiler_params=_CPARAMS,
    )(h, g, b)


# ---------------- parameters (deterministic synthetic init) ----------------
def init_params(key):
    def nrm(k, shape, scale=0.02, dtype=jnp.float32):
        return (scale * jax.random.normal(k, shape, jnp.float32)).astype(dtype)

    keys = iter(jax.random.split(key, 4 + 8 * LAYERS))
    # Conv2d patch weight (D, C, p, p) -> matmul layout (C*p*p, D), zero-padded
    # along the contraction dim to a multiple of 128, stored bf16.
    w_conv = nrm(next(keys), (HIDDEN, CH, PATCH, PATCH))
    w_pe = w_conv.reshape(HIDDEN, PATCH_K).T
    w_pe = jnp.pad(w_pe, ((0, PATCH_K_PAD - PATCH_K), (0, 0))).astype(jnp.bfloat16)

    params = {
        "patch_w": w_pe,                                   # (Kp, D) bf16
        "patch_b": nrm(next(keys), (1, HIDDEN)),           # conv bias
        "cls": nrm(next(keys), (1, HIDDEN)),
        "pos": nrm(next(keys), (SEQ, HIDDEN)),             # same resolution -> no interp
        "lnf_g": jnp.ones((1, HIDDEN), jnp.float32),
        "lnf_b": jnp.zeros((1, HIDDEN), jnp.float32),
        "layers": [],
    }
    for _ in range(LAYERS):
        params["layers"].append({
            "ln1_g": jnp.ones((1, HIDDEN), jnp.float32),
            "ln1_b": jnp.zeros((1, HIDDEN), jnp.float32),
            "qkv_w": nrm(next(keys), (HIDDEN, 3 * HIDDEN), dtype=jnp.bfloat16),
            "qkv_b": nrm(next(keys), (1, 3 * HIDDEN)),
            "proj_w": nrm(next(keys), (HIDDEN, HIDDEN), dtype=jnp.bfloat16),
            "proj_b": nrm(next(keys), (1, HIDDEN)),
            "ls1": jnp.ones((1, HIDDEN), jnp.float32),     # layer_scale_init_value
            "ln2_g": jnp.ones((1, HIDDEN), jnp.float32),
            "ln2_b": jnp.zeros((1, HIDDEN), jnp.float32),
            "fc1_w": nrm(next(keys), (HIDDEN, MLP), dtype=jnp.bfloat16),
            "fc1_b": nrm(next(keys), (1, MLP)),
            "fc2_w": nrm(next(keys), (MLP, HIDDEN), dtype=jnp.bfloat16),
            "fc2_b": nrm(next(keys), (1, HIDDEN)),
            "ls2": jnp.ones((1, HIDDEN), jnp.float32),
        })
    return params


# ---------------- forward pass ----------------
@jax.jit
def dinov2_last_hidden_state(pixel_values, params):
    """pixel_values: NCHW raw image values in [0, 255]. Returns (B, S, HIDDEN) f32."""
    # image_processor semantics: rescale 1/255 + ImageNet mean/std normalization.
    # TODO(synk): AutoImageProcessor's PIL bicubic resize / center-crop has no clean
    # Pallas equivalent; inputs are assumed already at model resolution.
    B, C, H, W = pixel_values.shape
    x = pixel_values.astype(jnp.float32) / 255.0
    x = (x - IMAGENET_MEAN.reshape(1, C, 1, 1)) / IMAGENET_STD.reshape(1, C, 1, 1)

    # Conv2d(kernel=stride=PATCH) == patch-flatten + matmul. The rearrange is XLA
    # glue; the matmul + bias + CLS prepend + pos-embed add are fused in one Pallas
    # kernel by prepending an all-zero "CLS patch" row and adding a (S, D) table.
    nH, nW = H // PATCH, W // PATCH
    patches = x.reshape(B, C, nH, PATCH, nW, PATCH).transpose(0, 2, 4, 1, 3, 5)
    patches = patches.reshape(B, nH * nW, PATCH_K)
    patches = jnp.pad(patches, ((0, 0), (1, 0), (0, PATCH_K_PAD - PATCH_K)))
    patches = patches.astype(jnp.bfloat16)                       # (B, S, Kp)

    embed_add = params["pos"]
    embed_add = embed_add.at[0:1, :].add(params["cls"])          # CLS row: cls + pos[0]
    embed_add = embed_add.at[1:, :].add(params["patch_b"])       # patch rows: bias + pos[1:]

    h = patch_embed(patches, params["patch_w"], embed_add)       # (B, S, D) bf16

    for lyr in params["layers"]:
        h = attn_block(h, lyr)   # LN1 + QKV + MHA + out-proj + LS1 + residual (1 call)
        h = mlp_block(h, lyr)    # LN2 + FC1 + GELU + FC2 + LS2 + residual     (1 call)

    return final_layernorm(h, params["lnf_g"], params["lnf_b"])  # last_hidden_state


if __name__ == "__main__":
    key = jax.random.PRNGKey(0)
    kx, kp = jax.random.split(key)
    # synthetic "image" batch, NCHW, values in [0, 255]
    x = jax.random.uniform(kx, (2, CH, IMG, IMG), jnp.float32, 0.0, 255.0)
    params = init_params(kp)

    out = jax.block_until_ready(dinov2_last_hidden_state(x, params))

    assert out.shape == (2, SEQ, HIDDEN), out.shape
    assert jnp.all(jnp.isfinite(out))
    print("KERNEL_OK")
</pallas_src>

<mosaic_0001>
module attributes {stable_mosaic.version = 11 : i64} {
  func.func @_embed_kernel(%arg0: i32, %arg1: memref<1x17x256xbf16, #tpu.memory_space<vmem>>, %arg2: memref<256x256xbf16, #tpu.memory_space<vmem>>, %arg3: memref<17x256xf32, #tpu.memory_space<vmem>>, %arg4: memref<1x17x256xbf16, #tpu.memory_space<vmem>>) attributes {dimension_semantics = [#tpu.dimension_semantics<parallel>], iteration_bounds = array<i64: 2>, scalar_prefetch = 0 : i64, scratch_operands = 0 : i64, tpu.core_type = #tpu.core_type<tc>, window_params = [{transform_indices = @transform_0, window_bounds = array<i64: 1, 17, 256>}, {pipeline_mode = #tpu.pipeline_mode<synchronous>, transform_indices = @transform_1, window_bounds = array<i64: 256, 256>}, {pipeline_mode = #tpu.pipeline_mode<synchronous>, transform_indices = @transform_2, window_bounds = array<i64: 17, 256>}, {transform_indices = @transform_3, window_bounds = array<i64: 1, 17, 256>}]} {
    %c0 = arith.constant 0 : index
    %c0_0 = arith.constant 0 : index
    %c0_1 = arith.constant 0 : index
    %0 = vector.load %arg1[%c0, %c0_0, %c0_1] : memref<1x17x256xbf16, #tpu.memory_space<vmem>>, vector<1x17x256xbf16>
    %1 = vector.shape_cast %0 : vector<1x17x256xbf16> to vector<17x256xbf16>
    %c0_2 = arith.constant 0 : index
    %c0_3 = arith.constant 0 : index
    %2 = vector.load %arg2[%c0_2, %c0_3] : memref<256x256xbf16, #tpu.memory_space<vmem>>, vector<256x256xbf16>
    %cst = arith.constant dense<0.000000e+00> : vector<17x256xf32>
    %3 = tpu.matmul %1, %2, %cst {dimension_numbers = #tpu.dot_dimension_numbers<[1], [0], [0], [1], [0, 0, 1, 1], [], []>} : vector<17x256xbf16>, vector<256x256xbf16>, vector<17x256xf32> -> vector<17x256xf32>
    %c0_4 = arith.constant 0 : index
    %c0_5 = arith.constant 0 : index
    %4 = vector.load %arg3[%c0_4, %c0_5] : memref<17x256xf32, #tpu.memory_space<vmem>>, vector<17x256xf32>
    %5 = arith.addf %3, %4 : vector<17x256xf32>
    %6 = arith.truncf %5 : vector<17x256xf32> to vector<17x256xbf16>
    %c0_6 = arith.constant 0 : index
    %c0_7 = arith.constant 0 : index
    %c0_8 = arith.constant 0 : index
    %7 = vector.load %arg4[%c0_6, %c0_7, %c0_8] : memref<1x17x256xbf16, #tpu.memory_space<vmem>>, vector<1x17x256xbf16>
    %8 = vector.shape_cast %7 : vector<1x17x256xbf16> to vector<17x256xbf16>
    %9 = vector.shape_cast %6 : vector<17x256xbf16> to vector<1x17x256xbf16>
    tpu.vector_store %arg4[%c0_6, %c0_7, %c0_8], %9 {strides = array<i32>} : memref<1x17x256xbf16, #tpu.memory_space<vmem>>, vector<1x17x256xbf16>,
    return
  }
  func.func @transform_0(%arg0: i32) -> (i32, i32, i32) {
    %c0_i32 = arith.constant 0 : i32
    %c0_i32_0 = arith.constant 0 : i32
    %c0_i32_1 = arith.constant 0 : i32
    return %arg0, %c0_i32, %c0_i32_0 : i32, i32, i32
  }
  func.func @transform_1(%arg0: i32) -> (i32, i32) {
    %c0_i32 = arith.constant 0 : i32
    %c0_i32_0 = arith.constant 0 : i32
    %c0_i32_1 = arith.constant 0 : i32
    return %c0_i32, %c0_i32_0 : i32, i32
  }
  func.func @transform_2(%arg0: i32) -> (i32, i32) {
    %c0_i32 = arith.constant 0 : i32
    %c0_i32_0 = arith.constant 0 : i32
    %c0_i32_1 = arith.constant 0 : i32
    return %c0_i32, %c0_i32_0 : i32, i32
  }
  func.func @transform_3(%arg0: i32) -> (i32, i32, i32) {
    %c0_i32 = arith.constant 0 : i32
    %c0_i32_0 = arith.constant 0 : i32
    %c0_i32_1 = arith.constant 0 : i32
    return %arg0, %c0_i32, %c0_i32_0 : i32, i32, i32
  }
}

module attributes {stable_mosaic.version = 11 : i64} {
  func.func @_attn_block_kernel(%arg0: i32, %arg1: memref<1x17x256xbf16, #tpu.memory_space<vmem>>, %arg2: memref<1x256xf32, #tpu.memory_space<vmem>>, %arg3: memref<1x256xf32, #tpu.memory_space<vmem>>, %arg4: memref<256x768xbf16, #tpu.memory_space<vmem>>, %arg5: memref<1x768xf32, #tpu.memory_space<vmem>>, %arg6: memref<256x256xbf16, #tpu.memory_space<vmem>>, %arg7: memref<1x256xf32, #tpu.memory_space<vmem>>, %arg8: memref<1x256xf32, #tpu.memory_space<vmem>>, %arg9: memref<1x17x256xbf16, #tpu.memory_space<vmem>>) attributes {dimension_semantics = [#tpu.dimension_semantics<parallel>], iteration_bounds = array<i64: 2>, scalar_prefetch = 0 : i64, scratch_operands = 0 : i64, tpu.core_type = #tpu.core_type<tc>, window_params = [{transform_indices = @transform_0, window_bounds = array<i64: 1, 17, 256>}, {pipeline_mode = #tpu.pipeline_mode<synchronous>, transform_indices = @transform_1, window_bounds = array<i64: 1, 256>}, {pipeline_mode = #tpu.pipeline_mode<synchronous>, transform_indices = @transform_2, window_bounds = array<i64: 1, 256>}, {pipeline_mode = #tpu.pipeline_mode<synchronous>, transform_indices = @transform_3, window_bounds = array<i64: 256, 768>}, {pipeline_mode = #tpu.pipeline_mode<synchronous>, transform_indices = @transform_4, window_bounds = array<i64: 1, 768>}, {pipeline_mode = #tpu.pipeline_mode<synchronous>, transform_indices = @transform_5, window_bounds = array<i64: 256, 256>}, {pipeline_mode = #tpu.pipeline_mode<synchronous>, transform_indices = @transform_6, window_bounds = array<i64: 1, 256>}, {pipeline_mode = #tpu.pipeline_mode<synchronous>, transform_indices = @transform_7, window_bounds = array<i64: 1, 256>}, {transform_indices = @transform_8, window_bounds = array<i64: 1, 17, 256>}]} {
    %c0 = arith.constant 0 : index
    %c0_0 = arith.constant 0 : index
    %c0_1 = arith.constant 0 : index
    %0 = vector.load %arg1[%c0, %c0_0, %c0_1] : memref<1x17x256xbf16, #tpu.memory_space<vmem>>, vector<1x17x256xbf16>
    %1 = vector.shape_cast %0 : vector<1x17x256xbf16> to vector<17x256xbf16>
    %2 = arith.extf %1 : vector<17x256xbf16> to vector<17x256xf32>
    %c0_2 = arith.constant 0 : index
    %c0_3 = arith.constant 0 : index
    %3 = vector.load %arg2[%c0_2, %c0_3] : memref<1x256xf32, #tpu.memory_space<vmem>>, vector<1x256xf32>
    %c0_4 = arith.constant 0 : index
    %c0_5 = arith.constant 0 : index
    %4 = vector.load %arg3[%c0_4, %c0_5] : memref<1x256xf32, #tpu.memory_space<vmem>>, vector<1x256xf32>
    %cst = arith.constant dense<0.000000e+00> : vector<17xf32>
    %5 = vector.multi_reduction <add>, %2, %cst [1] : vector<17x256xf32> to vector<17xf32>
    %6 = vector.shape_cast %5 : vector<17xf32> to vector<17x1xf32>
    %cst_6 = arith.constant 2.560000e+02 : f32
    %7 = vector.broadcast %cst_6 : f32 to vector<17x1xf32>
    %8 = arith.divf %6, %7 : vector<17x1xf32>
    %9 = vector.broadcast %8 : vector<17x1xf32> to vector<17x256xf32>
    %10 = arith.subf %2, %9 : vector<17x256xf32>
    %11 = arith.mulf %10, %10 : vector<17x256xf32>
    %cst_7 = arith.constant dense<0.000000e+00> : vector<17xf32>
    %12 = vector.multi_reduction <add>, %11, %cst_7 [1] : vector<17x256xf32> to vector<17xf32>
    %13 = vector.shape_cast %12 : vector<17xf32> to vector<17x1xf32>
    %cst_8 = arith.constant 2.560000e+02 : f32
    %14 = vector.broadcast %cst_8 : f32 to vector<17x1xf32>
    %15 = arith.divf %13, %14 : vector<17x1xf32>
    %16 = vector.broadcast %8 : vector<17x1xf32> to vector<17x256xf32>
    %17 = arith.subf %2, %16 : vector<17x256xf32>
    %cst_9 = arith.constant 9.99999997E-7 : f32
    %18 = vector.broadcast %cst_9 : f32 to vector<17x1xf32>
    %19 = arith.addf %15, %18 : vector<17x1xf32>
    %20 = math.rsqrt %19 : vector<17x1xf32>
    %21 = vector.broadcast %20 : vector<17x1xf32> to vector<17x256xf32>
    %22 = arith.mulf %17, %21 : vector<17x256xf32>
    %23 = vector.broadcast %3 : vector<1x256xf32> to vector<17x256xf32>
    %24 = arith.mulf %22, %23 : vector<17x256xf32>
    %25 = vector.broadcast %4 : vector<1x256xf32> to vector<17x256xf32>
    %26 = arith.addf %24, %25 : vector<17x256xf32>
    %27 = arith.truncf %26 : vector<17x256xf32> to vector<17x256xbf16>
    %c0_10 = arith.constant 0 : index
    %c0_11 = arith.constant 0 : index
    %28 = vector.load %arg4[%c0_10, %c0_11] : memref<256x768xbf16, #tpu.memory_space<vmem>>, vector<256x768xbf16>
    %cst_12 = arith.constant dense<0.000000e+00> : vector<17x768xf32>
    %29 = tpu.matmul %27, %28, %cst_12 {dimension_numbers = #tpu.dot_dimension_numbers<[1], [0], [0], [1], [0, 0, 1, 1], [], []>} : vector<17x256xbf16>, vector<256x768xbf16>, vector<17x768xf32> -> vector<17x768xf32>
    %c0_13 = arith.constant 0 : index
    %c0_14 = arith.constant 0 : index
    %30 = vector.load %arg5[%c0_13, %c0_14] : memref<1x768xf32, #tpu.memory_space<vmem>>, vector<1x768xf32>
    %31 = vector.broadcast %30 : vector<1x768xf32> to vector<17x768xf32>
    %32 = arith.addf %29, %31 : vector<17x768xf32>
    %cst_15 = arith.constant 0.000000e+00 : f32
    %33 = vector.broadcast %cst_15 : f32 to vector<17x256xf32>
    %34 = vector.extract_strided_slice %32 {offsets = [0, 0], sizes = [17, 128], strides = [1, 1]} : vector<17x768xf32> to vector<17x128xf32>
    %cst_16 = arith.constant 0.0883883461 : f32
    %35 = vector.broadcast %cst_16 : f32 to vector<17x128xf32>
    %36 = arith.mulf %34, %35 : vector<17x128xf32>
    %37 = arith.truncf %36 : vector<17x128xf32> to vector<17x128xbf16>
    %38 = vector.extract_strided_slice %32 {offsets = [0, 256], sizes = [17, 128], strides = [1, 1]} : vector<17x768xf32> to vector<17x128xf32>
    %39 = arith.truncf %38 : vector<17x128xf32> to vector<17x128xbf16>
    %40 = vector.extract_strided_slice %32 {offsets = [0, 512], sizes = [17, 128], strides = [1, 1]} : vector<17x768xf32> to vector<17x128xf32>
    %41 = arith.truncf %40 : vector<17x128xf32> to vector<17x128xbf16>
    %cst_17 = arith.constant dense<0.000000e+00> : vector<17x17xf32>
    %42 = tpu.matmul %37, %39, %cst_17 {dimension_numbers = #tpu.dot_dimension_numbers<[1], [1], [0], [0], [0, 0, 1, 0], [], []>} : vector<17x128xbf16>, vector<17x128xbf16>, vector<17x17xf32> -> vector<17x17xf32>
    %cst_18 = arith.constant dense<0xFF800000> : vector<17xf32>
    %43 = vector.multi_reduction <maximumf>, %42, %cst_18 [1] : vector<17x17xf32> to vector<17xf32>
    %44 = vector.shape_cast %43 : vector<17xf32> to vector<17x1xf32>
    %45 = vector.broadcast %44 : vector<17x1xf32> to vector<17x17xf32>
    %46 = arith.subf %42, %45 : vector<17x17xf32>
    %47 = math.exp %46 : vector<17x17xf32>
    %cst_19 = arith.constant dense<0.000000e+00> : vector<17xf32>
    %48 = vector.multi_reduction <add>, %47, %cst_19 [1] : vector<17x17xf32> to vector<17xf32>
    %49 = vector.shape_cast %48 : vector<17xf32> to vector<17x1xf32>
    %50 = tpu.reciprocal %49 {approx = true} : vector<17x1xf32> -> vector<17x1xf32>
    %51 = vector.broadcast %50 : vector<17x1xf32> to vector<17x17xf32>
    %52 = arith.mulf %47, %51 : vector<17x17xf32>
    %53 = arith.truncf %52 : vector<17x17xf32> to vector<17x17xbf16>
    %cst_20 = arith.constant dense<0.000000e+00> : vector<17x128xf32>
    %54 = tpu.matmul %53, %41, %cst_20 {dimension_numbers = #tpu.dot_dimension_numbers<[1], [0], [0], [1], [0, 0, 1, 1], [], []>} : vector<17x17xbf16>, vector<17x128xbf16>, vector<17x128xf32> -> vector<17x128xf32>
    %55 = arith.truncf %54 : vector<17x128xf32> to vector<17x128xbf16>
    %c0_21 = arith.constant 0 : index
    %c0_22 = arith.constant 0 : index
    %56 = vector.load %arg6[%c0_21, %c0_22] : memref<256x256xbf16, #tpu.memory_space<vmem>>, vector<128x256xbf16>
    %cst_23 = arith.constant dense<0.000000e+00> : vector<17x256xf32>
    %57 = tpu.matmul %55, %56, %cst_23 {dimension_numbers = #tpu.dot_dimension_numbers<[1], [0], [0], [1], [0, 0, 1, 1], [], []>} : vector<17x128xbf16>, vector<128x256xbf16>, vector<17x256xf32> -> vector<17x256xf32>
    %58 = arith.addf %33, %57 : vector<17x256xf32>
    %59 = vector.extract_strided_slice %32 {offsets = [0, 128], sizes = [17, 128], strides = [1, 1]} : vector<17x768xf32> to vector<17x128xf32>
    %cst_24 = arith.constant 0.0883883461 : f32
    %60 = vector.broadcast %cst_24 : f32 to vector<17x128xf32>
    %61 = arith.mulf %59, %60 : vector<17x128xf32>
    %62 = arith.truncf %61 : vector<17x128xf32> to vector<17x128xbf16>
    %63 = vector.extract_strided_slice %32 {offsets = [0, 384], sizes = [17, 128], strides = [1, 1]} : vector<17x768xf32> to vector<17x128xf32>
    %64 = arith.truncf %63 : vector<17x128xf32> to vector<17x128xbf16>
    %65 = vector.extract_strided_slice %32 {offsets = [0, 640], sizes = [17, 128], strides = [1, 1]} : vector<17x768xf32> to vector<17x128xf32>
    %66 = arith.truncf %65 : vector<17x128xf32> to vector<17x128xbf16>
    %cst_25 = arith.constant dense<0.000000e+00> : vector<17x17xf32>
    %67 = tpu.matmul %62, %64, %cst_25 {dimension_numbers = #tpu.dot_dimension_numbers<[1], [1], [0], [0], [0, 0, 1, 0], [], []>} : vector<17x128xbf16>, vector<17x128xbf16>, vector<17x17xf32> -> vector<17x17xf32>
    %cst_26 = arith.constant dense<0xFF800000> : vector<17xf32>
    %68 = vector.multi_reduction <maximumf>, %67, %cst_26 [1] : vector<17x17xf32> to vector<17xf32>
    %69 = vector.shape_cast %68 : vector<17xf32> to vector<17x1xf32>
    %70 = vector.broadcast %69 : vector<17x1xf32> to vector<17x17xf32>
    %71 = arith.subf %67, %70 : vector<17x17xf32>
    %72 = math.exp %71 : vector<17x17xf32>
    %cst_27 = arith.constant dense<0.000000e+00> : vector<17xf32>
    %73 = vector.multi_reduction <add>, %72, %cst_27 [1] : vector<17x17xf32> to vector<17xf32>
    %74 = vector.shape_cast %73 : vector<17xf32> to vector<17x1xf32>
    %75 = tpu.reciprocal %74 {approx = true} : vector<17x1xf32> -> vector<17x1xf32>
    %76 = vector.broadcast %75 : vector<17x1xf32> to vector<17x17xf32>
    %77 = arith.mulf %72, %76 : vector<17x17xf32>
    %78 = arith.truncf %77 : vector<17x17xf32> to vector<17x17xbf16>
    %cst_28 = arith.constant dense<0.000000e+00> : vector<17x128xf32>
    %79 = tpu.matmul %78, %66, %cst_28 {dimension_numbers = #tpu.dot_dimension_numbers<[1], [0], [0], [1], [0, 0, 1, 1], [], []>} : vector<17x17xbf16>, vector<17x128xbf16>, vector<17x128xf32> -> vector<17x128xf32>
    %80 = arith.truncf %79 : vector<17x128xf32> to vector<17x128xbf16>
    %c128 = arith.constant 128 : index
    %c0_29 = arith.constant 0 : index
    %81 = vector.load %arg6[%c128, %c0_29] : memref<256x256xbf16, #tpu.memory_space<vmem>>, vector<128x256xbf16>
    %cst_30 = arith.constant dense<0.000000e+00> : vector<17x256xf32>
    %82 = tpu.matmul %80, %81, %cst_30 {dimension_numbers = #tpu.dot_dimension_numbers<[1], [0], [0], [1], [0, 0, 1, 1], [], []>} : vector<17x128xbf16>, vector<128x256xbf16>, vector<17x256xf32> -> vector<17x256xf32>
    %83 = arith.addf %58, %82 : vector<17x256xf32>
    %c0_31 = arith.constant 0 : index
    %c0_32 = arith.constant 0 : index
    %84 = vector.load %arg7[%c0_31, %c0_32] : memref<1x256xf32, #tpu.memory_space<vmem>>, vector<1x256xf32>
    %85 = vector.broadcast %84 : vector<1x256xf32> to vector<17x256xf32>
    %86 = arith.addf %83, %85 : vector<17x256xf32>
    %c0_33 = arith.constant 0 : index
    %c0_34 = arith.constant 0 : index
    %87 = vector.load %arg8[%c0_33, %c0_34] : memref<1x256xf32, #tpu.memory_space<vmem>>, vector<1x256xf32>
    %88 = vector.broadcast %87 : vector<1x256xf32> to vector<17x256xf32>
    %89 = arith.mulf %88, %86 : vector<17x256xf32>
    %90 = arith.addf %2, %89 : vector<17x256xf32>
    %91 = arith.truncf %90 : vector<17x256xf32> to vector<17x256xbf16>
    %c0_35 = arith.constant 0 : index
    %c0_36 = arith.constant 0 : index
    %c0_37 = arith.constant 0 : index
    %92 = vector.load %arg9[%c0_35, %c0_36, %c0_37] : memref<1x17x256xbf16, #tpu.memory_space<vmem>>, vector<1x17x256xbf16>
    %93 = vector.shape_cast %92 : vector<1x17x256xbf16> to vector<17x256xbf16>
    %94 = vector.shape_cast %91 : vector<17x256xbf16> to vector<1x17x256xbf16>
    tpu.vector_store %arg9[%c0_35, %c0_36, %c0_37], %94 {strides = array<i32>} : memref<1x17x256xbf16, #tpu.memory_space<vmem>>, vector<1x17x256xbf16>,
    return
  }
  func.func @transform_0(%arg0: i32) -> (i32, i32, i32) {
    %c0_i32 = arith.constant 0 : i32
    %c0_i32_0 = arith.constant 0 : i32
    %c0_i32_1 = arith.constant 0 : i32
    return %arg0, %c0_i32, %c0_i32_0 : i32, i32, i32
  }
  func.func @transform_1(%arg0: i32) -> (i32, i32) {
    %c0_i32 = arith.constant 0 : i32
    %c0_i32_0 = arith.constant 0 : i32
    %c0_i32_1 = arith.constant 0 : i32
    return %c0_i32, %c0_i32_0 : i32, i32
  }
  func.func @transform_2(%arg0: i32) -> (i32, i32) {
    %c0_i32 = arith.constant 0 : i32
    %c0_i32_0 = arith.constant 0 : i32
    %c0_i32_1 = arith.constant 0 : i32
    return %c0_i32, %c0_i32_0 : i32, i32
  }
  func.func @transform_3(%arg0: i32) -> (i32, i32) {
    %c0_i32 = arith.constant 0 : i32
    %c0_i32_0 = arith.constant 0 : i32
    %c0_i32_1 = arith.constant 0 : i32
    return %c0_i32, %c0_i32_0 : i32, i32
  }
  func.func @transform_4(%arg0: i32) -> (i32, i32) {
    %c0_i32 = arith.constant 0 : i32
    %c0_i32_0 = arith.constant 0 : i32
    %c0_i32_1 = arith.constant 0 : i32
    return %c0_i32, %c0_i32_0 : i32, i32
  }
  func.func @transform_5(%arg0: i32) -> (i32, i32) {
    %c0_i32 = arith.constant 0 : i32
    %c0_i32_0 = arith.constant 0 : i32
    %c0_i32_1 = arith.constant 0 : i32
    return %c0_i32, %c0_i32_0 : i32, i32
  }
  func.func @transform_6(%arg0: i32) -> (i32, i32) {
    %c0_i32 = arith.constant 0 : i32
    %c0_i32_0 = arith.constant 0 : i32
    %c0_i32_1 = arith.constant 0 : i32
    return %c0_i32, %c0_i32_0 : i32, i32
  }
  func.func @transform_7(%arg0: i32) -> (i32, i32) {
    %c0_i32 = arith.constant 0 : i32
    %c0_i32_0 = arith.constant 0 : i32
    %c0_i32_1 = arith.constant 0 : i32
    return %c0_i32, %c0_i32_0 : i32, i32
  }
  func.func @transform_8(%arg0: i32) -> (i32, i32, i32) {
    %c0_i32 = arith.constant 0 : i32
    %c0_i32_0 = arith.constant 0 : i32
    %c0_i32_1 = arith.constant 0 : i32
    return %arg0, %c0_i32, %c0_i32_0 : i32, i32, i32
  }
}

module attributes {stable_mosaic.version = 11 : i64} {
  func.func @_mlp_block_kernel(%arg0: i32, %arg1: memref<1x17x256xbf16, #tpu.memory_space<vmem>>, %arg2: memref<1x256xf32, #tpu.memory_space<vmem>>, %arg3: memref<1x256xf32, #tpu.memory_space<vmem>>, %arg4: memref<256x1024xbf16, #tpu.memory_space<vmem>>, %arg5: memref<1x1024xf32, #tpu.memory_space<vmem>>, %arg6: memref<1024x256xbf16, #tpu.memory_space<vmem>>, %arg7: memref<1x256xf32, #tpu.memory_space<vmem>>, %arg8: memref<1x256xf32, #tpu.memory_space<vmem>>, %arg9: memref<1x17x256xbf16, #tpu.memory_space<vmem>>) attributes {dimension_semantics = [#tpu.dimension_semantics<parallel>], iteration_bounds = array<i64: 2>, scalar_prefetch = 0 : i64, scratch_operands = 0 : i64, tpu.core_type = #tpu.core_type<tc>, window_params = [{transform_indices = @transform_0, window_bounds = array<i64: 1, 17, 256>}, {pipeline_mode = #tpu.pipeline_mode<synchronous>, transform_indices = @transform_1, window_bounds = array<i64: 1, 256>}, {pipeline_mode = #tpu.pipeline_mode<synchronous>, transform_indices = @transform_2, window_bounds = array<i64: 1, 256>}, {pipeline_mode = #tpu.pipeline_mode<synchronous>, transform_indices = @transform_3, window_bounds = array<i64: 256, 1024>}, {pipeline_mode = #tpu.pipeline_mode<synchronous>, transform_indices = @transform_4, window_bounds = array<i64: 1, 1024>}, {pipeline_mode = #tpu.pipeline_mode<synchronous>, transform_indices = @transform_5, window_bounds = array<i64: 1024, 256>}, {pipeline_mode = #tpu.pipeline_mode<synchronous>, transform_indices = @transform_6, window_bounds = array<i64: 1, 256>}, {pipeline_mode = #tpu.pipeline_mode<synchronous>, transform_indices = @transform_7, window_bounds = array<i64: 1, 256>}, {transform_indices = @transform_8, window_bounds = array<i64: 1, 17, 256>}]} {
    %c0 = arith.constant 0 : index
    %c0_0 = arith.constant 0 : index
    %c0_1 = arith.constant 0 : index
    %0 = vector.load %arg1[%c0, %c0_0, %c0_1] : memref<1x17x256xbf16, #tpu.memory_space<vmem>>, vector<1x17x256xbf16>
    %1 = vector.shape_cast %0 : vector<1x17x256xbf16> to vector<17x256xbf16>
    %2 = arith.extf %1 : vector<17x256xbf16> to vector<17x256xf32>
    %c0_2 = arith.constant 0 : index
    %c0_3 = arith.constant 0 : index
    %3 = vector.load %arg2[%c0_2, %c0_3] : memref<1x256xf32, #tpu.memory_space<vmem>>, vector<1x256xf32>
    %c0_4 = arith.constant 0 : index
    %c0_5 = arith.constant 0 : index
    %4 = vector.load %arg3[%c0_4, %c0_5] : memref<1x256xf32, #tpu.memory_space<vmem>>, vector<1x256xf32>
    %cst = arith.constant dense<0.000000e+00> : vector<17xf32>
    %5 = vector.multi_reduction <add>, %2, %cst [1] : vector<17x256xf32> to vector<17xf32>
    %6 = vector.shape_cast %5 : vector<17xf32> to vector<17x1xf32>
    %cst_6 = arith.constant 2.560000e+02 : f32
    %7 = vector.broadcast %cst_6 : f32 to vector<17x1xf32>
    %8 = arith.divf %6, %7 : vector<17x1xf32>
    %9 = vector.broadcast %8 : vector<17x1xf32> to vector<17x256xf32>
    %10 = arith.subf %2, %9 : vector<17x256xf32>
    %11 = arith.mulf %10, %10 : vector<17x256xf32>
    %cst_7 = arith.constant dense<0.000000e+00> : vector<17xf32>
    %12 = vector.multi_reduction <add>, %11, %cst_7 [1] : vector<17x256xf32> to vector<17xf32>
    %13 = vector.shape_cast %12 : vector<17xf32> to vector<17x1xf32>
    %cst_8 = arith.constant 2.560000e+02 : f32
    %14 = vector.broadcast %cst_8 : f32 to vector<17x1xf32>
    %15 = arith.divf %13, %14 : vector<17x1xf32>
    %16 = vector.broadcast %8 : vector<17x1xf32> to vector<17x256xf32>
    %17 = arith.subf %2, %16 : vector<17x256xf32>
    %cst_9 = arith.constant 9.99999997E-7 : f32
    %18 = vector.broadcast %cst_9 : f32 to vector<17x1xf32>
    %19 = arith.addf %15, %18 : vector<17x1xf32>
    %20 = math.rsqrt %19 : vector<17x1xf32>
    %21 = vector.broadcast %20 : vector<17x1xf32> to vector<17x256xf32>
    %22 = arith.mulf %17, %21 : vector<17x256xf32>
    %23 = vector.broadcast %3 : vector<1x256xf32> to vector<17x256xf32>
    %24 = arith.mulf %22, %23 : vector<17x256xf32>
    %25 = vector.broadcast %4 : vector<1x256xf32> to vector<17x256xf32>
    %26 = arith.addf %24, %25 : vector<17x256xf32>
    %27 = arith.truncf %26 : vector<17x256xf32> to vector<17x256xbf16>
    %c0_10 = arith.constant 0 : index
    %c0_11 = arith.constant 0 : index
    %28 = vector.load %arg4[%c0_10, %c0_11] : memref<256x1024xbf16, #tpu.memory_space<vmem>>, vector<256x1024xbf16>
    %cst_12 = arith.constant dense<0.000000e+00> : vector<17x1024xf32>
    %29 = tpu.matmul %27, %28, %cst_12 {dimension_numbers = #tpu.dot_dimension_numbers<[1], [0], [0], [1], [0, 0, 1, 1], [], []>} : vector<17x256xbf16>, vector<256x1024xbf16>, vector<17x1024xf32> -> vector<17x1024xf32>
    %c0_13 = arith.constant 0 : index
    %c0_14 = arith.constant 0 : index
    %30 = vector.load %arg5[%c0_13, %c0_14] : memref<1x1024xf32, #tpu.memory_space<vmem>>, vector<1x1024xf32>
    %31 = vector.broadcast %30 : vector<1x1024xf32> to vector<17x1024xf32>
    %32 = arith.addf %29, %31 : vector<17x1024xf32>
    %33 = arith.mulf %32, %32 : vector<17x1024xf32>
    %34 = arith.mulf %32, %33 : vector<17x1024xf32>
    %cst_15 = arith.constant 4.471500e-02 : f32
    %35 = vector.broadcast %cst_15 : f32 to vector<17x1024xf32>
    %36 = arith.mulf %35, %34 : vector<17x1024xf32>
    %37 = arith.addf %32, %36 : vector<17x1024xf32>
    %cst_16 = arith.constant 0.797884583 : f32
    %38 = vector.broadcast %cst_16 : f32 to vector<17x1024xf32>
    %39 = arith.mulf %38, %37 : vector<17x1024xf32>
    %40 = math.tanh %39 : vector<17x1024xf32>
    %cst_17 = arith.constant 1.000000e+00 : f32
    %41 = vector.broadcast %cst_17 : f32 to vector<17x1024xf32>
    %42 = arith.addf %41, %40 : vector<17x1024xf32>
    %cst_18 = arith.constant 5.000000e-01 : f32
    %43 = vector.broadcast %cst_18 : f32 to vector<17x1024xf32>
    %44 = arith.mulf %43, %42 : vector<17x1024xf32>
    %45 = arith.mulf %32, %44 : vector<17x1024xf32>
    %46 = arith.truncf %45 : vector<17x1024xf32> to vector<17x1024xbf16>
    %c0_19 = arith.constant 0 : index
    %c0_20 = arith.constant 0 : index
    %47 = vector.load %arg6[%c0_19, %c0_20] : memref<1024x256xbf16, #tpu.memory_space<vmem>>, vector<1024x256xbf16>
    %cst_21 = arith.constant dense<0.000000e+00> : vector<17x256xf32>
    %48 = tpu.matmul %46, %47, %cst_21 {dimension_numbers = #tpu.dot_dimension_numbers<[1], [0], [0], [1], [0, 0, 1, 1], [], []>} : vector<17x1024xbf16>, vector<1024x256xbf16>, vector<17x256xf32> -> vector<17x256xf32>
    %c0_22 = arith.constant 0 : index
    %c0_23 = arith.constant 0 : index
    %49 = vector.load %arg7[%c0_22, %c0_23] : memref<1x256xf32, #tpu.memory_space<vmem>>, vector<1x256xf32>
    %50 = vector.broadcast %49 : vector<1x256xf32> to vector<17x256xf32>
    %51 = arith.addf %48, %50 : vector<17x256xf32>
    %c0_24 = arith.constant 0 : index
    %c0_25 = arith.constant 0 : index
    %52 = vector.load %arg8[%c0_24, %c0_25] : memref<1x256xf32, #tpu.memory_space<vmem>>, vector<1x256xf32>
    %53 = vector.broadcast %52 : vector<1x256xf32> to vector<17x256xf32>
    %54 = arith.mulf %53, %51 : vector<17x256xf32>
    %55 = arith.addf %2, %54 : vector<17x256xf32>
    %56 = arith.truncf %55 : vector<17x256xf32> to vector<17x256xbf16>
    %c0_26 = arith.constant 0 : index
    %c0_27 = arith.constant 0 : index
    %c0_28 = arith.constant 0 : index
    %57 = vector.load %arg9[%c0_26, %c0_27, %c0_28] : memref<1x17x256xbf16, #tpu.memory_space<vmem>>, vector<1x17x256xbf16>
    %58 = vector.shape_cast %57 : vector<1x17x256xbf16> to vector<17x256xbf16>
    %59 = vector.shape_cast %56 : vector<17x256xbf16> to vector<1x17x256xbf16>
    tpu.vector_store %arg9[%c0_26, %c0_27, %c0_28], %59 {strides = array<i32>} : memref<1x17x256xbf16, #tpu.memory_space<vmem>>, vector<1x17x256xbf16>,
    return
  }
  func.func @transform_0(%arg0: i32) -> (i32, i32, i32) {
    %c0_i32 = arith.constant 0 : i32
    %c0_i32_0 = arith.constant 0 : i32
    %c0_i32_1 = arith.constant 0 : i32
    return %arg0, %c0_i32, %c0_i32_0 : i32, i32, i32
  }
  func.func @transform_1(%arg0: i32) -> (i32, i32) {
    %c0_i32 = arith.constant 0 : i32
    %c0_i32_0 = arith.constant 0 : i32
    %c0_i32_1 = arith.constant 0 : i32
    return %c0_i32, %c0_i32_0 : i32, i32
  }
  func.func @transform_2(%arg0: i32) -> (i32, i32) {
    %c0_i32 = arith.constant 0 : i32
    %c0_i32_0 = arith.constant 0 : i32
    %c0_i32_1 = arith.constant 0 : i32
    return %c0_i32, %c0_i32_0 : i32, i32
  }
  func.func @transform_3(%arg0: i32) -> (i32, i32) {
    %c0_i32 = arith.constant 0 : i32
    %c0_i32_0 = arith.constant 0 : i32
    %c0_i32_1 = arith.constant 0 : i32
    return %c0_i32, %c0_i32_0 : i32, i32
  }
  func.func @transform_4(%arg0: i32) -> (i32, i32) {
    %c0_i32 = arith.constant 0 : i32
    %c0_i32_0 = arith.constant 0 : i32
    %c0_i32_1 = arith.constant 0 : i32
    return %c0_i32, %c0_i32_0 : i32, i32
  }
  func.func @transform_5(%arg0: i32) -> (i32, i32) {
    %c0_i32 = arith.constant 0 : i32
    %c0_i32_0 = arith.constant 0 : i32
    %c0_i32_1 = arith.constant 0 : i32
    return %c0_i32, %c0_i32_0 : i32, i32
  }
  func.func @transform_6(%arg0: i32) -> (i32, i32) {
    %c0_i32 = arith.constant 0 : i32
    %c0_i32_0 = arith.constant 0 : i32
    %c0_i32_1 = arith.constant 0 : i32
    return %c0_i32, %c0_i32_0 : i32, i32
  }
  func.func @transform_7(%arg0: i32) -> (i32, i32) {
    %c0_i32 = arith.constant 0 : i32
    %c0_i32_0 = arith.constant 0 : i32
    %c0_i32_1 = arith.constant 0 : i32
    return %c0_i32, %c0_i32_0 : i32, i32
  }
  func.func @transform_8(%arg0: i32) -> (i32, i32, i32) {
    %c0_i32 = arith.constant 0 : i32
    %c0_i32_0 = arith.constant 0 : i32
    %c0_i32_1 = arith.constant 0 : i32
    return %arg0, %c0_i32, %c0_i32_0 : i32, i32, i32
  }
}

module attributes {stable_mosaic.version = 11 : i64} {
  func.func @_final_ln_kernel(%arg0: i32, %arg1: memref<1x17x256xbf16, #tpu.memory_space<vmem>>, %arg2: memref<1x256xf32, #tpu.memory_space<vmem>>, %arg3: memref<1x256xf32, #tpu.memory_space<vmem>>, %arg4: memref<1x17x256xf32, #tpu.memory_space<vmem>>) attributes {dimension_semantics = [#tpu.dimension_semantics<parallel>], iteration_bounds = array<i64: 2>, scalar_prefetch = 0 : i64, scratch_operands = 0 : i64, tpu.core_type = #tpu.core_type<tc>, window_params = [{transform_indices = @transform_0, window_bounds = array<i64: 1, 17, 256>}, {pipeline_mode = #tpu.pipeline_mode<synchronous>, transform_indices = @transform_1, window_bounds = array<i64: 1, 256>}, {pipeline_mode = #tpu.pipeline_mode<synchronous>, transform_indices = @transform_2, window_bounds = array<i64: 1, 256>}, {transform_indices = @transform_3, window_bounds = array<i64: 1, 17, 256>}]} {
    %c0 = arith.constant 0 : index
    %c0_0 = arith.constant 0 : index
    %c0_1 = arith.constant 0 : index
    %0 = vector.load %arg1[%c0, %c0_0, %c0_1] : memref<1x17x256xbf16, #tpu.memory_space<vmem>>, vector<1x17x256xbf16>
    %1 = vector.shape_cast %0 : vector<1x17x256xbf16> to vector<17x256xbf16>
    %2 = arith.extf %1 : vector<17x256xbf16> to vector<17x256xf32>
    %c0_2 = arith.constant 0 : index
    %c0_3 = arith.constant 0 : index
    %3 = vector.load %arg2[%c0_2, %c0_3] : memref<1x256xf32, #tpu.memory_space<vmem>>, vector<1x256xf32>
    %c0_4 = arith.constant 0 : index
    %c0_5 = arith.constant 0 : index
    %4 = vector.load %arg3[%c0_4, %c0_5] : memref<1x256xf32, #tpu.memory_space<vmem>>, vector<1x256xf32>
    %cst = arith.constant dense<0.000000e+00> : vector<17xf32>
    %5 = vector.multi_reduction <add>, %2, %cst [1] : vector<17x256xf32> to vector<17xf32>
    %6 = vector.shape_cast %5 : vector<17xf32> to vector<17x1xf32>
    %cst_6 = arith.constant 2.560000e+02 : f32
    %7 = vector.broadcast %cst_6 : f32 to vector<17x1xf32>
    %8 = arith.divf %6, %7 : vector<17x1xf32>
    %9 = vector.broadcast %8 : vector<17x1xf32> to vector<17x256xf32>
    %10 = arith.subf %2, %9 : vector<17x256xf32>
    %11 = arith.mulf %10, %10 : vector<17x256xf32>
    %cst_7 = arith.constant dense<0.000000e+00> : vector<17xf32>
    %12 = vector.multi_reduction <add>, %11, %cst_7 [1] : vector<17x256xf32> to vector<17xf32>
    %13 = vector.shape_cast %12 : vector<17xf32> to vector<17x1xf32>
    %cst_8 = arith.constant 2.560000e+02 : f32
    %14 = vector.broadcast %cst_8 : f32 to vector<17x1xf32>
    %15 = arith.divf %13, %14 : vector<17x1xf32>
    %16 = vector.broadcast %8 : vector<17x1xf32> to vector<17x256xf32>
    %17 = arith.subf %2, %16 : vector<17x256xf32>
    %cst_9 = arith.constant 9.99999997E-7 : f32
    %18 = vector.broadcast %cst_9 : f32 to vector<17x1xf32>
    %19 = arith.addf %15, %18 : vector<17x1xf32>
    %20 = math.rsqrt %19 : vector<17x1xf32>
    %21 = vector.broadcast %20 : vector<17x1xf32> to vector<17x256xf32>
    %22 = arith.mulf %17, %21 : vector<17x256xf32>
    %23 = vector.broadcast %3 : vector<1x256xf32> to vector<17x256xf32>
    %24 = arith.mulf %22, %23 : vector<17x256xf32>
    %25 = vector.broadcast %4 : vector<1x256xf32> to vector<17x256xf32>
    %26 = arith.addf %24, %25 : vector<17x256xf32>
    %c0_10 = arith.constant 0 : index
    %c0_11 = arith.constant 0 : index
    %c0_12 = arith.constant 0 : index
    %27 = vector.load %arg4[%c0_10, %c0_11, %c0_12] : memref<1x17x256xf32, #tpu.memory_space<vmem>>, vector<1x17x256xf32>
    %28 = vector.shape_cast %27 : vector<1x17x256xf32> to vector<17x256xf32>
    %29 = vector.shape_cast %26 : vector<17x256xf32> to vector<1x17x256xf32>
    tpu.vector_store %arg4[%c0_10, %c0_11, %c0_12], %29 {strides = array<i32>} : memref<1x17x256xf32, #tpu.memory_space<vmem>>, vector<1x17x256xf32>,
    return
  }
  func.func @transform_0(%arg0: i32) -> (i32, i32, i32) {
    %c0_i32 = arith.constant 0 : i32
    %c0_i32_0 = arith.constant 0 : i32
    %c0_i32_1 = arith.constant 0 : i32
    return %arg0, %c0_i32, %c0_i32_0 : i32, i32, i32
  }
  func.func @transform_1(%arg0: i32) -> (i32, i32) {
    %c0_i32 = arith.constant 0 : i32
    %c0_i32_0 = arith.constant 0 : i32
    %c0_i32_1 = arith.constant 0 : i32
    return %c0_i32, %c0_i32_0 : i32, i32
  }
  func.func @transform_2(%arg0: i32) -> (i32, i32) {
    %c0_i32 = arith.constant 0 : i32
    %c0_i32_0 = arith.constant 0 : i32
    %c0_i32_1 = arith.constant 0 : i32
    return %c0_i32, %c0_i32_0 : i32, i32
  }
  func.func @transform_3(%arg0: i32) -> (i32, i32, i32) {
    %c0_i32 = arith.constant 0 : i32
    %c0_i32_0 = arith.constant 0 : i32
    %c0_i32_1 = arith.constant 0 : i32
    return %arg0, %c0_i32, %c0_i32_0 : i32, i32, i32
  }
}

</mosaic_0001>

<bundles_post_ra>
// kernel: dinov2_last_hidden_state.6
= control target key start
LH: loop header
LB: loop body
LE: loop exit
PB: predicated region body
PF: predicated region fallthrough
CT: control target
= control target key end

     0   :  { %s700_s12 = smov 0   ;;  %s861_s0 = inlined_call_operand.vmem [shape: bf16[2,17,256], index: 0, kind: input, shape index: {}]   ;;  %s862_s1 = inlined_call_operand.vmem [shape: bf16[256,256], index: 1, kind: input, shape index: {}]   ;;  %s863_s2 = inlined_call_operand.vmem [shape: f32[17,256], index: 2, kind: input, shape index: {}]   ;;  %s864_s3 = inlined_call_operand.vmem [shape: bf16[2,17,256], index: 3, kind: output, shape index: {}]  }
   0x1 LB: > { %s527_s13 = sadd.s32 4294967295, %s678_s12   ;;  %p531_p0 = scmp.ge.s32.totalorder %s678_s12, 1  ;;  %s678_s12 = sphi %s700_s12, %s13_s12  }
   0x2   : > { %p137_p1 = scmp.lt.s32.totalorder %s678_s12, 3 }
   0x4   : > { %p138_p2 = pnand %p531_p0, %p137_p1 }
   0x5   : > { %v619_v0 = vld [vmem:[%s862_s1 + $0x4] ss:$8 sps:$4 sm:$0xff] (!%p138_p2)   ;;  %v621_v1 = vld [vmem:[%s862_s1] ss:$8 sps:$4 sm:$0xff] (!%p138_p2)   ;;  %v622_v2 = vld [vmem:[%s862_s1 + $0x14] ss:$8 sps:$4 sm:$0xff] (!%p138_p2)  }
   0x6   : > { %141 = sbr.rel (%p138_p2) target bundleno = 290 (0x122), region = 32  ;;  %389 = vmatprep.subr.bf16.mxu0 (!%p138_p2), %v619_v0  ;;  %578 = vmatprep.subr.bf16.mxu1 (!%p138_p2), %v619_v0  ;;  %v624_v3 = vld [vmem:[%s862_s1 + $0x10] ss:$8 sps:$4 sm:$0xff] (!%p138_p2)   ;;  %v625_v4 = vld [vmem:[%s862_s1 + $0x24] ss:$8 sps:$4 sm:$0xff] (!%p138_p2)   ;;  %p161_p3 = scmp.lt.s32.totalorder (!%p138_p2), %s527_s13, 1 }
   0x7   : > { %390 = vmatpush1.bf16.msra.mxu0 (!%p138_p2), %v621_v1  ;;  %594 = vmatpush1.bf16.msra.mxu1 (!%p138_p2), %v621_v1  ;;  %v627_v5 = vld [vmem:[%s862_s1 + $0x20] ss:$8 sps:$4 sm:$0xff] (!%p138_p2)   ;;  %v628_v6 = vld [vmem:[%s862_s1 + $0x34] ss:$8 sps:$4 sm:$0xff] (!%p138_p2)   ;;  %v630_v7 = vld [vmem:[%s862_s1 + $0x30] ss:$8 sps:$4 sm:$0xff] (!%p138_p2)  }
   0x8   : > { %391 = vmatprep.subr.bf16.mxu0 (!%p138_p2), %v622_v2  ;;  %579 = vmatprep.subr.bf16.mxu1 (!%p138_p2), %v622_v2  ;;  %v631_v8 = vld [vmem:[%s862_s1 + $0x44] ss:$8 sps:$4 sm:$0xff] (!%p138_p2)   ;;  %v633_v9 = vld [vmem:[%s862_s1 + $0x40] ss:$8 sps:$4 sm:$0xff] (!%p138_p2)   ;;  %v634_v10 = vld [vmem:[%s862_s1 + $0x54] ss:$8 sps:$4 sm:$0xff] (!%p138_p2)  }
   0x9   : > { %v636_v11 = vld [vmem:[%s862_s1 + $0x50] ss:$8 sps:$4 sm:$0xff] (!%p138_p2)   ;;  %v637_v12 = vld [vmem:[%s862_s1 + $0x64] ss:$8 sps:$4 sm:$0xff] (!%p138_p2)   ;;  %v639_v15 = vld [vmem:[%s862_s1 + $0x60] ss:$8 sps:$4 sm:$0xff] (!%p138_p2)  }
   0xa   : > { %v640_v17 = vld [vmem:[%s862_s1 + $0x74] ss:$8 sps:$4 sm:$0xff] (!%p138_p2)   ;;  %v642_v18 = vld [vmem:[%s862_s1 + $0x70] ss:$8 sps:$4 sm:$0xff] (!%p138_p2)   ;;  %v643_v19 = vld [vmem:[%s862_s1 + $0x84] ss:$8 sps:$4 sm:$0xff] (!%p138_p2)  }
   0xb   : > { %392 = vmatpush1.bf16.msra.mxu0 (!%p138_p2), %v624_v3  ;;  %595 = vmatpush1.bf16.msra.mxu1 (!%p138_p2), %v624_v3  ;;  %v645_v20 = vld [vmem:[%s862_s1 + $0x80] ss:$8 sps:$4 sm:$0xff] (!%p138_p2)   ;;  %v646_v21 = vld [vmem:[%s862_s1 + $0x94] ss:$8 sps:$4 sm:$0xff] (!%p138_p2)   ;;  %v648_v22 = vld [vmem:[%s862_s1 + $0x90] ss:$8 sps:$4 sm:$0xff] (!%p138_p2)  }
   0xc   : > { %393 = vmatprep.subr.bf16.mxu0 (!%p138_p2), %v625_v4  ;;  %580 = vmatprep.subr.bf16.mxu1 (!%p138_p2), %v625_v4  ;;  %v649_v23 = vld [vmem:[%s862_s1 + $0xa4] ss:$8 sps:$4 sm:$0xff] (!%p138_p2)   ;;  %v651_v24 = vld [vmem:[%s862_s1 + $0xa0] ss:$8 sps:$4 sm:$0xff] (!%p138_p2)   ;;  %v652_v25 = vld [vmem:[%s862_s1 + $0xb4] ss:$8 sps:$4 sm:$0xff] (!%p138_p2)  }
   0xd   : > { %s870_s13 = smov (!%p161_p3, %s527_s13), 1  ;;  %v654_v26 = vld [vmem:[%s862_s1 + $0xb0] ss:$8 sps:$4 sm:$0xff]   ;;  %v655_v27 = vld [vmem:[%s862_s1 + $0xc4] ss:$8 sps:$4 sm:$0xff]   ;;  %vm462_vm0 = vcmask 1040384  }
   0xe   : > { %s610_s7 = smul.u32 24, %s870_s13  ;;  %v657_v28 = vld [vmem:[%s862_s1 + $0xc0] ss:$8 sps:$4 sm:$0xff]   ;;  %v658_v29 = vld [vmem:[%s862_s1 + $0xd4] ss:$8 sps:$4 sm:$0xff]   ;;  %vm465_vm2 = vcmask 1044484  }
   0xf   : > { %394 = vmatpush1.bf16.msra.mxu0 %v627_v5  ;;  %596 = vmatpush1.bf16.msra.mxu1 %v627_v5  ;;  %v660_v30 = vld [vmem:[%s862_s1 + $0xd0] ss:$8 sps:$4 sm:$0xff]   ;;  %v661_v31 = vld [vmem:[%s862_s1 + $0xe4] ss:$8 sps:$4 sm:$0xff]   ;;  %v663_v32 = vld [vmem:[%s862_s1 + $0xe0] ss:$8 sps:$4 sm:$0xff]  }
  0x10   : > { %395 = vmatprep.subr.bf16.mxu0 %v628_v6  ;;  %581 = vmatprep.subr.bf16.mxu1 %v628_v6  ;;  %s752_s16 = scalar_lea.vmem %s861_s0, %s610_s7  ;;  %v664_v33 = vld [vmem:[%s862_s1 + $0xf4] ss:$8 sps:$4 sm:$0xff]   ;;  %v666_v34 = vld [vmem:[%s862_s1 + $0xf0] ss:$8 sps:$4 sm:$0xff]   ;;  %vm463_vm1 = vsmask.f32 256  ;;  %s170_s20 = scalar_lea.vmem %s864_s3, %s610_s7 }
  0x11   : > { %v669_v13 = vld [vmem:[%s752_s16 + $0x4] ss:$8 sps:$4 sm:$0xff]   ;;  %v759_v14 = vld [vmem:[%s752_s16 + $0x10] sm:$0x11]  ;;  %v667_v35 = vld [vmem:[%s752_s16] ss:$8 sps:$4 sm:$0xff]  }
  0x12   : > { %v537_v16 = vcombine.high %v759_v14, %v759_v14  ;;  %421 = vmatprep.mubr.bf16.mxu0 %v669_v13  ;;  %v536_v36 = vcombine.low %v759_v14, %v759_v14  ;;  %vm466_vm3 = vsmask.f32 4352  ;;  %v206_v37 = vld [vmem:[%s863_s2] sm:$0xff]  ;;  %v207_v39 = vld [vmem:[%s863_s2 + $0x8] sm:$0xff]  ;;  %vm835_vm4 = vmand %vm462_vm0, %vm463_vm1 }
  0x13   : > { %396 = vmatpush1.bf16.msra.mxu0 %v630_v7  ;;  %597 = vmatpush1.bf16.msra.mxu1 %v630_v7  ;;  %v210_v38 = vld [vmem:[%s863_s2 + $0x20] sm:$0x1]  ;;  %v211_v40 = vld [vmem:[%s863_s2 + $0x28] sm:$0x1]  ;;  %vm844_vm5 = vmand %vm465_vm2, %vm466_vm3 }
  0x14   : > { %397 = vmatprep.subr.bf16.mxu0 %v631_v8  ;;  %582 = vmatprep.subr.bf16.mxu1 %v631_v8  ;;  %v208_v45 = vld [vmem:[%s863_s2 + $0x10] sm:$0xff]  ;;  %v209_v50 = vld [vmem:[%s863_s2 + $0x18] sm:$0xff]  ;;  %vm468_vm6 = vmor %vm844_vm5, %vm835_vm4 }
  0x15   : > { %431 = vmatprep.mubr.bf16.mxu1 %v537_v16  ;;  %v469_v55 = vld [vmem:[%s170_s20 + $0x10] sm:$0x11] }
  0x17   : > { %398 = vmatpush1.bf16.msra.mxu0 %v633_v9  ;;  %598 = vmatpush1.bf16.msra.mxu1 %v633_v9 }
  0x18   : > { %399 = vmatprep.subr.bf16.mxu0 %v634_v10  ;;  %583 = vmatprep.subr.bf16.mxu1 %v634_v10 }
  0x1b   : > { %400 = vmatpush1.bf16.msra.mxu0 %v636_v11  ;;  %599 = vmatpush1.bf16.msra.mxu1 %v636_v11 }
  0x1c   : > { %401 = vmatprep.subr.bf16.mxu0 %v637_v12  ;;  %584 = vmatprep.subr.bf16.mxu1 %v637_v12 }
  0x1f   : > { %402 = vmatpush1.bf16.msra.mxu0 %v639_v15  ;;  %600 = vmatpush1.bf16.msra.mxu1 %v639_v15 }
  0x20   : > { %403 = vmatprep.subr.bf16.mxu0 %v640_v17  ;;  %585 = vmatprep.subr.bf16.mxu1 %v640_v17 }
  0x23   : > { %404 = vmatpush1.bf16.msra.mxu0 %v642_v18  ;;  %601 = vmatpush1.bf16.msra.mxu1 %v642_v18 }
  0x24   : > { %405 = vmatprep.subr.bf16.mxu0 %v643_v19  ;;  %586 = vmatprep.subr.bf16.mxu1 %v643_v19 }
  0x27   : > { %406 = vmatpush1.bf16.msra.mxu0 %v645_v20  ;;  %602 = vmatpush1.bf16.msra.mxu1 %v645_v20 }
  0x28   : > { %407 = vmatprep.subr.bf16.mxu0 %v646_v21  ;;  %587 = vmatprep.subr.bf16.mxu1 %v646_v21 }
  0x2b   : > { %408 = vmatpush1.bf16.msra.mxu0 %v648_v22  ;;  %603 = vmatpush1.bf16.msra.mxu1 %v648_v22 }
  0x2c   : > { %409 = vmatprep.subr.bf16.mxu0 %v649_v23  ;;  %588 = vmatprep.subr.bf16.mxu1 %v649_v23 }
  0x2f   : > { %410 = vmatpush1.bf16.msra.mxu0 %v651_v24  ;;  %604 = vmatpush1.bf16.msra.mxu1 %v651_v24 }
  0x30   : > { %411 = vmatprep.subr.bf16.mxu0 %v652_v25  ;;  %589 = vmatprep.subr.bf16.mxu1 %v652_v25 }
  0x33   : > { %412 = vmatpush1.bf16.msra.mxu0 %v654_v26  ;;  %605 = vmatpush1.bf16.msra.mxu1 %v654_v26 }
  0x34   : > { %413 = vmatprep.subr.bf16.mxu0 %v655_v27  ;;  %590 = vmatprep.subr.bf16.mxu1 %v655_v27 }
  0x37   : > { %414 = vmatpush1.bf16.msra.mxu0 %v657_v28  ;;  %606 = vmatpush1.bf16.msra.mxu1 %v657_v28 }
  0x38   : > { %415 = vmatprep.subr.bf16.mxu0 %v658_v29  ;;  %591 = vmatprep.subr.bf16.mxu1 %v658_v29 }
  0x3b   : > { %416 = vmatpush1.bf16.msra.mxu0 %v660_v30  ;;  %607 = vmatpush1.bf16.msra.mxu1 %v660_v30 }
  0x3c   : > { %417 = vmatprep.subr.bf16.mxu0 %v661_v31  ;;  %592 = vmatprep.subr.bf16.mxu1 %v661_v31 }
  0x3f   : > { %418 = vmatpush1.bf16.msra.mxu0 %v663_v32  ;;  %608 = vmatpush1.bf16.msra.mxu1 %v663_v32 }
  0x40   : > { %419 = vmatprep.subr.bf16.mxu0 %v664_v33  ;;  %593 = vmatprep.subr.bf16.mxu1 %v664_v33 }
  0x43   : > { %420 = vmatpush1.bf16.msra.mxu0 %v666_v34  ;;  %609 = vmatpush1.bf16.msra.mxu1 %v666_v34 }
  0x46   : > { %422 = vmatmul.mubr.bf16.vlgmr.msra.gmra.mrb[0].mxu0 %v667_v35  ;;  %432 = vmatmul.mubr.bf16.vlgmr.msra.gmra.mrb[0].mxu1 %v536_v36 }
 0x119   : > { %v423_v42 = vpop.f32.mrb[0].mxu0  ;;  %v433_v43 = vpop.f32.mrb[0].mxu1 }
 0x11a   : > { %v424_v46 = vadd.f32 %v423_v42, %v206_v37  ;;  %v434_v47 = vadd.f32 %v433_v43, %v210_v38  ;;  %v425_v48 = vpop.f32.mrb[1].mxu0  ;;  %v435_v49 = vpop.f32.mrb[1].mxu1 }
 0x11b   : > { %v426_v51 = vadd.f32 %v425_v48, %v207_v39  ;;  %v436_v52 = vadd.f32 %v435_v49, %v211_v40  ;;  %v427_v53 = vpop.f32.mrb[2].mxu0  ;;  %v437_v54 = vpop.f32.mrb[2].mxu1 }
 0x11c   : > { %v428_v56 = vadd.f32 %v427_v53, %v208_v45  ;;  %v429_v57 = vpop.f32.mrb[3].mxu0  ;;  %v438_v58 = vpop.f32.mrb[3].mxu1 }
 0x11d   : > { %v575_v59 = vpack.c.bf16 %v426_v51, %v424_v46  ;;  %v577_v60 = vpack.c.bf16 %v436_v52, %v434_v47  ;;  %v430_v61 = vadd.f32 %v429_v57, %v209_v50 }
 0x11f   : > { %460 = vst [vmem:[%s170_s20] sm:$0xff] %v575_v59  ;;  %v470_v62 = vsel %vm468_vm6, %v577_v60, %v469_v55  ;;  %v576_v63 = vpack.c.bf16 %v430_v61, %v428_v56 }
 0x120   : > { %471 = vst [vmem:[%s170_s20 + $0x10] sm:$0x11] %v470_v62 }
 0x121   : > { %461 = vst [vmem:[%s170_s20 + $0x8] sm:$0xff] %v576_v63 }
 0x122 PF: > { %s13_s12 = sadd.s32 1, %s678_s12  }
 0x123   : > { %p10_p4 = scmp.ge.s32.totalorder %s13_s12, 4  }
 0x125   :  { %12 = sbr.rel (!%p10_p4) target bundleno = 1 (0x1), region = 62 }

// kernel: dinov2_last_hidden_state.11
= control target key start
LH: loop header
LB: loop body
LE: loop exit
PB: predicated region body
PF: predicated region fallthrough
CT: control target
= control target key end

     0   :  { %s384_s12 = smov 0   ;;  %s415_s0 = inlined_call_operand.vmem [shape: bf16[2,17,256], index: 0, kind: input, shape index: {}]   ;;  %s416_s1 = inlined_call_operand.vmem [shape: f32[1,256], index: 1, kind: input, shape index: {}]   ;;  %s417_s2 = inlined_call_operand.vmem [shape: f32[1,256], index: 2, kind: input, shape index: {}]   ;;  %s418_s3 = inlined_call_operand.vmem [shape: f32[2,17,256], index: 3, kind: output, shape index: {}]  }
   0x1 LB: > { %s331_s13 = sadd.s32 4294967295, %s362_s12   ;;  %p335_p0 = scmp.ge.s32.totalorder %s362_s12, 1  ;;  %s362_s12 = sphi %s384_s12, %s13_s12  }
   0x2   : > { %p137_p1 = scmp.lt.s32.totalorder %s362_s12, 3 }
   0x4   : > { %p138_p2 = pnand %p335_p0, %p137_p1 }
   0x5   : > { %p161_p3 = scmp.lt.s32.totalorder (!%p138_p2), %s331_s13, 1  ;;  %vm188_vm0 = vcmask (!%p138_p2), 1040384   ;;  %v237_v39 = vlaneseq (!%p138_p2)  ;;  %v180_v49 = vld [vmem:[%s416_s1] sm:$0x3] (!%p138_p2) }
   0x6   : > { %141 = sbr.rel (%p138_p2) target bundleno = 345 (0x159), region = 32  ;;  %v181_v51 = vld [vmem:[%s417_s2] sm:$0x3] (!%p138_p2) }
   0x7   : > { %v238_v42 = vshrl.u32 (!%p138_p2), %v237_v39, 7 }
   0x9   : > { %v239_v46 = vsub.s32 (!%p138_p2), 0, %v238_v42  ;;  %v243_v47 = vsub.s32 (!%p138_p2), 1, %v238_v42 }
   0xb   : > { %v240_v52 = vrot.slane (!%p138_p2), %v180_v49, %v239_v46  ;;  %v244_v53 = vrot.slane (!%p138_p2), %v180_v49, %v243_v47  ;;  %v257_v55 = vrot.slane (!%p138_p2), %v181_v51, %v239_v46  ;;  %v261_v56 = vrot.slane (!%p138_p2), %v181_v51, %v243_v47 }
   0xd   : > { %s420_s13 = smov (!%p161_p3, %s331_s13), 1 }
   0xe   : > { %s340_s14 = smul.u32 24, %s420_s13 }
   0xf   : > { %s341_s22 = smul.u32 48, %s420_s13 }
  0x10   : > { %s165_s17 = scalar_lea.vmem %s415_s0, %s340_s14 }
  0x11   : > { %v172_v0 = vld [vmem:[%s165_s17 + $0x8] sm:$0xff]  ;;  %v173_v1 = vld [vmem:[%s165_s17 + $0x10] sm:$0x11]  ;;  %v171_v2 = vld [vmem:[%s165_s17] sm:$0xff]  ;;  %s170_s25 = scalar_lea.vmem %s418_s3, %s341_s22 }
  0x12   : > { %v176_v3 = vunpack.c.l.bf16 %v172_v0  ;;  %v177_v4 = vunpack.c.h.bf16 %v172_v0  ;;  %v178_v5 = vunpack.c.l.bf16 %v173_v1  ;;  %v179_v6 = vunpack.c.h.bf16 %v173_v1 }
  0x13   : > { %v174_v7 = vunpack.c.l.bf16 %v171_v2  ;;  %v175_v8 = vunpack.c.h.bf16 %v171_v2 }
  0x14   : > { %v185_v9 = vadd.f32 %v177_v4, %v176_v3  ;;  %v189_v10 = vsel %vm188_vm0, %v178_v5, 0.0  ;;  %v190_v11 = vsel %vm188_vm0, %v179_v6, 0.0 }
  0x15   : > { %v191_v12 = vadd.f32 %v190_v11, %v189_v10  ;;  %v182_v13 = vadd.f32 %v175_v8, %v174_v7 }
  0x16   : > { %186 = vadd.xlane.f32.xlu1 %v185_v9 }
  0x17   : > { %192 = vadd.xlane.f32.xlu0 %v191_v12 }
  0x1b   : > { %183 = vadd.xlane.f32.xlu0 %v182_v13 }
  0xa3   : > { %v187_v14 = vpop.xlane.xlu1 %186 }
  0xa4   : > { %v196_v15 = vmul.f32 0.00390625, %v187_v14  ;;  %v193_v16 = vpop.xlane.xlu0 %192 }
  0xa5   : > { %v197_v17 = vmul.f32 0.00390625, %v193_v16 }
  0xa6   : > { %v200_v18 = vsub.f32 %v176_v3, %v196_v15  ;;  %v201_v19 = vsub.f32 %v177_v4, %v196_v15 }
  0xa7   : > { %v202_v20 = vsub.f32 %v178_v5, %v197_v17  ;;  %v203_v21 = vsub.f32 %v179_v6, %v197_v17 }
  0xa8   : > { %v184_v22 = vpop.xlane.xlu0 %183  ;;  %v206_v23 = vmul.f32 %v200_v18, %v200_v18  ;;  %v207_v24 = vmul.f32 %v201_v19, %v201_v19 }
  0xa9   : > { %v195_v25 = vmul.f32 0.00390625, %v184_v22  ;;  %v208_v29 = vmul.f32 %v202_v20, %v202_v20  ;;  %v209_v30 = vmul.f32 %v203_v21, %v203_v21 }
  0xaa   : > { %v213_v26 = vadd.f32 %v207_v24, %v206_v23 }
  0xab   : > { %v198_v27 = vsub.f32 %v174_v7, %v195_v25  ;;  %v199_v28 = vsub.f32 %v175_v8, %v195_v25  ;;  %v216_v34 = vsel %vm188_vm0, %v208_v29, 0.0  ;;  %v217_v35 = vsel %vm188_vm0, %v209_v30, 0.0 }
  0xac   : > { %214 = vadd.xlane.f32.xlu0 %v213_v26  ;;  %v218_v36 = vadd.f32 %v217_v35, %v216_v34 }
  0xad   : > { %v204_v31 = vmul.f32 %v198_v27, %v198_v27  ;;  %v205_v32 = vmul.f32 %v199_v28, %v199_v28 }
  0xaf   : > { %v210_v33 = vadd.f32 %v205_v32, %v204_v31 }
  0xb1   : > { %211 = vadd.xlane.f32.xlu1 %v210_v33 }
  0xb5   : > { %219 = vadd.xlane.f32.xlu1 %v218_v36 }
 0x139   : > { %v215_v37 = vpop.xlane.xlu0 %214 }
 0x13a   : > { %v222_v38 = vmul.f32 0.00390625, %v215_v37 }
 0x13c   : > { %v225_v40 = vadd.f32 1e-06, %v222_v38 }
 0x13e   : > { %350 = vrsqrt.f32 %v225_v40  ;;  %v212_v41 = vpop.xlane.xlu1 %211 }
 0x13f   : > { %v221_v43 = vmul.f32 0.00390625, %v212_v41 }
 0x141   : > { %v224_v44 = vadd.f32 1e-06, %v221_v43 }
 0x142   : > { %v220_v45 = vpop.xlane.xlu1 %219 }
 0x143   : > { %352 = vrsqrt.f32 %v224_v44  ;;  %v223_v48 = vmul.f32 0.00390625, %v220_v45 }
 0x145   : > { %v226_v50 = vadd.f32 1e-06, %v223_v48 }
 0x147   : > { %354 = vrsqrt.f32 %v226_v50 }
 0x148   : > { %v351_v54 = vpop.eup %350 }
 0x149   : > { %v232_v57 = vmul.f32 %v351_v54, %v200_v18  ;;  %v233_v58 = vmul.f32 %v351_v54, %v201_v19 }
 0x14b   : > { %v249_v59 = vmul.f32 %v240_v52, %v232_v57  ;;  %v250_v60 = vmul.f32 %v244_v53, %v233_v58 }
 0x14d   : > { %v353_v61 = vpop.eup %352  ;;  %v266_v62 = vadd.f32 %v257_v55, %v249_v59  ;;  %v267_v63 = vadd.f32 %v261_v56, %v250_v60 }
 0x14e   : > { %v230_v0 = vmul.f32 %v353_v61, %v198_v27  ;;  %v231_v1 = vmul.f32 %v353_v61, %v199_v28 }
 0x14f   : > { %272 = vst [vmem:[%s170_s25 + $0x10] sm:$0xff] %v266_v62  ;;  %273 = vst [vmem:[%s170_s25 + $0x18] sm:$0xff] %v267_v63 }
 0x150   : > { %v247_v2 = vmul.f32 %v240_v52, %v230_v0  ;;  %v248_v3 = vmul.f32 %v244_v53, %v231_v1 }
 0x151   : > { %v355_v4 = vpop.eup %354 }
 0x152   : > { %v264_v5 = vadd.f32 %v257_v55, %v247_v2  ;;  %v265_v6 = vadd.f32 %v261_v56, %v248_v3  ;;  %v234_v7 = vmul.f32 %v355_v4, %v202_v20  ;;  %v235_v8 = vmul.f32 %v355_v4, %v203_v21 }
 0x154   : > { %270 = vst [vmem:[%s170_s25] sm:$0xff] %v264_v5  ;;  %271 = vst [vmem:[%s170_s25 + $0x8] sm:$0xff] %v265_v6  ;;  %v251_v9 = vmul.f32 %v240_v52, %v234_v7  ;;  %v252_v10 = vmul.f32 %v244_v53, %v235_v8 }
 0x156   : > { %v268_v11 = vadd.f32 %v257_v55, %v251_v9  ;;  %v269_v12 = vadd.f32 %v261_v56, %v252_v10 }
 0x158   : > { %274 = vst [vmem:[%s170_s25 + $0x20] sm:$0x1] %v268_v11  ;;  %275 = vst [vmem:[%s170_s25 + $0x28] sm:$0x1] %v269_v12 }
 0x159 PF: > { %s13_s12 = sadd.s32 1, %s362_s12  }
 0x15a   : > { %p10_p4 = scmp.ge.s32.totalorder %s13_s12, 4  }
 0x15c   :  { %12 = sbr.rel (!%p10_p4) target bundleno = 1 (0x1), region = 62 }

// kernel: dinov2_last_hidden_state.7
= control target key start
LH: loop header
LB: loop body
LE: loop exit
PB: predicated region body
PF: predicated region fallthrough
CT: control target
= control target key end

     0   :  { %s2385_s27 = smov 0   ;;  %s2943_s0 = inlined_call_operand.vmem [shape: bf16[2,17,256], index: 0, kind: input, shape index: {}, may-alias: {0,8}]   ;;  %s2944_s1 = inlined_call_operand.vmem [shape: f32[1,256], index: 1, kind: input, shape index: {}]   ;;  %s2945_s2 = inlined_call_operand.vmem [shape: f32[1,256], index: 2, kind: input, shape index: {}]   ;;  %s2946_s3 = inlined_call_operand.vmem [shape: bf16[256,768], index: 3, kind: input, shape index: {}]   ;;  %s2947_s4 = inlined_call_operand.vmem [shape: f32[1,768], index: 4, kind: input, shape index: {}]   ;;  %s2948_s5 = inlined_call_operand.vmem [shape: bf16[256,256], index: 5, kind: input, shape index: {}]   ;;  %s2949_s6 = inlined_call_operand.vmem [shape: f32[1,256], index: 6, kind: input, shape index: {}]   ;;  %s2950_s7 = inlined_call_operand.vmem [shape: f32[1,256], index: 7, kind: input, shape index: {}]   ;;  %s2951_s8 = inlined_call_operand.vmem [shape: bf16[2,17,256], index: 8, kind: output, shape index: {}, may-alias: {0,8}]  }
   0x1 LB: > { %s1900_s28 = sadd.s32 4294967295, %s2337_s27   ;;  %p1904_p0 = scmp.ge.s32.totalorder %s2337_s27, 1  ;;  %s2337_s27 = sphi %s2385_s27, %s18_s27  }
   0x2   : > { %p262_p1 = scmp.lt.s32.totalorder %s2337_s27, 3 }
   0x4   : > { %p263_p2 = pnand %p1904_p0, %p262_p1 }
   0x5   : > { %p296_p3 = scmp.lt.s32.totalorder (!%p263_p2), %s1900_s28, 1  ;;  %vm324_vm0 = vcmask (!%p263_p2), 1040384   ;;  %v2109_v14 = vld [vmem:[%s2946_s3 + $0x4] ss:$24 sps:$4 sm:$0xff] (!%p263_p2)   ;;  %v2111_v15 = vld [vmem:[%s2946_s3] ss:$24 sps:$4 sm:$0xff] (!%p263_p2)  }
   0x6   : > { %266 = sbr.rel (%p263_p2) target bundleno = 1608 (0x648), region = 52  ;;  %v2112_v16 = vld [vmem:[%s2946_s3 + $0xc] ss:$24 sps:$4 sm:$0xff] (!%p263_p2)   ;;  %v2114_v17 = vld [vmem:[%s2946_s3 + $0x8] ss:$24 sps:$4 sm:$0xff] (!%p263_p2)   ;;  %1018 = vmatprep.subr.bf16.mxu0 (!%p263_p2), %v2109_v14  ;;  %vm1228_vm1 = vcmask (!%p263_p2), 138240  }
   0x7   : > { %v2115_v18 = vld [vmem:[%s2946_s3 + $0x34] ss:$24 sps:$4 sm:$0xff] (!%p263_p2)   ;;  %1069 = vmatprep.subr.bf16.mxu1 (!%p263_p2), %v2112_v16  ;;  %1019 = vmatpush1.bf16.msra.mxu0 (!%p263_p2), %v2111_v15  ;;  %v2117_v20 = vld [vmem:[%s2946_s3 + $0x30] ss:$24 sps:$4 sm:$0xff] (!%p263_p2)   ;;  %v2121_v22 = vld [vmem:[%s2946_s3 + $0x64] ss:$24 sps:$4 sm:$0xff] (!%p263_p2)  }
   0x8   : > { %v2118_v19 = vld [vmem:[%s2946_s3 + $0x3c] ss:$24 sps:$4 sm:$0xff] (!%p263_p2)   ;;  %1070 = vmatpush1.bf16.msra.mxu1 (!%p263_p2), %v2114_v17  ;;  %v2120_v21 = vld [vmem:[%s2946_s3 + $0x38] ss:$24 sps:$4 sm:$0xff] (!%p263_p2)   ;;  %1020 = vmatprep.subr.bf16.mxu0 (!%p263_p2), %v2115_v18  ;;  %v2124_v23 = vld [vmem:[%s2946_s3 + $0x6c] ss:$24 sps:$4 sm:$0xff] (!%p263_p2)  }
   0x9   : > { %1071 = vmatprep.subr.bf16.mxu1 (!%p263_p2), %v2118_v19  ;;  %v2123_v24 = vld [vmem:[%s2946_s3 + $0x60] ss:$24 sps:$4 sm:$0xff] (!%p263_p2)   ;;  %v2127_v26 = vld [vmem:[%s2946_s3 + $0x94] ss:$24 sps:$4 sm:$0xff] (!%p263_p2)   ;;  %v2129_v28 = vld [vmem:[%s2946_s3 + $0x90] ss:$24 sps:$4 sm:$0xff] (!%p263_p2)  }
   0xa   : > { %v2126_v25 = vld [vmem:[%s2946_s3 + $0x68] ss:$24 sps:$4 sm:$0xff] (!%p263_p2)   ;;  %v2130_v27 = vld [vmem:[%s2946_s3 + $0x9c] ss:$24 sps:$4 sm:$0xff] (!%p263_p2)   ;;  %v2132_v29 = vld [vmem:[%s2946_s3 + $0x98] ss:$24 sps:$4 sm:$0xff] (!%p263_p2)  }
   0xb   : > { %1021 = vmatpush1.bf16.msra.mxu0 (!%p263_p2), %v2117_v20  ;;  %v2133_v30 = vld [vmem:[%s2946_s3 + $0xc4] ss:$24 sps:$4 sm:$0xff] (!%p263_p2)   ;;  %v2135_v32 = vld [vmem:[%s2946_s3 + $0xc0] ss:$24 sps:$4 sm:$0xff] (!%p263_p2)   ;;  %v2139_v34 = vld [vmem:[%s2946_s3 + $0xf4] ss:$24 sps:$4 sm:$0xff] (!%p263_p2)  }
   0xc   : > { %1072 = vmatpush1.bf16.msra.mxu1 (!%p263_p2), %v2120_v21  ;;  %1022 = vmatprep.subr.bf16.mxu0 (!%p263_p2), %v2121_v22  ;;  %v2136_v31 = vld [vmem:[%s2946_s3 + $0xcc] ss:$24 sps:$4 sm:$0xff] (!%p263_p2)   ;;  %v2138_v33 = vld [vmem:[%s2946_s3 + $0xc8] ss:$24 sps:$4 sm:$0xff] (!%p263_p2)   ;;  %v2142_v35 = vld [vmem:[%s2946_s3 + $0xfc] ss:$24 sps:$4 sm:$0xff] (!%p263_p2)  }
   0xd   : > { %s2953_s28 = smov (!%p296_p3, %s1900_s28), 1  ;;  %1073 = vmatprep.subr.bf16.mxu1 %v2124_v23  ;;  %v2141_v36 = vld [vmem:[%s2946_s3 + $0xf0] ss:$24 sps:$4 sm:$0xff]   ;;  %v2145_v38 = vld [vmem:[%s2946_s3 + $0x124] ss:$24 sps:$4 sm:$0xff]   ;;  %vm1235_vm2 = vcmask 131072  }
   0xe   : > { %s2099_s29 = smul.u32 24, %s2953_s28  ;;  %v2144_v37 = vld [vmem:[%s2946_s3 + $0xf8] ss:$24 sps:$4 sm:$0xff]   ;;  %v2148_v39 = vld [vmem:[%s2946_s3 + $0x12c] ss:$24 sps:$4 sm:$0xff]   ;;  %vm1838_vm4 = vcmask 1044484  }
   0xf   : > { %1023 = vmatpush1.bf16.msra.mxu0 %v2123_v24  ;;  %v2147_v40 = vld [vmem:[%s2946_s3 + $0x120] ss:$24 sps:$4 sm:$0xff]   ;;  %v2151_v42 = vld [vmem:[%s2946_s3 + $0x154] ss:$24 sps:$4 sm:$0xff]   ;;  %v2153_v44 = vld [vmem:[%s2946_s3 + $0x150] ss:$24 sps:$4 sm:$0xff]  }
  0x10   : > { %s300_s10 = scalar_lea.vmem %s2943_s0, %s2099_s29  ;;  %1074 = vmatpush1.bf16.msra.mxu1 %v2126_v25  ;;  %1024 = vmatprep.subr.bf16.mxu0 %v2127_v26  ;;  %v2150_v41 = vld [vmem:[%s2946_s3 + $0x128] ss:$24 sps:$4 sm:$0xff]   ;;  %v2154_v43 = vld [vmem:[%s2946_s3 + $0x15c] ss:$24 sps:$4 sm:$0xff]   ;;  %v2156_v45 = vld [vmem:[%s2946_s3 + $0x158] ss:$24 sps:$4 sm:$0xff]   ;;  %s305_s13 = scalar_lea.vmem %s2951_s8, %s2099_s29 }
  0x11   : > { %v307_v0 = vld [vmem:[%s300_s10] sm:$0xff]  ;;  %v309_v1 = vld [vmem:[%s300_s10 + $0x10] sm:$0x11]  ;;  %v308_v2 = vld [vmem:[%s300_s10 + $0x8] sm:$0xff]  ;;  %1075 = vmatprep.subr.bf16.mxu1 %v2130_v27  ;;  %vm1836_vm3 = vsmask.f32 256 }
  0x12   : > { %v2401_v3 = vunpack.c.l.bf16 %v307_v0  ;;  %v2403_v4 = vunpack.c.h.bf16 %v307_v0  ;;  %v2405_v5 = vunpack.c.l.bf16 %v309_v1  ;;  %v2407_v6 = vunpack.c.h.bf16 %v309_v1  ;;  %v2157_v46 = vld [vmem:[%s2946_s3 + $0x184] ss:$24 sps:$4 sm:$0xff]   ;;  %v2159_v48 = vld [vmem:[%s2946_s3 + $0x180] ss:$24 sps:$4 sm:$0xff]   ;;  %v2163_v50 = vld [vmem:[%s2946_s3 + $0x1b4] ss:$24 sps:$4 sm:$0xff]  }
  0x13   : > { %v2409_v7 = vunpack.c.l.bf16 %v308_v2  ;;  %v2411_v8 = vunpack.c.h.bf16 %v308_v2  ;;  %1025 = vmatpush1.bf16.msra.mxu0 %v2129_v28  ;;  %v2160_v47 = vld [vmem:[%s2946_s3 + $0x18c] ss:$24 sps:$4 sm:$0xff]   ;;  %v2162_v49 = vld [vmem:[%s2946_s3 + $0x188] ss:$24 sps:$4 sm:$0xff]   ;;  %v2166_v17 = vld [vmem:[%s2946_s3 + $0x1bc] ss:$24 sps:$4 sm:$0xff]  }
  0x14   : > { %v318_v9 = vadd.f32 %v2403_v4, %v2401_v3  ;;  %v325_v10 = vsel %vm324_vm0, %v2405_v5, 0.0  ;;  %v326_v11 = vsel %vm324_vm0, %v2407_v6, 0.0  ;;  %1076 = vmatpush1.bf16.msra.mxu1 %v2132_v29  ;;  %1026 = vmatprep.subr.bf16.mxu0 %v2133_v30  ;;  %v2165_v16 = vld [vmem:[%s2946_s3 + $0x1b0] ss:$24 sps:$4 sm:$0xff]   ;;  %v2169_v19 = vld [vmem:[%s2946_s3 + $0x1e4] ss:$24 sps:$4 sm:$0xff]   ;;  %vm1837_vm6 = vmand %vm324_vm0, %vm1836_vm3 }
  0x15   : > { %v327_v12 = vadd.f32 %v326_v11, %v325_v10  ;;  %v321_v13 = vadd.f32 %v2411_v8, %v2409_v7  ;;  %1077 = vmatprep.subr.bf16.mxu1 %v2136_v31  ;;  %v2168_v18 = vld [vmem:[%s2946_s3 + $0x1b8] ss:$24 sps:$4 sm:$0xff]   ;;  %v2172_v21 = vld [vmem:[%s2946_s3 + $0x1ec] ss:$24 sps:$4 sm:$0xff]   ;;  %v2174_v22 = vld [vmem:[%s2946_s3 + $0x1e8] ss:$24 sps:$4 sm:$0xff]  }
  0x16   : > { %319 = vadd.xlane.f32.xlu0 %v318_v9  ;;  %v2171_v20 = vld [vmem:[%s2946_s3 + $0x1e0] ss:$24 sps:$4 sm:$0xff]   ;;  %v2175_v23 = vld [vmem:[%s2946_s3 + $0x214] ss:$24 sps:$4 sm:$0xff]   ;;  %v2177_v24 = vld [vmem:[%s2946_s3 + $0x210] ss:$24 sps:$4 sm:$0xff]  }
  0x17   : > { %328 = vadd.xlane.f32.xlu1 %v327_v12  ;;  %1027 = vmatpush1.bf16.msra.mxu0 %v2135_v32  ;;  %v2178_v25 = vld [vmem:[%s2946_s3 + $0x21c] ss:$24 sps:$4 sm:$0xff]   ;;  %v2180_v26 = vld [vmem:[%s2946_s3 + $0x218] ss:$24 sps:$4 sm:$0xff]   ;;  %v2184_v29 = vld [vmem:[%s2946_s3 + $0x24c] ss:$24 sps:$4 sm:$0xff]  }
  0x18   : > { %1078 = vmatpush1.bf16.msra.mxu1 %v2138_v33  ;;  %1028 = vmatprep.subr.bf16.mxu0 %v2139_v34  ;;  %v2181_v27 = vld [vmem:[%s2946_s3 + $0x244] ss:$24 sps:$4 sm:$0xff]   ;;  %v2183_v28 = vld [vmem:[%s2946_s3 + $0x240] ss:$24 sps:$4 sm:$0xff]   ;;  %v2187_v31 = vld [vmem:[%s2946_s3 + $0x274] ss:$24 sps:$4 sm:$0xff]  }
  0x19   : > { %1079 = vmatprep.subr.bf16.mxu1 %v2142_v35  ;;  %v2186_v30 = vld [vmem:[%s2946_s3 + $0x248] ss:$24 sps:$4 sm:$0xff]   ;;  %v2190_v32 = vld [vmem:[%s2946_s3 + $0x27c] ss:$24 sps:$4 sm:$0xff]   ;;  %v2192_v34 = vld [vmem:[%s2946_s3 + $0x278] ss:$24 sps:$4 sm:$0xff]  }
  0x1a   : > { %322 = vadd.xlane.f32.xlu0 %v321_v13  ;;  %v2189_v33 = vld [vmem:[%s2946_s3 + $0x270] ss:$24 sps:$4 sm:$0xff]   ;;  %v2193_v35 = vld [vmem:[%s2946_s3 + $0x2a4] ss:$24 sps:$4 sm:$0xff]   ;;  %vm1839_vm5 = vsmask.f32 4352 }
  0x1b   : > { %1029 = vmatpush1.bf16.msra.mxu0 %v2141_v36  ;;  %v2196_v36 = vld [vmem:[%s2946_s3 + $0x2ac] ss:$24 sps:$4 sm:$0xff]   ;;  %vm1840_vm7 = vmand %vm1838_vm4, %vm1839_vm5 }
  0x1c   : > { %1080 = vmatpush1.bf16.msra.mxu1 %v2144_v37  ;;  %1030 = vmatprep.subr.bf16.mxu0 %v2145_v38  ;;  %v2195_v37 = vld [vmem:[%s2946_s3 + $0x2a0] ss:$24 sps:$4 sm:$0xff]   ;;  %vm1841_vm8 = vmor %vm1840_vm7, %vm1837_vm6 }
  0x1d   : > { %1081 = vmatprep.subr.bf16.mxu1 %v2148_v39  ;;  %v2198_v38 = vld [vmem:[%s2946_s3 + $0x2a8] ss:$24 sps:$4 sm:$0xff]   ;;  %v2199_v39 = vld [vmem:[%s2946_s3 + $0x2d4] ss:$24 sps:$4 sm:$0xff]  }
  0x1f   : > { %1031 = vmatpush1.bf16.msra.mxu0 %v2147_v40  ;;  %v2202_v40 = vld [vmem:[%s2946_s3 + $0x2dc] ss:$24 sps:$4 sm:$0xff]  }
  0x20   : > { %1082 = vmatpush1.bf16.msra.mxu1 %v2150_v41  ;;  %1032 = vmatprep.subr.bf16.mxu0 %v2151_v42  ;;  %v2201_v41 = vld [vmem:[%s2946_s3 + $0x2d0] ss:$24 sps:$4 sm:$0xff]  }
  0x21   : > { %1083 = vmatprep.subr.bf16.mxu1 %v2154_v43  ;;  %v2204_v42 = vld [vmem:[%s2946_s3 + $0x2d8] ss:$24 sps:$4 sm:$0xff]   ;;  %v2207_v43 = vld [vmem:[%s2946_s3 + $0x14] ss:$24 sps:$4 sm:$0xff]  }
  0x23   : > { %1033 = vmatpush1.bf16.msra.mxu0 %v2153_v44 }
  0x24   : > { %1084 = vmatpush1.bf16.msra.mxu1 %v2156_v45  ;;  %1034 = vmatprep.subr.bf16.mxu0 %v2157_v46 }
  0x25   : > { %1085 = vmatprep.subr.bf16.mxu1 %v2160_v47 }
  0x27   : > { %1035 = vmatpush1.bf16.msra.mxu0 %v2159_v48 }
  0x28   : > { %1086 = vmatpush1.bf16.msra.mxu1 %v2162_v49  ;;  %1036 = vmatprep.subr.bf16.mxu0 %v2163_v50  ;;  %v373_v49 = vlaneseq }
  0x29   : > { %1087 = vmatprep.subr.bf16.mxu1 %v2166_v17 }
  0x2b   : > { %1037 = vmatpush1.bf16.msra.mxu0 %v2165_v16 }
  0x2c   : > { %1088 = vmatpush1.bf16.msra.mxu1 %v2168_v18  ;;  %1038 = vmatprep.subr.bf16.mxu0 %v2169_v19 }
  0x2d   : > { %1089 = vmatprep.subr.bf16.mxu1 %v2172_v21 }
  0x2f   : > { %1039 = vmatpush1.bf16.msra.mxu0 %v2171_v20 }
  0x30   : > { %1090 = vmatpush1.bf16.msra.mxu1 %v2174_v22  ;;  %1040 = vmatprep.subr.bf16.mxu0 %v2175_v23 }
  0x31   : > { %1091 = vmatprep.subr.bf16.mxu1 %v2178_v25 }
  0x33   : > { %1041 = vmatpush1.bf16.msra.mxu0 %v2177_v24 }
  0x34   : > { %1092 = vmatpush1.bf16.msra.mxu1 %v2180_v26  ;;  %1042 = vmatprep.subr.bf16.mxu0 %v2181_v27 }
  0x35   : > { %1093 = vmatprep.subr.bf16.mxu1 %v2184_v29 }
  0x37   : > { %1043 = vmatpush1.bf16.msra.mxu0 %v2183_v28 }
  0x38   : > { %1094 = vmatpush1.bf16.msra.mxu1 %v2186_v30  ;;  %1044 = vmatprep.subr.bf16.mxu0 %v2187_v31  ;;  %v2213_v31 = vld [vmem:[%s2946_s3 + $0x74] ss:$24 sps:$4 sm:$0xff]  }
  0x39   : > { %1095 = vmatprep.subr.bf16.mxu1 %v2190_v32 }
  0x3b   : > { %1045 = vmatpush1.bf16.msra.mxu0 %v2189_v33  ;;  %v2211_v33 = vld [vmem:[%s2946_s3 + $0x70] ss:$24 sps:$4 sm:$0xff]  }
  0x3c   : > { %1096 = vmatpush1.bf16.msra.mxu1 %v2192_v34  ;;  %1046 = vmatprep.subr.bf16.mxu0 %v2193_v35  ;;  %v2216_v35 = vld [vmem:[%s2946_s3 + $0xa4] ss:$24 sps:$4 sm:$0xff]  }
  0x3d   : > { %1097 = vmatprep.subr.bf16.mxu1 %v2196_v36  ;;  %v2214_v36 = vld [vmem:[%s2946_s3 + $0xa0] ss:$24 sps:$4 sm:$0xff]  }
  0x3f   : > { %1047 = vmatpush1.bf16.msra.mxu0 %v2195_v37  ;;  %v2219_v37 = vld [vmem:[%s2946_s3 + $0xd4] ss:$24 sps:$4 sm:$0xff]  }
  0x40   : > { %1098 = vmatpush1.bf16.msra.mxu1 %v2198_v38  ;;  %1048 = vmatprep.subr.bf16.mxu0 %v2199_v39  ;;  %v2217_v38 = vld [vmem:[%s2946_s3 + $0xd0] ss:$24 sps:$4 sm:$0xff]   ;;  %v2222_v39 = vld [vmem:[%s2946_s3 + $0x104] ss:$24 sps:$4 sm:$0xff]  }
  0x41   : > { %1099 = vmatprep.subr.bf16.mxu1 %v2202_v40  ;;  %v2220_v40 = vld [vmem:[%s2946_s3 + $0x100] ss:$24 sps:$4 sm:$0xff]  }
  0x43   : > { %1049 = vmatpush1.bf16.msra.mxu0 %v2201_v41  ;;  %v2225_v41 = vld [vmem:[%s2946_s3 + $0x134] ss:$24 sps:$4 sm:$0xff]  }
  0x44   : > { %1100 = vmatpush1.bf16.msra.mxu1 %v2204_v42  ;;  %1120 = vmatprep.subr.bf16.mxu0 %v2207_v43  ;;  %v2223_v42 = vld [vmem:[%s2946_s3 + $0x130] ss:$24 sps:$4 sm:$0xff]   ;;  %v2228_v43 = vld [vmem:[%s2946_s3 + $0x164] ss:$24 sps:$4 sm:$0xff]  }
  0xa3   : > { %v320_v51 = vpop.xlane.xlu0 %319 }
  0xa4   : > { %v331_v52 = vmul.f32 0.00390625, %v320_v51  ;;  %v329_v53 = vpop.xlane.xlu1 %328 }
  0xa5   : > { %v333_v54 = vmul.f32 0.00390625, %v329_v53 }
  0xa6   : > { %v2533_v55 = vsub.f32 %v2401_v3, %v331_v52  ;;  %v2536_v56 = vsub.f32 %v2403_v4, %v331_v52 }
  0xa7   : > { %v2539_v57 = vsub.f32 %v2405_v5, %v333_v54  ;;  %v2542_v58 = vsub.f32 %v2407_v6, %v333_v54  ;;  %v323_v59 = vpop.xlane.xlu0 %322  ;;  %v2648_v54 = vshrl.u32 %v373_v49, 7  ;;  %v2237_v49 = vld [vmem:[%s2946_s3 + $0x1f4] ss:$24 sps:$4 sm:$0xff]  }
  0xa8   : > { %v332_v60 = vmul.f32 0.00390625, %v323_v59  ;;  %v340_v61 = vmul.f32 %v2533_v55, %v2533_v55  ;;  %v341_v62 = vmul.f32 %v2536_v56, %v2536_v56 }
  0xa9   : > { %v344_v63 = vmul.f32 %v2539_v57, %v2539_v57  ;;  %v345_v0 = vmul.f32 %v2542_v58, %v2542_v58  ;;  %v2651_v59 = vsub.s32 1, %v2648_v54 }
  0xaa   : > { %v2553_v1 = vsub.f32 %v2409_v7, %v332_v60  ;;  %v2556_v2 = vsub.f32 %v2411_v8, %v332_v60  ;;  %v346_v9 = vadd.f32 %v341_v62, %v340_v61  ;;  %v316_v60 = vld [vmem:[%s2944_s1] sm:$0x3]  ;;  %v2657_v61 = vsub.s32 0, %v2648_v54 }
  0xab   : > { %v352_v10 = vsel %vm324_vm0, %v344_v63, 0.0  ;;  %v353_v11 = vsel %vm324_vm0, %v345_v0, 0.0  ;;  %v380_v0 = vrot.slane %v316_v60, %v2651_v59 }
  0xac   : > { %347 = vadd.xlane.f32.xlu1 %v346_v9  ;;  %v354_v12 = vadd.f32 %v353_v11, %v352_v10  ;;  %v342_v13 = vmul.f32 %v2553_v1, %v2553_v1  ;;  %v343_v14 = vmul.f32 %v2556_v2, %v2556_v2  ;;  %v317_v9 = vld [vmem:[%s2945_s2] sm:$0x3]  ;;  %v376_v11 = vrot.slane %v316_v60, %v2657_v61  ;;  %v2241_v60 = vld [vmem:[%s2946_s3 + $0x250] ss:$24 sps:$4 sm:$0xff]  }
  0xad   : > { %v393_v19 = vrot.slane %v317_v9, %v2657_v61 }
  0xae   : > { %v349_v15 = vadd.f32 %v343_v14, %v342_v13 }
  0xb0   : > { %355 = vadd.xlane.f32.xlu1 %v354_v12  ;;  %350 = vadd.xlane.f32.xlu0 %v349_v15  ;;  %v397_v15 = vrot.slane %v317_v9, %v2651_v59  ;;  %v2247_v9 = vld [vmem:[%s2946_s3 + $0x2b0] ss:$24 sps:$4 sm:$0xff]  }
 0x139   : > { %v348_v44 = vpop.xlane.xlu1 %347 }
 0x13a   : > { %v357_v45 = vmul.f32 0.00390625, %v348_v44  ;;  %v2226_v44 = vld [vmem:[%s2946_s3 + $0x160] ss:$24 sps:$4 sm:$0xff]  }
 0x13c   : > { %v360_v46 = vadd.f32 1e-06, %v357_v45  ;;  %v2231_v45 = vld [vmem:[%s2946_s3 + $0x194] ss:$24 sps:$4 sm:$0xff]  }
 0x13d   : > { %v356_v47 = vpop.xlane.xlu1 %355  ;;  %v351_v48 = vpop.xlane.xlu0 %350 }
 0x13e   : > { %2301 = vrsqrt.f32 %v360_v46  ;;  %v359_v50 = vmul.f32 0.00390625, %v356_v47  ;;  %v358_v51 = vmul.f32 0.00390625, %v351_v48  ;;  %v2229_v46 = vld [vmem:[%s2946_s3 + $0x190] ss:$24 sps:$4 sm:$0xff]   ;;  %v2234_v47 = vld [vmem:[%s2946_s3 + $0x1c4] ss:$24 sps:$4 sm:$0xff]  }
 0x13f   : > { %v2232_v48 = vld [vmem:[%s2946_s3 + $0x1c0] ss:$24 sps:$4 sm:$0xff]  }
 0x140   : > { %v362_v52 = vadd.f32 1e-06, %v359_v50  ;;  %v361_v53 = vadd.f32 1e-06, %v358_v51  ;;  %v2235_v50 = vld [vmem:[%s2946_s3 + $0x1f0] ss:$24 sps:$4 sm:$0xff]  }
 0x141   : > { %v2240_v51 = vld [vmem:[%s2946_s3 + $0x224] ss:$24 sps:$4 sm:$0xff]  }
 0x142   : > { %2303 = vrsqrt.f32 %v362_v52  ;;  %v2238_v52 = vld [vmem:[%s2946_s3 + $0x220] ss:$24 sps:$4 sm:$0xff]  }
 0x143   : > { %2305 = vrsqrt.f32 %v361_v53  ;;  %v2243_v53 = vld [vmem:[%s2946_s3 + $0x254] ss:$24 sps:$4 sm:$0xff]  }
 0x148   : > { %v2302_v62 = vpop.eup %2301 }
 0x149   : > { %v367_v63 = vmul.f32 %v2302_v62, %v2536_v56  ;;  %v366_v10 = vmul.f32 %v2302_v62, %v2533_v55  ;;  %v2246_v62 = vld [vmem:[%s2946_s3 + $0x284] ss:$24 sps:$4 sm:$0xff]  }
 0x14b   : > { %v384_v14 = vmul.f32 %v380_v0, %v367_v63  ;;  %v383_v18 = vmul.f32 %v376_v11, %v366_v10  ;;  %v2244_v63 = vld [vmem:[%s2946_s3 + $0x280] ss:$24 sps:$4 sm:$0xff]   ;;  %v2252_v10 = vld [vmem:[%s2946_s3 + $0x2e4] ss:$24 sps:$4 sm:$0xff]  }
 0x14c   : > { %v2304_v12 = vpop.eup %2303 }
 0x14d   : > { %v2306_v13 = vpop.eup %2305  ;;  %v371_v16 = vmul.f32 %v2304_v12, %v2542_v58  ;;  %v401_v55 = vadd.f32 %v397_v15, %v384_v14  ;;  %v370_v23 = vmul.f32 %v2304_v12, %v2539_v57  ;;  %v400_v25 = vadd.f32 %v393_v19, %v383_v18  ;;  %v2205_v58 = vld [vmem:[%s2946_s3 + $0x10] ss:$24 sps:$4 sm:$0xff]   ;;  %v2208_v57 = vld [vmem:[%s2946_s3 + $0x40] ss:$24 sps:$4 sm:$0xff]  }
 0x14e   : > { %v369_v17 = vmul.f32 %v2306_v13, %v2556_v2  ;;  %v368_v56 = vmul.f32 %v2306_v13, %v2553_v1  ;;  %v2210_v1 = vld [vmem:[%s2946_s3 + $0x44] ss:$24 sps:$4 sm:$0xff]   ;;  %v518_v13 = vsub.s32 2, %v2648_v54  ;;  %v522_v14 = vsub.s32 3, %v2648_v54 }
 0x14f   : > { %v388_v20 = vmul.f32 %v380_v0, %v371_v16  ;;  %v387_v29 = vmul.f32 %v376_v11, %v370_v23  ;;  %v2778_v12 = vld [vmem:[%s2947_s4] sm:$0x3f] }
 0x150   : > { %v386_v21 = vmul.f32 %v380_v0, %v369_v17  ;;  %v385_v22 = vmul.f32 %v376_v11, %v368_v56  ;;  %v2249_v0 = vld [vmem:[%s2946_s3 + $0x2b4] ss:$24 sps:$4 sm:$0xff]   ;;  %v2250_v11 = vld [vmem:[%s2946_s3 + $0x2e0] ss:$24 sps:$4 sm:$0xff]   ;;  %v515_v16 = vrot.slane %v2778_v12, %v2651_v59  ;;  %v519_v17 = vrot.slane %v2778_v12, %v518_v13 }
 0x151   : > { %v405_v27 = vadd.f32 %v397_v15, %v388_v20  ;;  %v404_v32 = vadd.f32 %v393_v19, %v387_v29 }
 0x152   : > { %v403_v24 = vadd.f32 %v397_v15, %v386_v21  ;;  %v402_v26 = vadd.f32 %v393_v19, %v385_v22  ;;  %v511_v15 = vrot.slane %v2778_v12, %v2657_v61  ;;  %v523_v19 = vrot.slane %v2778_v12, %v522_v14 }
 0x153   : > { %v2680_v30 = vpack.c.bf16 %v405_v27, %v405_v27  ;;  %v408_v34 = vpack.c.bf16 %v404_v32, %v404_v32 }
 0x154   : > { %v407_v28 = vpack.c.bf16 %v403_v24, %v401_v55  ;;  %v2675_v2 = vpack.c.bf16 %v402_v26, %v400_v25 }
 0x156   : > { %1050 = vmatprep.mubr.bf16.mxu0 %v407_v28  ;;  %1101 = vmatprep.mubr.bf16.mxu1 %v407_v28 }
 0x157   : > { %1051 = vmatmul.mubr.bf16.vlgmr.msra.gmra.mrb[0].mxu0 %v2675_v2  ;;  %1102 = vmatmul.mubr.bf16.vlgmr.msra.gmra.mrb[0].mxu1 %v2675_v2 }
 0x158   : > { %1121 = vmatpush1.bf16.msra.mxu0 %v2205_v58  ;;  %1060 = vmatprep.mubr.bf16.mxu0 %v2680_v30 }
 0x159   : > { %1111 = vmatprep.mubr.bf16.mxu1 %v2680_v30  ;;  %1122 = vmatprep.subr.bf16.mxu0 %v2210_v1 }
 0x15c   : > { %1123 = vmatpush1.bf16.msra.mxu0 %v2208_v57 }
 0x15d   : > { %1124 = vmatprep.subr.bf16.mxu0 %v2213_v31 }
 0x15f   : > { %1061 = vmatmul.mubr.bf16.gmra.mrb[4].mxu0 %v408_v34  ;;  %1112 = vmatmul.mubr.bf16.gmra.mrb[4].mxu1 %v408_v34 }
 0x160   : > { %1125 = vmatpush1.bf16.msra.mxu0 %v2211_v33  ;;  %1152 = vmatprep.mubr.bf16.mxu0 %v407_v28 }
 0x161   : > { %1126 = vmatprep.subr.bf16.mxu0 %v2216_v35 }
 0x164   : > { %1127 = vmatpush1.bf16.msra.mxu0 %v2214_v36 }
 0x165   : > { %1128 = vmatprep.subr.bf16.mxu0 %v2219_v37 }
 0x168   : > { %1129 = vmatpush1.bf16.msra.mxu0 %v2217_v38 }
 0x169   : > { %1130 = vmatprep.subr.bf16.mxu0 %v2222_v39 }
 0x16c   : > { %1131 = vmatpush1.bf16.msra.mxu0 %v2220_v40 }
 0x16d   : > { %1132 = vmatprep.subr.bf16.mxu0 %v2225_v41 }
 0x170   : > { %1133 = vmatpush1.bf16.msra.mxu0 %v2223_v42 }
 0x171   : > { %1134 = vmatprep.subr.bf16.mxu0 %v2228_v43 }
 0x174   : > { %1135 = vmatpush1.bf16.msra.mxu0 %v2226_v44 }
 0x175   : > { %1136 = vmatprep.subr.bf16.mxu0 %v2231_v45 }
 0x178   : > { %1137 = vmatpush1.bf16.msra.mxu0 %v2229_v46 }
 0x179   : > { %1138 = vmatprep.subr.bf16.mxu0 %v2234_v47 }
 0x17c   : > { %1139 = vmatpush1.bf16.msra.mxu0 %v2232_v48 }
 0x17d   : > { %1140 = vmatprep.subr.bf16.mxu0 %v2237_v49 }
 0x180   : > { %1141 = vmatpush1.bf16.msra.mxu0 %v2235_v50 }
 0x181   : > { %1142 = vmatprep.subr.bf16.mxu0 %v2240_v51 }
 0x184   : > { %1143 = vmatpush1.bf16.msra.mxu0 %v2238_v52 }
 0x185   : > { %1144 = vmatprep.subr.bf16.mxu0 %v2243_v53 }
 0x188   : > { %1145 = vmatpush1.bf16.msra.mxu0 %v2241_v60 }
 0x189   : > { %1146 = vmatprep.subr.bf16.mxu0 %v2246_v62  ;;  %v526_v62 = vsub.s32 4, %v2648_v54 }
 0x18c   : > { %1147 = vmatpush1.bf16.msra.mxu0 %v2244_v63  ;;  %v530_v63 = vsub.s32 5, %v2648_v54 }
 0x18d   : > { %1148 = vmatprep.subr.bf16.mxu0 %v2249_v0  ;;  %v527_v0 = vrot.slane %v2778_v12, %v526_v62 }
 0x190   : > { %1149 = vmatpush1.bf16.msra.mxu0 %v2247_v9 }
 0x191   : > { %1150 = vmatprep.subr.bf16.mxu0 %v2252_v10  ;;  %v531_v10 = vrot.slane %v2778_v12, %v530_v63 }
 0x194   : > { %1151 = vmatpush1.bf16.msra.mxu0 %v2250_v11 }
 0x197   : > { %1153 = vmatmul.mubr.bf16.vlgmr.msra.gmra.mrb[8].mxu0 %v2675_v2 }
 0x198   : > { %1162 = vmatprep.mubr.bf16.mxu0 %v2680_v30 }
 0x19f   : > { %1163 = vmatmul.mubr.bf16.gmra.mrb[12].mxu0 %v408_v34 }
 0x22a   : > { %v1052_v56 = vpop.f32.mrb[0].mxu0  ;;  %v1103_v18 = vpop.f32.mrb[0].mxu1 }
 0x22b   : > { %v1053_v20 = vadd.f32 %v1052_v56, %v511_v15  ;;  %v1054_v21 = vpop.f32.mrb[1].mxu0  ;;  %v1105_v22 = vpop.f32.mrb[1].mxu1  ;;  %v1104_v25 = vadd.f32 %v1103_v18, %v519_v17 }
 0x22c   : > { %v1055_v55 = vadd.f32 %v1054_v21, %v515_v16  ;;  %v1056_v23 = vpop.f32.mrb[2].mxu0  ;;  %v1107_v24 = vpop.f32.mrb[2].mxu1  ;;  %v1106_v2 = vadd.f32 %v1105_v22, %v523_v19  ;;  %v2339_v22 = vmov 0  }
 0x22d   : > { %v1057_v26 = vadd.f32 %v1056_v23, %v511_v15  ;;  %v1108_v27 = vadd.f32 %v1107_v24, %v519_v17  ;;  %v1058_v28 = vpop.f32.mrb[3].mxu0  ;;  %v1109_v58 = vpop.f32.mrb[3].mxu1  ;;  %v1171_v30 = vmul.f32 0.088388346, %v1053_v20 }
 0x22e   : > { %v1059_v1 = vadd.f32 %v1058_v28, %v515_v16  ;;  %v1110_v29 = vadd.f32 %v1109_v58, %v523_v19  ;;  %v1342_v32 = vmul.f32 0.088388346, %v1055_v55  ;;  %v1272_v55 = vsel %vm324_vm0, 65535, %v2339_v22 }
 0x22f   : > { %v1172_v57 = vmul.f32 0.088388346, %v1057_v26  ;;  %v1176_v31 = vpack.c.bf16 %v1108_v27, %v1104_v25 }
 0x230   : > { %v1343_v33 = vmul.f32 0.088388346, %v1059_v1  ;;  %v1347_v34 = vpack.c.bf16 %v1110_v29, %v1106_v2 }
 0x231   : > { %v1174_v35 = vpack.c.bf16 %v1172_v57, %v1171_v30  ;;  %2063 = vmatprep.subr.bf16.mxu0 %v1176_v31 }
 0x232   : > { %v1345_v36 = vpack.c.bf16 %v1343_v33, %v1342_v32  ;;  %v1062_v37 = vpop.f32.mrb[4].mxu0  ;;  %v1113_v38 = vpop.f32.mrb[4].mxu1  ;;  %2064 = vmatpush3.bf16.xpose.msra.mxu0 %v1176_v31 }
 0x233   : > { %v1114_v39 = vadd.f32 %v1113_v38, %v519_v17  ;;  %v1064_v40 = vpop.f32.mrb[5].mxu0  ;;  %v1115_v41 = vpop.f32.mrb[5].mxu1  ;;  %2067 = vmatprep.mubr.bf16.mxu0 %v1174_v35  ;;  %v1063_v47 = vadd.f32 %v1062_v37, %v511_v15 }
 0x234   : > { %v1066_v42 = vpop.f32.mrb[6].mxu0  ;;  %v1117_v43 = vpop.f32.mrb[6].mxu1  ;;  %v1116_v49 = vadd.f32 %v1115_v41, %v523_v19  ;;  %v1065_v52 = vadd.f32 %v1064_v40, %v515_v16 }
 0x235   : > { %v1177_v44 = vpack.c.bf16 %v1114_v39, %v1114_v39  ;;  %v1067_v45 = vpop.f32.mrb[7].mxu0  ;;  %v1118_v46 = vpop.f32.mrb[7].mxu1  ;;  %v1173_v48 = vmul.f32 0.088388346, %v1063_v47 }
 0x236   : > { %v1348_v51 = vpack.c.bf16 %v1116_v49, %v1116_v49  ;;  %v1344_v53 = vmul.f32 0.088388346, %v1065_v52 }
 0x237   : > { %2065 = vmatprep.subr.bf16.mxu0 %v1177_v44  ;;  %v1175_v50 = vpack.c.bf16 %v1173_v48, %v1173_v48 }
 0x238   : > { %v1346_v60 = vpack.c.bf16 %v1344_v53, %v1344_v53 }
 0x23a   : > { %2066 = vmatpush3.bf16.xpose.msra.mxu0 %v1177_v44 }
 0x23b   : > { %2079 = vmatprep.subr.bf16.mxu0 %v1347_v34 }
 0x241   : > { %2068 = vmatmul.mubr.bf16.vlgmr.msra.gmra.mrb[16].mxu0 %v1175_v50 }
 0x242   : > { %2080 = vmatpush3.bf16.xpose.msra.mxu0 %v1347_v34  ;;  %2083 = vmatprep.mubr.bf16.mxu0 %v1345_v36 }
 0x243   : > { %2081 = vmatprep.subr.bf16.mxu0 %v1348_v51 }
 0x24a   : > { %2082 = vmatpush3.bf16.xpose.msra.mxu0 %v1348_v51 }
 0x251   : > { %2084 = vmatmul.mubr.bf16.vlgmr.msra.gmra.mrb[20].mxu0 %v1346_v60 }
 0x26a   : > { %v1154_v9 = vpop.f32.mrb[8].mxu0 }
 0x26b   : > { %v1156_v11 = vpop.f32.mrb[9].mxu0  ;;  %v1155_v14 = vadd.f32 %v1154_v9, %v527_v0 }
 0x26c   : > { %v1158_v13 = vpop.f32.mrb[10].mxu0  ;;  %v1157_v56 = vadd.f32 %v1156_v11, %v531_v10 }
 0x26d   : > { %v1159_v15 = vadd.f32 %v1158_v13, %v527_v0  ;;  %v1160_v17 = vpop.f32.mrb[11].mxu0 }
 0x26e   : > { %v1161_v16 = vadd.f32 %v1160_v17, %v531_v10 }
 0x26f   : > { %v1178_v18 = vpack.c.bf16 %v1159_v15, %v1155_v14 }
 0x270   : > { %v2792_v19 = vpack.c.bf16 %v1161_v16, %v1157_v56 }
 0x271   : > { %2071 = vmatprep.subr.bf16.mxu1 %v1178_v18 }
 0x272   : > { %v1164_v20 = vpop.f32.mrb[12].mxu0  ;;  %2072 = vmatpush3.bf16.msra.mxu1 %v1178_v18 }
 0x273   : > { %v1165_v21 = vadd.f32 %v1164_v20, %v527_v0  ;;  %v1166_v54 = vpop.f32.mrb[13].mxu0 }
 0x274   : > { %v1167_v12 = vadd.f32 %v1166_v54, %v531_v10  ;;  %v1168_v23 = vpop.f32.mrb[14].mxu0 }
 0x275   : > { %v1179_v24 = vpack.c.bf16 %v1165_v21, %v1165_v21  ;;  %v1169_v25 = vpop.f32.mrb[15].mxu0 }
 0x276   : > { %v1350_v26 = vpack.c.bf16 %v1167_v12, %v1167_v12 }
 0x277   : > { %v1274_v27 = vand.u32 %v1272_v55, %v1179_v24 }
 0x278   : > { %v2796_v28 = vand.u32 %v1350_v26, %v1272_v55 }
 0x279   : > { %2073 = vmatprep.subr.bf16.mxu1 %v1274_v27 }
 0x27a   : > { %2074 = vmatpush3.bf16.msra.mxu1 %v1274_v27 }
 0x27b   : > { %2087 = vmatprep.subr.bf16.mxu1 %v2792_v19 }
 0x314   : > { %v2069_v58 = vpop.f32.mrb[16].mxu0 }
 0x315   : > { %v1214_v2 = vpop.f32.mrb[17].mxu0  ;;  %v1236_v31 = vsel %vm1235_vm2, %v2069_v58, -inf }
 0x316   : > { %v2070_v1 = vpop.f32.mrb[18].mxu0  ;;  %v1229_v29 = vsel %vm1228_vm1, %v1214_v2, -inf }
 0x317   : > { %1230 = vmax.xlane.f32.xlu0 %v1229_v29  ;;  %v1217_v30 = vpop.f32.mrb[19].mxu0 }
 0x318   : > { %v1232_v57 = vsel %vm1228_vm1, %v1217_v30, -inf }
 0x319   : > { %1233 = vmax.xlane.f32.xlu1 %v1232_v57  ;;  %v2255_v57 = vld [vmem:[%s2948_s5 + $0x84] ss:$8 sps:$4 sm:$0xff]  }
 0x31b   : > { %1237 = vmax.xlane.f32.xlu0 %v1236_v31 }
 0x324   : > { %v2085_v32 = vpop.f32.mrb[20].mxu0 }
 0x325   : > { %v1385_v33 = vpop.f32.mrb[21].mxu0  ;;  %v1405_v38 = vsel %vm1235_vm2, %v2085_v32, -inf }
 0x326   : > { %v2086_v34 = vpop.f32.mrb[22].mxu0  ;;  %v1399_v35 = vsel %vm1228_vm1, %v1385_v33, -inf }
 0x327   : > { %v1388_v36 = vpop.f32.mrb[23].mxu0  ;;  %1400 = vmax.xlane.f32.xlu1 %v1399_v35 }
 0x328   : > { %v1402_v37 = vsel %vm1228_vm1, %v1388_v36, -inf }
 0x329   : > { %1403 = vmax.xlane.f32.xlu0 %v1402_v37 }
 0x32b   : > { %1406 = vmax.xlane.f32.xlu1 %v1405_v38 }
 0x3a4   : > { %v1231_v39 = vpop.xlane.xlu0 %1230 }
 0x3a5   : > { %v1239_v40 = vsub.f32 %v1214_v2, %v1231_v39  ;;  %v2258_v39 = vld [vmem:[%s2948_s5 + $0x94] ss:$8 sps:$4 sm:$0xff]  }
 0x3a6   : > { %v1234_v41 = vpop.xlane.xlu1 %1233 }
 0x3a7   : > { %v1242_v42 = vmul.f32 1.442695, %v1239_v40  ;;  %v1240_v43 = vsub.f32 %v1217_v30, %v1234_v41  ;;  %v2261_v40 = vld [vmem:[%s2948_s5 + $0xa4] ss:$8 sps:$4 sm:$0xff]   ;;  %v2259_v41 = vld [vmem:[%s2948_s5 + $0xa0] ss:$8 sps:$4 sm:$0xff]  }
 0x3a8   : > { %v1238_v44 = vpop.xlane.xlu0 %1237 }
 0x3a9   : > { %2307 = vpow2.f32 %v1242_v42  ;;  %v1244_v45 = vmul.f32 1.442695, %v1240_v43  ;;  %v1241_v46 = vsub.f32 %v2069_v58, %v1238_v44  ;;  %v2264_v42 = vld [vmem:[%s2948_s5 + $0xb4] ss:$8 sps:$4 sm:$0xff]   ;;  %v2262_v43 = vld [vmem:[%s2948_s5 + $0xb0] ss:$8 sps:$4 sm:$0xff]  }
 0x3aa   : > { %v2265_v44 = vld [vmem:[%s2948_s5 + $0xc0] ss:$8 sps:$4 sm:$0xff]  }
 0x3ab   : > { %2309 = vpow2.f32 %v1244_v45  ;;  %v1246_v47 = vmul.f32 1.442695, %v1241_v46  ;;  %v2267_v45 = vld [vmem:[%s2948_s5 + $0xc4] ss:$8 sps:$4 sm:$0xff]   ;;  %v2270_v46 = vld [vmem:[%s2948_s5 + $0xd4] ss:$8 sps:$4 sm:$0xff]  }
 0x3ad   : > { %2311 = vpow2.f32 %v1246_v47  ;;  %v2268_v47 = vld [vmem:[%s2948_s5 + $0xd0] ss:$8 sps:$4 sm:$0xff]  }
 0x3b3   : > { %v2308_v48 = vpop.eup %2307 }
 0x3b4   : > { %v1401_v49 = vpop.xlane.xlu1 %1400  ;;  %v1248_v50 = vsel %vm1228_vm1, %v2308_v48, 0.0 }
 0x3b5   : > { %v2310_v51 = vpop.eup %2309  ;;  %v1408_v52 = vsub.f32 %v1385_v33, %v1401_v49  ;;  %1249 = vadd.xlane.f32.xlu0 %v1248_v50  ;;  %v2271_v49 = vld [vmem:[%s2948_s5 + $0xe0] ss:$8 sps:$4 sm:$0xff]   ;;  %v2276_v50 = vld [vmem:[%s2948_s5 + $0xf4] ss:$8 sps:$4 sm:$0xff]  }
 0x3b6   : > { %v1404_v53 = vpop.xlane.xlu0 %1403  ;;  %v1251_v60 = vsel %vm1228_vm1, %v2310_v51, 0.0 }
 0x3b7   : > { %v2312_v62 = vpop.eup %2311  ;;  %v1411_v63 = vmul.f32 1.442695, %v1408_v52  ;;  %v1409_v0 = vsub.f32 %v1388_v36, %v1404_v53  ;;  %1252 = vadd.xlane.f32.xlu1 %v1251_v60  ;;  %v2279_v52 = vld [vmem:[%s2948_s5 + $0x4] ss:$8 sps:$4 sm:$0xff]  }
 0x3b8   : > { %v1407_v9 = vpop.xlane.xlu1 %1406  ;;  %v1254_v10 = vsel %vm1235_vm2, %v2312_v62, 0.0 }
 0x3b9   : > { %2313 = vpow2.f32 %v1411_v63  ;;  %v1413_v11 = vmul.f32 1.442695, %v1409_v0  ;;  %v1410_v13 = vsub.f32 %v2085_v32, %v1407_v9  ;;  %1255 = vadd.xlane.f32.xlu0 %v1254_v10 }
 0x3bb   : > { %2315 = vpow2.f32 %v1413_v11  ;;  %v1415_v14 = vmul.f32 1.442695, %v1410_v13 }
 0x3bd   : > { %2317 = vpow2.f32 %v1415_v14  ;;  %v2277_v14 = vld [vmem:[%s2948_s5] ss:$8 sps:$4 sm:$0xff]  }
 0x3c3   : > { %v2314_v15 = vpop.eup %2313 }
 0x3c4   : > { %v1417_v17 = vsel %vm1228_vm1, %v2314_v15, 0.0 }
 0x3c5   : > { %v2316_v56 = vpop.eup %2315  ;;  %1418 = vadd.xlane.f32.xlu1 %v1417_v17  ;;  %v2282_v17 = vld [vmem:[%s2948_s5 + $0x14] ss:$8 sps:$4 sm:$0xff]  }
 0x3c6   : > { %v1420_v16 = vsel %vm1228_vm1, %v2316_v56, 0.0 }
 0x3c7   : > { %v2318_v18 = vpop.eup %2317  ;;  %1421 = vadd.xlane.f32.xlu0 %v1420_v16  ;;  %v2285_v16 = vld [vmem:[%s2948_s5 + $0x24] ss:$8 sps:$4 sm:$0xff]  }
 0x3c8   : > { %v1423_v20 = vsel %vm1235_vm2, %v2318_v18, 0.0 }
 0x3c9   : > { %1424 = vadd.xlane.f32.xlu1 %v1423_v20 }
 0x442   : > { %v1250_v21 = vpop.xlane.xlu0 %1249 }
 0x443   : > { %2319 = vrcp.f32 %v1250_v21  ;;  %v2288_v21 = vld [vmem:[%s2948_s5 + $0x34] ss:$8 sps:$4 sm:$0xff]  }
 0x444   : > { %v1253_v54 = vpop.xlane.xlu1 %1252 }
 0x445   : > { %2321 = vrcp.f32 %v1253_v54  ;;  %v2286_v54 = vld [vmem:[%s2948_s5 + $0x30] ss:$8 sps:$4 sm:$0xff]  }
 0x446   : > { %v1256_v55 = vpop.xlane.xlu0 %1255 }
 0x447   : > { %2323 = vrcp.f32 %v1256_v55  ;;  %v2291_v55 = vld [vmem:[%s2948_s5 + $0x44] ss:$8 sps:$4 sm:$0xff]  }
 0x44d   : > { %v2320_v12 = vpop.eup %2319 }
 0x44e   : > { %v1260_v24 = vmul.f32 %v2320_v12, %v2308_v48  ;;  %v2273_v48 = vld [vmem:[%s2948_s5 + $0xe4] ss:$8 sps:$4 sm:$0xff]   ;;  %v2289_v12 = vld [vmem:[%s2948_s5 + $0x40] ss:$8 sps:$4 sm:$0xff]  }
 0x44f   : > { %v2322_v23 = vpop.eup %2321 }
 0x450   : > { %v1261_v25 = vmul.f32 %v2322_v23, %v2310_v51  ;;  %v2274_v51 = vld [vmem:[%s2948_s5 + $0xf0] ss:$8 sps:$4 sm:$0xff]   ;;  %v2294_v23 = vld [vmem:[%s2948_s5 + $0x54] ss:$8 sps:$4 sm:$0xff]  }
 0x451   : > { %v2324_v26 = vpop.eup %2323 }
 0x452   : > { %v1262_v27 = vmul.f32 %v2324_v26, %v2312_v62  ;;  %v1419_v58 = vpop.xlane.xlu1 %1418  ;;  %v1263_v2 = vpack.c.bf16 %v1261_v25, %v1260_v24  ;;  %v2292_v24 = vld [vmem:[%s2948_s5 + $0x50] ss:$8 sps:$4 sm:$0xff]   ;;  %v2297_v25 = vld [vmem:[%s2948_s5 + $0x64] ss:$8 sps:$4 sm:$0xff]   ;;  %v2295_v26 = vld [vmem:[%s2948_s5 + $0x60] ss:$8 sps:$4 sm:$0xff]  }
 0x453   : > { %2325 = vrcp.f32 %v1419_v58  ;;  %v2298_v58 = vld [vmem:[%s2948_s5 + $0x70] ss:$8 sps:$4 sm:$0xff]  }
 0x454   : > { %v1264_v1 = vpack.c.bf16 %v1262_v27, %v1262_v27  ;;  %v1422_v29 = vpop.xlane.xlu0 %1421  ;;  %2075 = vmatprep.mubr.msk.bf16.mxu1 %vm1228_vm1, %v1263_v2  ;;  %v2300_v27 = vld [vmem:[%s2948_s5 + $0x74] ss:$8 sps:$4 sm:$0xff]  }
 0x455   : > { %2327 = vrcp.f32 %v1422_v29 }
 0x456   : > { %2076 = vmatmul.mubr.msk.bf16.vlgmr.msra.gmra.mrb[8].mxu1 %vm1228_vm1, %v1264_v1  ;;  %v1425_v30 = vpop.xlane.xlu1 %1424 }
 0x457   : > { %2088 = vmatpush3.bf16.msra.mxu1 %v2792_v19  ;;  %2329 = vrcp.f32 %v1425_v30  ;;  %v2253_v19 = vld [vmem:[%s2948_s5 + $0x80] ss:$8 sps:$4 sm:$0xff]  }
 0x458   : > { %2089 = vmatprep.subr.bf16.mxu1 %v2796_v28 }
 0x45b   : > { %2090 = vmatpush3.bf16.msra.mxu1 %v2796_v28  ;;  %v2256_v28 = vld [vmem:[%s2948_s5 + $0x90] ss:$8 sps:$4 sm:$0xff]  }
 0x45c   : > { %1589 = vmatprep.subr.bf16.mxu1 %v2255_v57 }
 0x45d   : > { %v2326_v31 = vpop.eup %2325 }
 0x45e   : > { %v1429_v33 = vmul.f32 %v2326_v31, %v2314_v15  ;;  %v1771_v31 = vld [vmem:[%s2949_s6] sm:$0x3] }
 0x45f   : > { %v2328_v32 = vpop.eup %2327 }
 0x460   : > { %v1430_v34 = vmul.f32 %v2328_v32, %v2316_v56  ;;  %v2280_v56 = vld [vmem:[%s2948_s5 + $0x10] ss:$8 sps:$4 sm:$0xff]   ;;  %v1789_v32 = vld [vmem:[%s2950_s7] sm:$0x3] }
 0x461   : > { %v2330_v35 = vpop.eup %2329 }
 0x462   : > { %v1431_v36 = vmul.f32 %v2330_v35, %v2318_v18  ;;  %v1432_v37 = vpack.c.bf16 %v1430_v34, %v1429_v33  ;;  %v2283_v18 = vld [vmem:[%s2948_s5 + $0x20] ss:$8 sps:$4 sm:$0xff]   ;;  %v1776_v33 = vrot.slane %v1771_v31, %v2657_v61  ;;  %v1780_v34 = vrot.slane %v1771_v31, %v2651_v59 }
 0x464   : > { %v1433_v38 = vpack.c.bf16 %v1431_v36, %v1431_v36  ;;  %2091 = vmatprep.mubr.msk.bf16.mxu1 %vm1228_vm1, %v1432_v37  ;;  %v1798_v36 = vrot.slane %v1789_v32, %v2651_v59 }
 0x466   : > { %2092 = vmatmul.mubr.msk.bf16.vlgmr.msra.gmra.mrb[12].mxu1 %vm1228_vm1, %v1433_v38 }
 0x467   : > { %1590 = vmatpush1.bf16.msra.mxu1 %v2253_v19  ;;  %1621 = vmatprep.mubr.bf16.mxu1 %v2339_v22 }
 0x468   : > { %1591 = vmatprep.subr.bf16.mxu1 %v2258_v39 }
 0x46b   : > { %1592 = vmatpush1.bf16.msra.mxu1 %v2256_v28 }
 0x46c   : > { %1593 = vmatprep.subr.bf16.mxu1 %v2261_v40 }
 0x46f   : > { %1594 = vmatpush1.bf16.msra.mxu1 %v2259_v41 }
 0x470   : > { %1595 = vmatprep.subr.bf16.mxu1 %v2264_v42 }
 0x473   : > { %1596 = vmatpush1.bf16.msra.mxu1 %v2262_v43 }
 0x474   : > { %1597 = vmatprep.subr.bf16.mxu1 %v2267_v45 }
 0x477   : > { %1598 = vmatpush1.bf16.msra.mxu1 %v2265_v44 }
 0x478   : > { %1599 = vmatprep.subr.bf16.mxu1 %v2270_v46 }
 0x47b   : > { %1600 = vmatpush1.bf16.msra.mxu1 %v2268_v47 }
 0x47c   : > { %1601 = vmatprep.subr.bf16.mxu1 %v2273_v48 }
 0x47f   : > { %1602 = vmatpush1.bf16.msra.mxu1 %v2271_v49 }
 0x480   : > { %1603 = vmatprep.subr.bf16.mxu1 %v2276_v50 }
 0x483   : > { %1604 = vmatpush1.bf16.msra.mxu1 %v2274_v51 }
 0x484   : > { %1720 = vmatprep.subr.bf16.mxu1 %v2279_v52 }
 0x529   : > { %v2077_v53 = vpop.f32.mrb[8].mxu1 }
 0x52a   : > { %v1310_v60 = vpop.f32.mrb[9].mxu1  ;;  %v1325_v2 = vpack.c.bf16 %v2077_v53, %v2077_v53 }
 0x52b   : > { %v2078_v62 = vpop.f32.mrb[10].mxu1 }
 0x52c   : > { %v1313_v63 = vpop.f32.mrb[11].mxu1 }
 0x52d   : > { %v1324_v0 = vpack.c.bf16 %v1313_v63, %v1310_v60 }
 0x539   : > { %v2093_v9 = vpop.f32.mrb[12].mxu1 }
 0x53a   : > { %v1477_v10 = vpop.f32.mrb[13].mxu1  ;;  %v1492_v20 = vpack.c.bf16 %v2093_v9, %v2093_v9  ;;  %v1842_v9 = vld [vmem:[%s305_s13 + $0x10] sm:$0x11] }
 0x53b   : > { %v2094_v11 = vpop.f32.mrb[14].mxu1 }
 0x53c   : > { %v1480_v13 = vpop.f32.mrb[15].mxu1 }
 0x53d   : > { %v1491_v15 = vpack.c.bf16 %v1480_v13, %v1477_v10 }
 0x53f   : > { %1622 = vmatmul.mubr.bf16.vlgmr.msra.gmra.mrb[16].mxu1 %v1491_v15 }
 0x540   : > { %1721 = vmatpush1.bf16.msra.mxu1 %v2277_v14  ;;  %1631 = vmatprep.mubr.bf16.mxu1 %v2339_v22 }
 0x541   : > { %1722 = vmatprep.subr.bf16.mxu1 %v2282_v17 }
 0x544   : > { %1723 = vmatpush1.bf16.msra.mxu1 %v2280_v56 }
 0x545   : > { %1724 = vmatprep.subr.bf16.mxu1 %v2285_v16 }
 0x547   : > { %1632 = vmatmul.mubr.bf16.gmra.mrb[20].mxu1 %v1492_v20 }
 0x548   : > { %1725 = vmatpush1.bf16.msra.mxu1 %v2283_v18  ;;  %1752 = vmatprep.mubr.bf16.mxu1 %v2339_v22 }
 0x549   : > { %1726 = vmatprep.subr.bf16.mxu1 %v2288_v21 }
 0x54c   : > { %1727 = vmatpush1.bf16.msra.mxu1 %v2286_v54 }
 0x54d   : > { %1728 = vmatprep.subr.bf16.mxu1 %v2291_v55 }
 0x550   : > { %1729 = vmatpush1.bf16.msra.mxu1 %v2289_v12 }
 0x551   : > { %1730 = vmatprep.subr.bf16.mxu1 %v2294_v23 }
 0x554   : > { %1731 = vmatpush1.bf16.msra.mxu1 %v2292_v24 }
 0x555   : > { %1732 = vmatprep.subr.bf16.mxu1 %v2297_v25 }
 0x558   : > { %1733 = vmatpush1.bf16.msra.mxu1 %v2295_v26 }
 0x559   : > { %1734 = vmatprep.subr.bf16.mxu1 %v2300_v27 }
 0x55c   : > { %1735 = vmatpush1.bf16.msra.mxu1 %v2298_v58 }
 0x55f   : > { %1753 = vmatmul.mubr.bf16.vlgmr.msra.gmra.mrb[16].mxu1 %v1324_v0 }
 0x560   : > { %1762 = vmatprep.mubr.bf16.mxu1 %v2339_v22  ;;  %v1794_v22 = vrot.slane %v1789_v32, %v2657_v61 }
 0x567   : > { %1763 = vmatmul.mubr.bf16.gmra.mrb[24].mxu1 %v1325_v2 }
 0x61a   : > { %v1633_v1 = vpop.f32.mrb[20].mxu1 }
 0x61b   : > { %v1635_v29 = vpop.f32.mrb[21].mxu1 }
 0x61c   : > { %v1637_v30 = vpop.f32.mrb[22].mxu1 }
 0x61d   : > { %v1638_v57 = vpop.f32.mrb[23].mxu1 }
 0x632   : > { %v1754_v35 = vpop.f32.mrb[16].mxu1 }
 0x633   : > { %v1783_v37 = vadd.f32 %v1776_v33, %v1754_v35  ;;  %v1756_v19 = vpop.f32.mrb[17].mxu1 }
 0x634   : > { %v1784_v38 = vadd.f32 %v1780_v34, %v1756_v19  ;;  %v1758_v39 = vpop.f32.mrb[18].mxu1 }
 0x635   : > { %v1801_v28 = vmul.f32 %v1794_v22, %v1783_v37  ;;  %v1785_v40 = vadd.f32 %v1776_v33, %v1758_v39  ;;  %v1760_v41 = vpop.f32.mrb[19].mxu1 }
 0x636   : > { %v1802_v42 = vmul.f32 %v1798_v36, %v1784_v38  ;;  %v1786_v43 = vadd.f32 %v1780_v34, %v1760_v41 }
 0x637   : > { %v1807_v44 = vadd.f32 %v1801_v28, %v2401_v3  ;;  %v1803_v45 = vmul.f32 %v1794_v22, %v1785_v40 }
 0x638   : > { %v1808_v46 = vadd.f32 %v1802_v42, %v2403_v4  ;;  %v1804_v47 = vmul.f32 %v1798_v36, %v1786_v43 }
 0x639   : > { %v1809_v59 = vadd.f32 %v1803_v45, %v2409_v7 }
 0x63a   : > { %v2044_v61 = vpack.c.bf16 %v1808_v46, %v1807_v44  ;;  %v1810_v48 = vadd.f32 %v1804_v47, %v2411_v8  ;;  %v1764_v49 = vpop.f32.mrb[24].mxu1 }
 0x63b   : > { %v1765_v50 = vadd.f32 %v1764_v49, %v1633_v1  ;;  %v1766_v51 = vpop.f32.mrb[25].mxu1 }
 0x63c   : > { %1833 = vst [vmem:[%s305_s13] sm:$0xff] %v2044_v61  ;;  %v2045_v52 = vpack.c.bf16 %v1810_v48, %v1809_v59  ;;  %v1767_v3 = vadd.f32 %v1766_v51, %v1635_v29  ;;  %v1768_v53 = vpop.f32.mrb[26].mxu1 }
 0x63d   : > { %v1787_v4 = vadd.f32 %v1776_v33, %v1765_v50  ;;  %v1769_v60 = vpop.f32.mrb[27].mxu1 }
 0x63e   : > { %1834 = vst [vmem:[%s305_s13 + $0x8] sm:$0xff] %v2045_v52  ;;  %v1788_v62 = vadd.f32 %v1780_v34, %v1767_v3 }
 0x63f   : > { %v1805_v63 = vmul.f32 %v1794_v22, %v1787_v4 }
 0x640   : > { %v1806_v7 = vmul.f32 %v1798_v36, %v1788_v62 }
 0x641   : > { %v1811_v8 = vadd.f32 %v1805_v63, %v2405_v5 }
 0x642   : > { %v1812_v0 = vadd.f32 %v1806_v7, %v2407_v6 }
 0x644   : > { %v2046_v10 = vpack.c.bf16 %v1812_v0, %v1811_v8 }
 0x646   : > { %v1843_v11 = vsel %vm1841_vm8, %v2046_v10, %v1842_v9 }
 0x647   : > { %1844 = vst [vmem:[%s305_s13 + $0x10] sm:$0x11] %v1843_v11 }
 0x648 PF: > { %s18_s27 = sadd.s32 1, %s2337_s27  }
 0x649   : > { %p15_p4 = scmp.ge.s32.totalorder %s18_s27, 4  }
 0x64b   :  { %17 = sbr.rel (!%p15_p4) target bundleno = 1 (0x1), region = 82 }

// kernel: dinov2_last_hidden_state.8
= control target key start
LH: loop header
LB: loop body
LE: loop exit
PB: predicated region body
PF: predicated region fallthrough
CT: control target
= control target key end

     0   :  { %s3359_s27 = smov 0   ;;  %s4415_s0 = inlined_call_operand.vmem [shape: bf16[2,17,256], index: 0, kind: input, shape index: {}, may-alias: {0,8}]   ;;  %s4416_s1 = inlined_call_operand.vmem [shape: f32[1,256], index: 1, kind: input, shape index: {}]   ;;  %s4417_s2 = inlined_call_operand.vmem [shape: f32[1,256], index: 2, kind: input, shape index: {}]   ;;  %s4418_s3 = inlined_call_operand.vmem [shape: bf16[256,1024], index: 3, kind: input, shape index: {}]   ;;  %s4419_s4 = inlined_call_operand.vmem [shape: f32[1,1024], index: 4, kind: input, shape index: {}]   ;;  %s4420_s5 = inlined_call_operand.vmem [shape: bf16[1024,256], index: 5, kind: input, shape index: {}]   ;;  %s4421_s6 = inlined_call_operand.vmem [shape: f32[1,256], index: 6, kind: input, shape index: {}]   ;;  %s4422_s7 = inlined_call_operand.vmem [shape: f32[1,256], index: 7, kind: input, shape index: {}]   ;;  %s4423_s8 = inlined_call_operand.vmem [shape: bf16[2,17,256], index: 8, kind: output, shape index: {}, may-alias: {0,8}]  }
   0x1 LB: > { %s2750_s28 = sadd.s32 4294967295, %s3312_s27   ;;  %p2754_p0 = scmp.ge.s32.totalorder %s3312_s27, 1  ;;  %s3312_s27 = sphi %s3359_s27, %s18_s27  }
   0x2   : > { %p262_p1 = scmp.lt.s32.totalorder %s3312_s27, 3 }
   0x4   : > { %p263_p2 = pnand %p2754_p0, %p262_p1 }
   0x5   : > { %p296_p3 = scmp.lt.s32.totalorder (!%p263_p2), %s2750_s28, 1  ;;  %vm323_vm0 = vcmask (!%p263_p2), 1040384   ;;  %v409_v14 = vld [vmem:[%s4418_s3] sm:$0xff] (!%p263_p2)  ;;  %vm2686_vm1 = vsmask.f32 (!%p263_p2), 256  ;;  %vm2688_vm2 = vcmask (!%p263_p2), 1044484  }
   0x6   : > { %266 = sbr.rel (%p263_p2) target bundleno = 1013 (0x3f5), region = 52  ;;  %v413_v15 = vld [vmem:[%s4418_s3 + $0x20] sm:$0xff] (!%p263_p2)  ;;  %vm2689_vm3 = vsmask.f32 (!%p263_p2), 4352  ;;  %vm2687_vm4 = vmand (!%p263_p2), %vm323_vm0, %vm2686_vm1 }
   0x7   : > { %v417_v16 = vld [vmem:[%s4418_s3 + $0x40] sm:$0xff] (!%p263_p2)  ;;  %v2758_v17 = vcombine.high (!%p263_p2), %v409_v14, %v413_v15  ;;  %v2757_v18 = vcombine.low (!%p263_p2), %v409_v14, %v413_v15  ;;  %vm2690_vm5 = vmand (!%p263_p2), %vm2688_vm2, %vm2689_vm3 }
   0x8   : > { %v421_v19 = vld [vmem:[%s4418_s3 + $0x60] sm:$0xff] (!%p263_p2)  ;;  %vm2691_vm6 = vmor (!%p263_p2), %vm2690_vm5, %vm2687_vm4 }
   0x9   : > { %v2766_v20 = vcombine.high (!%p263_p2), %v417_v16, %v421_v19  ;;  %v425_v21 = vld [vmem:[%s4418_s3 + $0x80] sm:$0xff] (!%p263_p2)  ;;  %1219 = vmatprep.subr.bf16.mxu1 (!%p263_p2), %v2758_v17  ;;  %v2765_v23 = vcombine.low (!%p263_p2), %v417_v16, %v421_v19 }
   0xa   : > { %v429_v22 = vld [vmem:[%s4418_s3 + $0xa0] sm:$0xff] (!%p263_p2)  ;;  %1220 = vmatpush1.bf16.msra.mxu1 (!%p263_p2), %v2757_v18 }
   0xb   : > { %1221 = vmatprep.subr.bf16.mxu1 (!%p263_p2), %v2766_v20  ;;  %v2774_v24 = vcombine.high (!%p263_p2), %v425_v21, %v429_v22  ;;  %v433_v25 = vld [vmem:[%s4418_s3 + $0xc0] sm:$0xff] (!%p263_p2)  ;;  %v2773_v27 = vcombine.low (!%p263_p2), %v425_v21, %v429_v22 }
   0xc   : > { %v437_v26 = vld [vmem:[%s4418_s3 + $0xe0] sm:$0xff] (!%p263_p2) }
   0xd   : > { %s4425_s28 = smov (!%p296_p3, %s2750_s28), 1  ;;  %v441_v28 = vld [vmem:[%s4418_s3 + $0x100] sm:$0xff]  ;;  %v2782_v30 = vcombine.high %v433_v25, %v437_v26  ;;  %v2781_v31 = vcombine.low %v433_v25, %v437_v26 }
   0xe   : > { %s3051_s29 = smul.u32 24, %s4425_s28  ;;  %1222 = vmatpush1.bf16.msra.mxu1 %v2765_v23  ;;  %v445_v29 = vld [vmem:[%s4418_s3 + $0x120] sm:$0xff] }
   0xf   : > { %1223 = vmatprep.subr.bf16.mxu1 %v2774_v24  ;;  %v2790_v32 = vcombine.high %v441_v28, %v445_v29  ;;  %v449_v33 = vld [vmem:[%s4418_s3 + $0x140] sm:$0xff]  ;;  %v2789_v35 = vcombine.low %v441_v28, %v445_v29 }
  0x10   : > { %s300_s10 = scalar_lea.vmem %s4415_s0, %s3051_s29  ;;  %v453_v34 = vld [vmem:[%s4418_s3 + $0x160] sm:$0xff]  ;;  %s305_s22 = scalar_lea.vmem %s4423_s8, %s3051_s29 }
  0x11   : > { %v306_v0 = vld [vmem:[%s300_s10] sm:$0xff]  ;;  %v308_v1 = vld [vmem:[%s300_s10 + $0x10] sm:$0x11]  ;;  %v307_v2 = vld [vmem:[%s300_s10 + $0x8] sm:$0xff]  ;;  %v2798_v36 = vcombine.high %v449_v33, %v453_v34  ;;  %v2797_v39 = vcombine.low %v449_v33, %v453_v34 }
  0x12   : > { %v3375_v3 = vunpack.c.l.bf16 %v306_v0  ;;  %v3377_v4 = vunpack.c.h.bf16 %v306_v0  ;;  %v3379_v5 = vunpack.c.l.bf16 %v308_v1  ;;  %v3381_v6 = vunpack.c.h.bf16 %v308_v1  ;;  %1224 = vmatpush1.bf16.msra.mxu1 %v2773_v27  ;;  %v457_v37 = vld [vmem:[%s4418_s3 + $0x180] sm:$0xff] }
  0x13   : > { %v3383_v7 = vunpack.c.l.bf16 %v307_v2  ;;  %v3385_v8 = vunpack.c.h.bf16 %v307_v2  ;;  %1225 = vmatprep.subr.bf16.mxu1 %v2782_v30  ;;  %v461_v38 = vld [vmem:[%s4418_s3 + $0x1a0] sm:$0xff] }
  0x14   : > { %v317_v9 = vadd.f32 %v3377_v4, %v3375_v3  ;;  %v324_v10 = vsel %vm323_vm0, %v3379_v5, 0.0  ;;  %v325_v11 = vsel %vm323_vm0, %v3381_v6, 0.0  ;;  %v2806_v40 = vcombine.high %v457_v37, %v461_v38  ;;  %v465_v41 = vld [vmem:[%s4418_s3 + $0x1c0] sm:$0xff] }
  0x15   : > { %v326_v12 = vadd.f32 %v325_v11, %v324_v10  ;;  %v320_v13 = vadd.f32 %v3385_v8, %v3383_v7  ;;  %v469_v42 = vld [vmem:[%s4418_s3 + $0x1e0] sm:$0xff]  ;;  %v2805_v43 = vcombine.low %v457_v37, %v461_v38 }
  0x16   : > { %318 = vadd.xlane.f32.xlu0 %v317_v9  ;;  %1226 = vmatpush1.bf16.msra.mxu1 %v2781_v31  ;;  %v2814_v44 = vcombine.high %v465_v41, %v469_v42  ;;  %v473_v45 = vld [vmem:[%s4418_s3 + $0x200] sm:$0xff]  ;;  %v2813_v47 = vcombine.low %v465_v41, %v469_v42 }
  0x17   : > { %327 = vadd.xlane.f32.xlu1 %v326_v12  ;;  %1227 = vmatprep.subr.bf16.mxu1 %v2790_v32  ;;  %v477_v46 = vld [vmem:[%s4418_s3 + $0x220] sm:$0xff] }
  0x18   : > { %v2822_v48 = vcombine.high %v473_v45, %v477_v46  ;;  %v481_v49 = vld [vmem:[%s4418_s3 + $0x240] sm:$0xff]  ;;  %v2821_v51 = vcombine.low %v473_v45, %v477_v46 }
  0x19   : > { %v485_v50 = vld [vmem:[%s4418_s3 + $0x260] sm:$0xff] }
  0x1a   : > { %321 = vadd.xlane.f32.xlu0 %v320_v13  ;;  %1228 = vmatpush1.bf16.msra.mxu1 %v2789_v35  ;;  %v2830_v52 = vcombine.high %v481_v49, %v485_v50  ;;  %v2829_v18 = vcombine.low %v481_v49, %v485_v50  ;;  %v489_v19 = vld [vmem:[%s4418_s3 + $0x280] sm:$0xff] }
  0x1b   : > { %1229 = vmatprep.subr.bf16.mxu1 %v2798_v36  ;;  %v493_v20 = vld [vmem:[%s4418_s3 + $0x2a0] sm:$0xff] }
  0x1c   : > { %v2838_v21 = vcombine.high %v489_v19, %v493_v20  ;;  %v2837_v22 = vcombine.low %v489_v19, %v493_v20  ;;  %v497_v23 = vld [vmem:[%s4418_s3 + $0x2c0] sm:$0xff] }
  0x1d   : > { %v501_v24 = vld [vmem:[%s4418_s3 + $0x2e0] sm:$0xff] }
  0x1e   : > { %1230 = vmatpush1.bf16.msra.mxu1 %v2797_v39  ;;  %v2846_v25 = vcombine.high %v497_v23, %v501_v24  ;;  %v2845_v26 = vcombine.low %v497_v23, %v501_v24  ;;  %v505_v27 = vld [vmem:[%s4418_s3 + $0x300] sm:$0xff] }
  0x1f   : > { %1231 = vmatprep.subr.bf16.mxu1 %v2806_v40  ;;  %v509_v28 = vld [vmem:[%s4418_s3 + $0x320] sm:$0xff] }
  0x20   : > { %v2854_v29 = vcombine.high %v505_v27, %v509_v28  ;;  %v2853_v30 = vcombine.low %v505_v27, %v509_v28  ;;  %v513_v31 = vld [vmem:[%s4418_s3 + $0x340] sm:$0xff] }
  0x21   : > { %v517_v32 = vld [vmem:[%s4418_s3 + $0x360] sm:$0xff] }
  0x22   : > { %1232 = vmatpush1.bf16.msra.mxu1 %v2805_v43  ;;  %v2862_v33 = vcombine.high %v513_v31, %v517_v32  ;;  %v2861_v34 = vcombine.low %v513_v31, %v517_v32  ;;  %v521_v35 = vld [vmem:[%s4418_s3 + $0x380] sm:$0xff]  ;;  %v410_v43 = vld [vmem:[%s4418_s3 + $0x8] sm:$0xff] }
  0x23   : > { %1233 = vmatprep.subr.bf16.mxu1 %v2814_v44  ;;  %v525_v36 = vld [vmem:[%s4418_s3 + $0x3a0] sm:$0xff]  ;;  %v414_v44 = vld [vmem:[%s4418_s3 + $0x28] sm:$0xff] }
  0x24   : > { %v2870_v37 = vcombine.high %v521_v35, %v525_v36  ;;  %v2869_v38 = vcombine.low %v521_v35, %v525_v36  ;;  %v529_v39 = vld [vmem:[%s4418_s3 + $0x3c0] sm:$0xff]  ;;  %v2760_v45 = vcombine.high %v410_v43, %v414_v44  ;;  %v2759_v46 = vcombine.low %v410_v43, %v414_v44  ;;  %v430_v35 = vld [vmem:[%s4418_s3 + $0xa8] sm:$0xff] }
  0x25   : > { %v533_v40 = vld [vmem:[%s4418_s3 + $0x3e0] sm:$0xff]  ;;  %v442_v44 = vld [vmem:[%s4418_s3 + $0x108] sm:$0xff] }
  0x26   : > { %1234 = vmatpush1.bf16.msra.mxu1 %v2813_v47  ;;  %v2878_v41 = vcombine.high %v529_v39, %v533_v40  ;;  %v2877_v42 = vcombine.low %v529_v39, %v533_v40  ;;  %v434_v39 = vld [vmem:[%s4418_s3 + $0xc8] sm:$0xff] }
  0x27   : > { %1235 = vmatprep.subr.bf16.mxu1 %v2822_v48  ;;  %v438_v40 = vld [vmem:[%s4418_s3 + $0xe8] sm:$0xff] }
  0x28   : > { %v2784_v43 = vcombine.high %v434_v39, %v438_v40 }
  0x2a   : > { %1236 = vmatpush1.bf16.msra.mxu1 %v2821_v51 }
  0x2b   : > { %1237 = vmatprep.subr.bf16.mxu1 %v2830_v52  ;;  %v372_v52 = vlaneseq }
  0x2e   : > { %1238 = vmatpush1.bf16.msra.mxu1 %v2829_v18 }
  0x2f   : > { %1239 = vmatprep.subr.bf16.mxu1 %v2838_v21 }
  0x32   : > { %1240 = vmatpush1.bf16.msra.mxu1 %v2837_v22 }
  0x33   : > { %1241 = vmatprep.subr.bf16.mxu1 %v2846_v25 }
  0x36   : > { %1242 = vmatpush1.bf16.msra.mxu1 %v2845_v26 }
  0x37   : > { %1243 = vmatprep.subr.bf16.mxu1 %v2854_v29 }
  0x3a   : > { %1244 = vmatpush1.bf16.msra.mxu1 %v2853_v30  ;;  %v418_v30 = vld [vmem:[%s4418_s3 + $0x48] sm:$0xff] }
  0x3b   : > { %1245 = vmatprep.subr.bf16.mxu1 %v2862_v33 }
  0x3e   : > { %1246 = vmatpush1.bf16.msra.mxu1 %v2861_v34  ;;  %v426_v34 = vld [vmem:[%s4418_s3 + $0x88] sm:$0xff] }
  0x3f   : > { %1247 = vmatprep.subr.bf16.mxu1 %v2870_v37  ;;  %v2776_v37 = vcombine.high %v426_v34, %v430_v35 }
  0x42   : > { %1248 = vmatpush1.bf16.msra.mxu1 %v2869_v38 }
  0x43   : > { %1249 = vmatprep.subr.bf16.mxu1 %v2878_v41  ;;  %v2775_v41 = vcombine.low %v426_v34, %v430_v35 }
  0x46   : > { %1250 = vmatpush1.bf16.msra.mxu1 %v2877_v42 }
  0x47   : > { %1270 = vmatprep.subr.bf16.mxu1 %v2760_v45  ;;  %v446_v45 = vld [vmem:[%s4418_s3 + $0x128] sm:$0xff] }
  0xa3   : > { %v319_v53 = vpop.xlane.xlu0 %318 }
  0xa4   : > { %v330_v54 = vmul.f32 0.00390625, %v319_v53  ;;  %v328_v55 = vpop.xlane.xlu1 %327 }
  0xa5   : > { %v332_v56 = vmul.f32 0.00390625, %v328_v55 }
  0xa6   : > { %v3456_v57 = vsub.f32 %v3375_v3, %v330_v54  ;;  %v3459_v58 = vsub.f32 %v3377_v4, %v330_v54 }
  0xa7   : > { %v3462_v59 = vsub.f32 %v3379_v5, %v332_v56  ;;  %v3465_v60 = vsub.f32 %v3381_v6, %v332_v56  ;;  %v322_v61 = vpop.xlane.xlu0 %321 }
  0xa8   : > { %v331_v62 = vmul.f32 0.00390625, %v322_v61  ;;  %v339_v63 = vmul.f32 %v3456_v57, %v3456_v57  ;;  %v340_v0 = vmul.f32 %v3459_v58, %v3459_v58  ;;  %v3529_v61 = vshrl.u32 %v372_v52, 7  ;;  %v458_v52 = vld [vmem:[%s4418_s3 + $0x188] sm:$0xff] }
  0xa9   : > { %v343_v1 = vmul.f32 %v3462_v59, %v3462_v59  ;;  %v344_v2 = vmul.f32 %v3465_v60, %v3465_v60 }
  0xaa   : > { %v3476_v9 = vsub.f32 %v3383_v7, %v331_v62  ;;  %v3479_v10 = vsub.f32 %v3385_v8, %v331_v62  ;;  %v345_v11 = vadd.f32 %v340_v0, %v339_v63  ;;  %v3532_v62 = vsub.s32 1, %v3529_v61  ;;  %v315_v63 = vld [vmem:[%s4416_s1] sm:$0x3] }
  0xab   : > { %v351_v12 = vsel %vm323_vm0, %v343_v1, 0.0  ;;  %v352_v13 = vsel %vm323_vm0, %v344_v2, 0.0  ;;  %v3538_v0 = vsub.s32 0, %v3529_v61 }
  0xac   : > { %346 = vadd.xlane.f32.xlu1 %v345_v11  ;;  %v353_v14 = vadd.f32 %v352_v13, %v351_v12  ;;  %v341_v15 = vmul.f32 %v3476_v9, %v3476_v9  ;;  %v342_v16 = vmul.f32 %v3479_v10, %v3479_v10  ;;  %v379_v11 = vrot.slane %v315_v63, %v3532_v62  ;;  %v316_v13 = vld [vmem:[%s4417_s2] sm:$0x3] }
  0xad   : > { %v396_v19 = vrot.slane %v316_v13, %v3532_v62 }
  0xae   : > { %v348_v17 = vadd.f32 %v342_v16, %v341_v15 }
  0xb0   : > { %354 = vadd.xlane.f32.xlu1 %v353_v14  ;;  %349 = vadd.xlane.f32.xlu0 %v348_v17  ;;  %v375_v14 = vrot.slane %v315_v63, %v3538_v0  ;;  %v470_v63 = vld [vmem:[%s4418_s3 + $0x1e8] sm:$0xff] }
 0x139   : > { %v347_v47 = vpop.xlane.xlu1 %346 }
 0x13a   : > { %v356_v48 = vmul.f32 0.00390625, %v347_v47  ;;  %v2792_v47 = vcombine.high %v442_v44, %v446_v45 }
 0x13c   : > { %v359_v49 = vadd.f32 1e-06, %v356_v48  ;;  %v450_v48 = vld [vmem:[%s4418_s3 + $0x148] sm:$0xff] }
 0x13d   : > { %v355_v50 = vpop.xlane.xlu1 %354  ;;  %v350_v51 = vpop.xlane.xlu0 %349 }
 0x13e   : > { %3252 = vrsqrt.f32 %v359_v49  ;;  %v358_v53 = vmul.f32 0.00390625, %v355_v50  ;;  %v357_v54 = vmul.f32 0.00390625, %v350_v51  ;;  %v454_v49 = vld [vmem:[%s4418_s3 + $0x168] sm:$0xff]  ;;  %v2791_v50 = vcombine.low %v442_v44, %v446_v45  ;;  %v415_v44 = vld [vmem:[%s4418_s3 + $0x30] sm:$0xff] }
 0x13f   : > { %v2800_v51 = vcombine.high %v450_v48, %v454_v49 }
 0x140   : > { %v361_v55 = vadd.f32 1e-06, %v358_v53  ;;  %v360_v56 = vadd.f32 1e-06, %v357_v54  ;;  %v462_v53 = vld [vmem:[%s4418_s3 + $0x1a8] sm:$0xff]  ;;  %v2799_v54 = vcombine.low %v450_v48, %v454_v49  ;;  %v419_v49 = vld [vmem:[%s4418_s3 + $0x50] sm:$0xff] }
 0x141   : > { %v3065_v48 = vld [vmem:[%s4420_s5 + $0x10] ss:$8 sps:$4 sm:$0xff]  }
 0x142   : > { %3254 = vrsqrt.f32 %v361_v55  ;;  %v2808_v55 = vcombine.high %v458_v52, %v462_v53 }
 0x143   : > { %3256 = vrsqrt.f32 %v360_v56  ;;  %v466_v56 = vld [vmem:[%s4418_s3 + $0x1c8] sm:$0xff] }
 0x148   : > { %v3253_v1 = vpop.eup %3252 }
 0x149   : > { %v366_v2 = vmul.f32 %v3253_v1, %v3459_v58  ;;  %v365_v12 = vmul.f32 %v3253_v1, %v3456_v57  ;;  %v392_v57 = vrot.slane %v316_v13, %v3538_v0  ;;  %v2807_v1 = vcombine.low %v458_v52, %v462_v53  ;;  %v3066_v52 = vld [vmem:[%s4420_s5 + $0x24] ss:$8 sps:$4 sm:$0xff]  }
 0x14a   : > { %v2815_v13 = vcombine.low %v466_v56, %v470_v63 }
 0x14b   : > { %v383_v18 = vmul.f32 %v379_v11, %v366_v2  ;;  %v382_v21 = vmul.f32 %v375_v14, %v365_v12  ;;  %v2816_v2 = vcombine.high %v466_v56, %v470_v63  ;;  %v478_v12 = vld [vmem:[%s4418_s3 + $0x228] sm:$0xff]  ;;  %v431_v56 = vld [vmem:[%s4418_s3 + $0xb0] sm:$0xff] }
 0x14c   : > { %v3255_v15 = vpop.eup %3254 }
 0x14d   : > { %v3257_v16 = vpop.eup %3256  ;;  %v370_v17 = vmul.f32 %v3255_v15, %v3465_v60  ;;  %v369_v25 = vmul.f32 %v3255_v15, %v3462_v59  ;;  %v400_v26 = vadd.f32 %v396_v19, %v383_v18  ;;  %v399_v28 = vadd.f32 %v392_v57, %v382_v21  ;;  %v482_v15 = vld [vmem:[%s4418_s3 + $0x248] sm:$0xff] }
 0x14e   : > { %v367_v20 = vmul.f32 %v3257_v16, %v3476_v9  ;;  %v368_v58 = vmul.f32 %v3257_v16, %v3479_v10  ;;  %v422_v9 = vld [vmem:[%s4418_s3 + $0x68] sm:$0xff] }
 0x14f   : > { %v387_v22 = vmul.f32 %v379_v11, %v370_v17  ;;  %v2768_v32 = vcombine.high %v418_v30, %v422_v9  ;;  %v386_v33 = vmul.f32 %v375_v14, %v369_v25  ;;  %v2767_v36 = vcombine.low %v418_v30, %v422_v9  ;;  %v486_v16 = vld [vmem:[%s4418_s3 + $0x268] sm:$0xff] }
 0x150   : > { %v385_v23 = vmul.f32 %v379_v11, %v368_v58  ;;  %v384_v24 = vmul.f32 %v375_v14, %v367_v20  ;;  %v474_v11 = vld [vmem:[%s4418_s3 + $0x208] sm:$0xff]  ;;  %v2832_v18 = vcombine.high %v482_v15, %v486_v16  ;;  %v2831_v58 = vcombine.low %v482_v15, %v486_v16 }
 0x151   : > { %v404_v60 = vadd.f32 %v396_v19, %v387_v22  ;;  %v403_v38 = vadd.f32 %v392_v57, %v386_v33  ;;  %v2824_v14 = vcombine.high %v474_v11, %v478_v12  ;;  %v2823_v17 = vcombine.low %v474_v11, %v478_v12  ;;  %v494_v20 = vld [vmem:[%s4418_s3 + $0x2a8] sm:$0xff] }
 0x152   : > { %v402_v27 = vadd.f32 %v396_v19, %v385_v23  ;;  %v401_v29 = vadd.f32 %v392_v57, %v384_v24  ;;  %v490_v19 = vld [vmem:[%s4418_s3 + $0x288] sm:$0xff] }
 0x153   : > { %v3564_v59 = vpack.c.bf16 %v404_v60, %v404_v60  ;;  %v3580_v42 = vpack.c.bf16 %v403_v38, %v403_v38  ;;  %v2840_v21 = vcombine.high %v490_v19, %v494_v20  ;;  %v498_v57 = vld [vmem:[%s4418_s3 + $0x2c8] sm:$0xff]  ;;  %v2839_v23 = vcombine.low %v490_v19, %v494_v20  ;;  %v447_v19 = vld [vmem:[%s4418_s3 + $0x130] sm:$0xff] }
 0x154   : > { %v3559_v10 = vpack.c.bf16 %v402_v27, %v400_v26  ;;  %v3561_v31 = vpack.c.bf16 %v401_v29, %v399_v28  ;;  %v502_v22 = vld [vmem:[%s4418_s3 + $0x2e8] sm:$0xff]  ;;  %v3075_v20 = vld [vmem:[%s4420_s5 + $0x54] ss:$8 sps:$4 sm:$0xff]  }
 0x155   : > { %v2848_v24 = vcombine.high %v498_v57, %v502_v22  ;;  %v506_v25 = vld [vmem:[%s4418_s3 + $0x308] sm:$0xff]  ;;  %v2847_v27 = vcombine.low %v498_v57, %v502_v22 }
 0x156   : > { %1251 = vmatprep.mubr.bf16.mxu1 %v3559_v10  ;;  %v510_v26 = vld [vmem:[%s4418_s3 + $0x328] sm:$0xff] }
 0x157   : > { %1252 = vmatmul.mubr.bf16.vlgmr.msra.gmra.mrb[0].mxu1 %v3561_v31  ;;  %v2856_v28 = vcombine.high %v506_v25, %v510_v26  ;;  %v514_v29 = vld [vmem:[%s4418_s3 + $0x348] sm:$0xff]  ;;  %v2855_v30 = vcombine.low %v506_v25, %v510_v26 }
 0x158   : > { %1271 = vmatpush1.bf16.msra.mxu1 %v2759_v46  ;;  %1261 = vmatprep.mubr.bf16.mxu1 %v3564_v59  ;;  %v2783_v46 = vcombine.low %v434_v39, %v438_v40  ;;  %v518_v60 = vld [vmem:[%s4418_s3 + $0x368] sm:$0xff] }
 0x159   : > { %1272 = vmatprep.subr.bf16.mxu1 %v2768_v32  ;;  %v2864_v9 = vcombine.high %v514_v29, %v518_v60  ;;  %v522_v32 = vld [vmem:[%s4418_s3 + $0x388] sm:$0xff]  ;;  %v2863_v34 = vcombine.low %v514_v29, %v518_v60  ;;  %v459_v29 = vld [vmem:[%s4418_s3 + $0x190] sm:$0xff] }
 0x15a   : > { %v526_v33 = vld [vmem:[%s4418_s3 + $0x3a8] sm:$0xff]  ;;  %v463_v60 = vld [vmem:[%s4418_s3 + $0x1b0] sm:$0xff] }
 0x15b   : > { %v2872_v35 = vcombine.high %v522_v32, %v526_v33  ;;  %v2871_v38 = vcombine.low %v522_v32, %v526_v33  ;;  %v3060_v39 = vld [vmem:[%s4420_s5 + $0x4] ss:$8 sps:$4 sm:$0xff]   ;;  %v3080_v25 = vld [vmem:[%s4420_s5 + $0x60] ss:$8 sps:$4 sm:$0xff]   ;;  %v3083_v32 = vld [vmem:[%s4420_s5 + $0x70] ss:$8 sps:$4 sm:$0xff]  }
 0x15c   : > { %1273 = vmatpush1.bf16.msra.mxu1 %v2767_v36  ;;  %v530_v36 = vld [vmem:[%s4418_s3 + $0x3c8] sm:$0xff]  ;;  %2435 = vmatprep.subr.bf16.mxu0 %v3060_v39  ;;  %v467_v33 = vld [vmem:[%s4418_s3 + $0x1d0] sm:$0xff] }
 0x15d   : > { %1274 = vmatprep.subr.bf16.mxu1 %v2776_v37  ;;  %v534_v37 = vld [vmem:[%s4418_s3 + $0x3e8] sm:$0xff]  ;;  %v475_v39 = vld [vmem:[%s4418_s3 + $0x210] sm:$0xff] }
 0x15e   : > { %v2880_v40 = vcombine.high %v530_v36, %v534_v37  ;;  %v2879_v45 = vcombine.low %v530_v36, %v534_v37  ;;  %v3072_v11 = vld [vmem:[%s4420_s5 + $0x44] ss:$8 sps:$4 sm:$0xff]  }
 0x15f   : > { %1262 = vmatmul.mubr.bf16.gmra.mrb[4].mxu1 %v3580_v42  ;;  %v3078_v57 = vld [vmem:[%s4420_s5 + $0x64] ss:$8 sps:$4 sm:$0xff]  }
 0x160   : > { %1275 = vmatpush1.bf16.msra.mxu1 %v2775_v41  ;;  %1302 = vmatprep.mubr.bf16.mxu1 %v3559_v10  ;;  %v3062_v41 = vld [vmem:[%s4420_s5] ss:$8 sps:$4 sm:$0xff]   ;;  %v3084_v36 = vld [vmem:[%s4420_s5 + $0x84] ss:$8 sps:$4 sm:$0xff]  }
 0x161   : > { %1276 = vmatprep.subr.bf16.mxu1 %v2784_v43  ;;  %v411_v43 = vld [vmem:[%s4418_s3 + $0x10] sm:$0xff]  ;;  %2436 = vmatpush1.bf16.msra.mxu0 %v3062_v41 }
 0x164   : > { %1277 = vmatpush1.bf16.msra.mxu1 %v2783_v46  ;;  %v3063_v46 = vld [vmem:[%s4420_s5 + $0x14] ss:$8 sps:$4 sm:$0xff]  }
 0x165   : > { %1278 = vmatprep.subr.bf16.mxu1 %v2792_v47  ;;  %v2762_v47 = vcombine.high %v411_v43, %v415_v44  ;;  %2437 = vmatprep.subr.bf16.mxu0 %v3063_v46  ;;  %v483_v46 = vld [vmem:[%s4418_s3 + $0x250] sm:$0xff] }
 0x166   : > { %2438 = vmatpush1.bf16.msra.mxu0 %v3065_v48 }
 0x167   : > { %2439 = vmatprep.subr.bf16.mxu0 %v3066_v52  ;;  %v491_v52 = vld [vmem:[%s4418_s3 + $0x290] sm:$0xff] }
 0x168   : > { %1279 = vmatpush1.bf16.msra.mxu1 %v2791_v50  ;;  %v423_v50 = vld [vmem:[%s4418_s3 + $0x70] sm:$0xff] }
 0x169   : > { %1280 = vmatprep.subr.bf16.mxu1 %v2800_v51  ;;  %v2761_v51 = vcombine.low %v411_v43, %v415_v44  ;;  %v2770_v53 = vcombine.high %v419_v49, %v423_v50  ;;  %v2769_v63 = vcombine.low %v419_v49, %v423_v50  ;;  %v3087_v43 = vld [vmem:[%s4420_s5 + $0x94] ss:$8 sps:$4 sm:$0xff]   ;;  %v3090_v49 = vld [vmem:[%s4420_s5 + $0xa4] ss:$8 sps:$4 sm:$0xff]  }
 0x16c   : > { %1281 = vmatpush1.bf16.msra.mxu1 %v2799_v54  ;;  %v3068_v54 = vld [vmem:[%s4420_s5 + $0x20] ss:$8 sps:$4 sm:$0xff]  }
 0x16d   : > { %1282 = vmatprep.subr.bf16.mxu1 %v2808_v55  ;;  %v427_v55 = vld [vmem:[%s4418_s3 + $0x90] sm:$0xff]  ;;  %2440 = vmatpush1.bf16.msra.mxu0 %v3068_v54 }
 0x16e   : > { %v2778_v12 = vcombine.high %v427_v55, %v431_v56  ;;  %v2777_v15 = vcombine.low %v427_v55, %v431_v56  ;;  %v3093_v55 = vld [vmem:[%s4420_s5 + $0xb4] ss:$8 sps:$4 sm:$0xff]  }
 0x170   : > { %1283 = vmatpush1.bf16.msra.mxu1 %v2807_v1  ;;  %v3069_v1 = vld [vmem:[%s4420_s5 + $0x34] ss:$8 sps:$4 sm:$0xff]  }
 0x171   : > { %1284 = vmatprep.subr.bf16.mxu1 %v2816_v2  ;;  %v3071_v2 = vld [vmem:[%s4420_s5 + $0x30] ss:$8 sps:$4 sm:$0xff]   ;;  %2441 = vmatprep.subr.bf16.mxu0 %v3069_v1 }
 0x172   : > { %2442 = vmatpush1.bf16.msra.mxu0 %v3071_v2  ;;  %v499_v1 = vld [vmem:[%s4418_s3 + $0x2d0] sm:$0xff] }
 0x173   : > { %2443 = vmatprep.subr.bf16.mxu0 %v3072_v11  ;;  %v503_v2 = vld [vmem:[%s4418_s3 + $0x2f0] sm:$0xff] }
 0x174   : > { %1285 = vmatpush1.bf16.msra.mxu1 %v2815_v13  ;;  %v435_v13 = vld [vmem:[%s4418_s3 + $0xd0] sm:$0xff] }
 0x175   : > { %1286 = vmatprep.subr.bf16.mxu1 %v2824_v14  ;;  %v439_v14 = vld [vmem:[%s4418_s3 + $0xf0] sm:$0xff] }
 0x176   : > { %v2786_v16 = vcombine.high %v435_v13, %v439_v14 }
 0x178   : > { %1287 = vmatpush1.bf16.msra.mxu1 %v2823_v17  ;;  %v3074_v17 = vld [vmem:[%s4420_s5 + $0x40] ss:$8 sps:$4 sm:$0xff]  }
 0x179   : > { %1288 = vmatprep.subr.bf16.mxu1 %v2832_v18  ;;  %v443_v18 = vld [vmem:[%s4418_s3 + $0x110] sm:$0xff]  ;;  %2444 = vmatpush1.bf16.msra.mxu0 %v3074_v17  ;;  %v2849_v17 = vcombine.low %v499_v1, %v503_v2 }
 0x17a   : > { %v2794_v22 = vcombine.high %v443_v18, %v447_v19  ;;  %2445 = vmatprep.subr.bf16.mxu0 %v3075_v20  ;;  %v2793_v26 = vcombine.low %v443_v18, %v447_v19  ;;  %v3099_v18 = vld [vmem:[%s4420_s5 + $0xd4] ss:$8 sps:$4 sm:$0xff]   ;;  %v3101_v19 = vld [vmem:[%s4420_s5 + $0xd0] ss:$8 sps:$4 sm:$0xff]   ;;  %v3102_v20 = vld [vmem:[%s4420_s5 + $0xe4] ss:$8 sps:$4 sm:$0xff]  }
 0x17c   : > { %1289 = vmatpush1.bf16.msra.mxu1 %v2831_v58  ;;  %v3077_v58 = vld [vmem:[%s4420_s5 + $0x50] ss:$8 sps:$4 sm:$0xff]  }
 0x17d   : > { %1290 = vmatprep.subr.bf16.mxu1 %v2840_v21  ;;  %v2785_v21 = vcombine.low %v435_v13, %v439_v14  ;;  %2446 = vmatpush1.bf16.msra.mxu0 %v3077_v58  ;;  %v2850_v13 = vcombine.high %v499_v1, %v503_v2  ;;  %v3098_v14 = vld [vmem:[%s4420_s5 + $0xc0] ss:$8 sps:$4 sm:$0xff]  }
 0x17e   : > { %2447 = vmatprep.subr.bf16.mxu0 %v3078_v57  ;;  %v519_v57 = vld [vmem:[%s4418_s3 + $0x370] sm:$0xff] }
 0x180   : > { %1291 = vmatpush1.bf16.msra.mxu1 %v2839_v23  ;;  %v451_v23 = vld [vmem:[%s4418_s3 + $0x150] sm:$0xff] }
 0x181   : > { %1292 = vmatprep.subr.bf16.mxu1 %v2848_v24  ;;  %v455_v24 = vld [vmem:[%s4418_s3 + $0x170] sm:$0xff]  ;;  %2448 = vmatpush1.bf16.msra.mxu0 %v3080_v25 }
 0x184   : > { %1293 = vmatpush1.bf16.msra.mxu1 %v2847_v27  ;;  %v3081_v27 = vld [vmem:[%s4420_s5 + $0x74] ss:$8 sps:$4 sm:$0xff]  }
 0x185   : > { %1294 = vmatprep.subr.bf16.mxu1 %v2856_v28  ;;  %v2802_v28 = vcombine.high %v451_v23, %v455_v24  ;;  %2449 = vmatprep.subr.bf16.mxu0 %v3081_v27  ;;  %v527_v27 = vld [vmem:[%s4418_s3 + $0x3b0] sm:$0xff] }
 0x186   : > { %2450 = vmatpush1.bf16.msra.mxu0 %v3083_v32 }
 0x187   : > { %2451 = vmatprep.subr.bf16.mxu0 %v3084_v36  ;;  %v416_v36 = vld [vmem:[%s4418_s3 + $0x38] sm:$0xff] }
 0x188   : > { %1295 = vmatpush1.bf16.msra.mxu1 %v2855_v30  ;;  %v2801_v30 = vcombine.low %v451_v23, %v455_v24  ;;  %v3105_v24 = vld [vmem:[%s4420_s5 + $0xf4] ss:$8 sps:$4 sm:$0xff]  }
 0x189   : > { %1296 = vmatprep.subr.bf16.mxu1 %v2864_v9  ;;  %v2810_v9 = vcombine.high %v459_v29, %v463_v60 }
 0x18c   : > { %1297 = vmatpush1.bf16.msra.mxu1 %v2863_v34  ;;  %v471_v34 = vld [vmem:[%s4418_s3 + $0x1f0] sm:$0xff] }
 0x18d   : > { %1298 = vmatprep.subr.bf16.mxu1 %v2872_v35  ;;  %v2809_v35 = vcombine.low %v459_v29, %v463_v60  ;;  %v2818_v37 = vcombine.high %v467_v33, %v471_v34  ;;  %v2817_v41 = vcombine.low %v467_v33, %v471_v34  ;;  %v3110_v33 = vld [vmem:[%s4420_s5 + $0x104] ss:$8 sps:$4 sm:$0xff]  }
 0x190   : > { %1299 = vmatpush1.bf16.msra.mxu1 %v2871_v38  ;;  %v3086_v38 = vld [vmem:[%s4420_s5 + $0x80] ss:$8 sps:$4 sm:$0xff]  }
 0x191   : > { %1300 = vmatprep.subr.bf16.mxu1 %v2880_v40  ;;  %v479_v40 = vld [vmem:[%s4418_s3 + $0x230] sm:$0xff]  ;;  %2452 = vmatpush1.bf16.msra.mxu0 %v3086_v38 }
 0x192   : > { %v2826_v44 = vcombine.high %v475_v39, %v479_v40  ;;  %2453 = vmatprep.subr.bf16.mxu0 %v3087_v43  ;;  %v2825_v48 = vcombine.low %v475_v39, %v479_v40  ;;  %v420_v39 = vld [vmem:[%s4418_s3 + $0x58] sm:$0xff] }
 0x193   : > { %v424_v40 = vld [vmem:[%s4418_s3 + $0x78] sm:$0xff] }
 0x194   : > { %1301 = vmatpush1.bf16.msra.mxu1 %v2879_v45  ;;  %v3089_v45 = vld [vmem:[%s4420_s5 + $0x90] ss:$8 sps:$4 sm:$0xff]   ;;  %v2772_v43 = vcombine.high %v420_v39, %v424_v40 }
 0x195   : > { %1321 = vmatprep.subr.bf16.mxu1 %v2762_v47  ;;  %v487_v47 = vld [vmem:[%s4418_s3 + $0x270] sm:$0xff]  ;;  %2454 = vmatpush1.bf16.msra.mxu0 %v3089_v45  ;;  %v432_v45 = vld [vmem:[%s4418_s3 + $0xb8] sm:$0xff] }
 0x196   : > { %v2834_v50 = vcombine.high %v483_v46, %v487_v47  ;;  %2455 = vmatprep.subr.bf16.mxu0 %v3090_v49  ;;  %v2833_v54 = vcombine.low %v483_v46, %v487_v47  ;;  %v2771_v46 = vcombine.low %v420_v39, %v424_v40  ;;  %v440_v49 = vld [vmem:[%s4418_s3 + $0xf8] sm:$0xff] }
 0x197   : > { %1303 = vmatmul.mubr.bf16.vlgmr.msra.gmra.mrb[8].mxu1 %v3561_v31  ;;  %v524_v39 = vld [vmem:[%s4418_s3 + $0x398] sm:$0xff] }
 0x198   : > { %1312 = vmatprep.mubr.bf16.mxu1 %v3564_v59  ;;  %1322 = vmatpush1.bf16.msra.mxu1 %v2761_v51  ;;  %v3092_v51 = vld [vmem:[%s4420_s5 + $0xa0] ss:$8 sps:$4 sm:$0xff]   ;;  %v528_v40 = vld [vmem:[%s4418_s3 + $0x3b8] sm:$0xff] }
 0x199   : > { %1323 = vmatprep.subr.bf16.mxu1 %v2770_v53  ;;  %v495_v53 = vld [vmem:[%s4418_s3 + $0x2b0] sm:$0xff]  ;;  %2456 = vmatpush1.bf16.msra.mxu0 %v3092_v51 }
 0x19a   : > { %v2842_v56 = vcombine.high %v491_v52, %v495_v53  ;;  %2457 = vmatprep.subr.bf16.mxu0 %v3093_v55  ;;  %v2841_v11 = vcombine.low %v491_v52, %v495_v53  ;;  %v444_v52 = vld [vmem:[%s4418_s3 + $0x118] sm:$0xff] }
 0x19b   : > { %v448_v53 = vld [vmem:[%s4418_s3 + $0x138] sm:$0xff] }
 0x19c   : > { %1324 = vmatpush1.bf16.msra.mxu1 %v2769_v63  ;;  %v3095_v63 = vld [vmem:[%s4420_s5 + $0xb0] ss:$8 sps:$4 sm:$0xff]   ;;  %v2796_v55 = vcombine.high %v444_v52, %v448_v53  ;;  %v2795_v1 = vcombine.low %v444_v52, %v448_v53 }
 0x19d   : > { %1325 = vmatprep.subr.bf16.mxu1 %v2778_v12  ;;  %2458 = vmatpush1.bf16.msra.mxu0 %v3095_v63  ;;  %v3096_v12 = vld [vmem:[%s4420_s5 + $0xc4] ss:$8 sps:$4 sm:$0xff]   ;;  %v456_v63 = vld [vmem:[%s4418_s3 + $0x178] sm:$0xff] }
 0x19e   : > { %2459 = vmatprep.subr.bf16.mxu0 %v3096_v12 }
 0x19f   : > { %1313 = vmatmul.mubr.bf16.gmra.mrb[12].mxu1 %v3580_v42 }
 0x1a0   : > { %1326 = vmatpush1.bf16.msra.mxu1 %v2777_v15  ;;  %1353 = vmatprep.mubr.bf16.mxu1 %v3559_v10  ;;  %v507_v15 = vld [vmem:[%s4418_s3 + $0x310] sm:$0xff] }
 0x1a1   : > { %1327 = vmatprep.subr.bf16.mxu1 %v2786_v16  ;;  %v511_v16 = vld [vmem:[%s4418_s3 + $0x330] sm:$0xff]  ;;  %2460 = vmatpush1.bf16.msra.mxu0 %v3098_v14  ;;  %v468_v14 = vld [vmem:[%s4418_s3 + $0x1d8] sm:$0xff] }
 0x1a2   : > { %v2858_v58 = vcombine.high %v507_v15, %v511_v16  ;;  %2461 = vmatprep.subr.bf16.mxu0 %v3099_v18  ;;  %v2857_v23 = vcombine.low %v507_v15, %v511_v16  ;;  %v472_v15 = vld [vmem:[%s4418_s3 + $0x1f8] sm:$0xff] }
 0x1a3   : > { %v476_v18 = vld [vmem:[%s4418_s3 + $0x218] sm:$0xff] }
 0x1a4   : > { %1328 = vmatpush1.bf16.msra.mxu1 %v2785_v21  ;;  %v515_v21 = vld [vmem:[%s4418_s3 + $0x350] sm:$0xff] }
 0x1a5   : > { %1329 = vmatprep.subr.bf16.mxu1 %v2794_v22  ;;  %2462 = vmatpush1.bf16.msra.mxu0 %v3101_v19  ;;  %v3104_v22 = vld [vmem:[%s4420_s5 + $0xe0] ss:$8 sps:$4 sm:$0xff]   ;;  %v2866_v25 = vcombine.high %v515_v21, %v519_v57  ;;  %v2865_v29 = vcombine.low %v515_v21, %v519_v57  ;;  %v480_v19 = vld [vmem:[%s4418_s3 + $0x238] sm:$0xff] }
 0x1a6   : > { %2463 = vmatprep.subr.bf16.mxu0 %v3102_v20  ;;  %v2819_v20 = vcombine.low %v468_v14, %v472_v15  ;;  %v484_v21 = vld [vmem:[%s4418_s3 + $0x258] sm:$0xff] }
 0x1a7   : > { %v488_v57 = vld [vmem:[%s4418_s3 + $0x278] sm:$0xff] }
 0x1a8   : > { %1330 = vmatpush1.bf16.msra.mxu1 %v2793_v26  ;;  %v523_v26 = vld [vmem:[%s4418_s3 + $0x390] sm:$0xff] }
 0x1a9   : > { %1331 = vmatprep.subr.bf16.mxu1 %v2802_v28  ;;  %2464 = vmatpush1.bf16.msra.mxu0 %v3104_v22  ;;  %v3107_v28 = vld [vmem:[%s4420_s5 + $0xf0] ss:$8 sps:$4 sm:$0xff]   ;;  %v2874_v60 = vcombine.high %v523_v26, %v527_v27  ;;  %v2873_v32 = vcombine.low %v523_v26, %v527_v27  ;;  %v2827_v22 = vcombine.low %v476_v18, %v480_v19 }
 0x1aa   : > { %2465 = vmatprep.subr.bf16.mxu0 %v3105_v24  ;;  %v492_v24 = vld [vmem:[%s4418_s3 + $0x298] sm:$0xff]  ;;  %v2835_v26 = vcombine.low %v484_v21, %v488_v57 }
 0x1ac   : > { %1332 = vmatpush1.bf16.msra.mxu1 %v2801_v30  ;;  %v531_v30 = vld [vmem:[%s4418_s3 + $0x3d0] sm:$0xff] }
 0x1ad   : > { %1333 = vmatprep.subr.bf16.mxu1 %v2810_v9  ;;  %v535_v9 = vld [vmem:[%s4418_s3 + $0x3f0] sm:$0xff]  ;;  %2466 = vmatpush1.bf16.msra.mxu0 %v3107_v28  ;;  %v500_v28 = vld [vmem:[%s4418_s3 + $0x2d8] sm:$0xff] }
 0x1ae   : > { %v2882_v34 = vcombine.high %v531_v30, %v535_v9  ;;  %2486 = vmatprep.subr.bf16.mxu0 %v3110_v33 }
 0x1b0   : > { %1334 = vmatpush1.bf16.msra.mxu1 %v2809_v35  ;;  %v412_v35 = vld [vmem:[%s4418_s3 + $0x18] sm:$0xff] }
 0x1b1   : > { %1335 = vmatprep.subr.bf16.mxu1 %v2818_v37  ;;  %v2881_v37 = vcombine.low %v531_v30, %v535_v9  ;;  %v2764_v38 = vcombine.high %v412_v35, %v416_v36  ;;  %v508_v9 = vld [vmem:[%s4418_s3 + $0x318] sm:$0xff] }
 0x1b4   : > { %1336 = vmatpush1.bf16.msra.mxu1 %v2817_v41  ;;  %v2763_v41 = vcombine.low %v412_v35, %v416_v36  ;;  %v516_v35 = vld [vmem:[%s4418_s3 + $0x358] sm:$0xff] }
 0x1b5   : > { %1337 = vmatprep.subr.bf16.mxu1 %v2826_v44  ;;  %v428_v44 = vld [vmem:[%s4418_s3 + $0x98] sm:$0xff] }
 0x1b6   : > { %v2780_v47 = vcombine.high %v428_v44, %v432_v45  ;;  %v520_v36 = vld [vmem:[%s4418_s3 + $0x378] sm:$0xff] }
 0x1b8   : > { %1338 = vmatpush1.bf16.msra.mxu1 %v2825_v48  ;;  %v436_v48 = vld [vmem:[%s4418_s3 + $0xd8] sm:$0xff] }
 0x1b9   : > { %1339 = vmatprep.subr.bf16.mxu1 %v2834_v50  ;;  %v2779_v50 = vcombine.low %v428_v44, %v432_v45  ;;  %v2788_v51 = vcombine.high %v436_v48, %v440_v49  ;;  %v532_v44 = vld [vmem:[%s4418_s3 + $0x3d8] sm:$0xff] }
 0x1ba   : > { %v536_v45 = vld [vmem:[%s4418_s3 + $0x3f8] sm:$0xff] }
 0x1bc   : > { %1340 = vmatpush1.bf16.msra.mxu1 %v2833_v54  ;;  %v2787_v54 = vcombine.low %v436_v48, %v440_v49  ;;  %v2883_v48 = vcombine.low %v532_v44, %v536_v45  ;;  %v3961_v49 = vld [vmem:[%s4419_s4] sm:$0xff] }
 0x1bd   : > { %1341 = vmatprep.subr.bf16.mxu1 %v2842_v56  ;;  %v452_v56 = vld [vmem:[%s4418_s3 + $0x158] sm:$0xff] }
 0x1be   : > { %v2804_v2 = vcombine.high %v452_v56, %v456_v63  ;;  %v2803_v12 = vcombine.low %v452_v56, %v456_v63 }
 0x1c0   : > { %1342 = vmatpush1.bf16.msra.mxu1 %v2841_v11  ;;  %v460_v11 = vld [vmem:[%s4418_s3 + $0x198] sm:$0xff] }
 0x1c1   : > { %1343 = vmatprep.subr.bf16.mxu1 %v2850_v13 }
 0x1c4   : > { %1344 = vmatpush1.bf16.msra.mxu1 %v2849_v17  ;;  %v2820_v17 = vcombine.high %v468_v14, %v472_v15 }
 0x1c5   : > { %1345 = vmatprep.subr.bf16.mxu1 %v2858_v58  ;;  %v2828_v58 = vcombine.high %v476_v18, %v480_v19 }
 0x1c8   : > { %1346 = vmatpush1.bf16.msra.mxu1 %v2857_v23  ;;  %v2836_v23 = vcombine.high %v484_v21, %v488_v57 }
 0x1c9   : > { %1347 = vmatprep.subr.bf16.mxu1 %v2866_v25  ;;  %v496_v25 = vld [vmem:[%s4418_s3 + $0x2b8] sm:$0xff] }
 0x1ca   : > { %v2844_v27 = vcombine.high %v492_v24, %v496_v25 }
 0x1cc   : > { %1348 = vmatpush1.bf16.msra.mxu1 %v2865_v29  ;;  %v504_v29 = vld [vmem:[%s4418_s3 + $0x2f8] sm:$0xff] }
 0x1cd   : > { %1349 = vmatprep.subr.bf16.mxu1 %v2874_v60  ;;  %v2843_v60 = vcombine.low %v492_v24, %v496_v25  ;;  %v2852_v30 = vcombine.high %v500_v28, %v504_v29  ;;  %v2851_v33 = vcombine.low %v500_v28, %v504_v29 }
 0x1d0   : > { %1350 = vmatpush1.bf16.msra.mxu1 %v2873_v32  ;;  %v512_v32 = vld [vmem:[%s4418_s3 + $0x338] sm:$0xff] }
 0x1d1   : > { %1351 = vmatprep.subr.bf16.mxu1 %v2882_v34  ;;  %v2860_v34 = vcombine.high %v508_v9, %v512_v32 }
 0x1d4   : > { %1352 = vmatpush1.bf16.msra.mxu1 %v2881_v37  ;;  %v2859_v37 = vcombine.low %v508_v9, %v512_v32 }
 0x1d5   : > { %1372 = vmatprep.subr.bf16.mxu1 %v2764_v38  ;;  %v2868_v38 = vcombine.high %v516_v35, %v520_v36 }
 0x1d7   : > { %1354 = vmatmul.mubr.bf16.vlgmr.msra.gmra.mrb[16].mxu1 %v3561_v31 }
 0x1d8   : > { %1363 = vmatprep.mubr.bf16.mxu1 %v3564_v59  ;;  %1373 = vmatpush1.bf16.msra.mxu1 %v2763_v41  ;;  %v2867_v41 = vcombine.low %v516_v35, %v520_v36 }
 0x1d9   : > { %1374 = vmatprep.subr.bf16.mxu1 %v2772_v43  ;;  %v2876_v43 = vcombine.high %v524_v39, %v528_v40 }
 0x1dc   : > { %1375 = vmatpush1.bf16.msra.mxu1 %v2771_v46  ;;  %v2875_v46 = vcombine.low %v524_v39, %v528_v40 }
 0x1dd   : > { %1376 = vmatprep.subr.bf16.mxu1 %v2780_v47  ;;  %v2884_v47 = vcombine.high %v532_v44, %v536_v45 }
 0x1df   : > { %1364 = vmatmul.mubr.bf16.gmra.mrb[20].mxu1 %v3580_v42 }
 0x1e0   : > { %1377 = vmatpush1.bf16.msra.mxu1 %v2779_v50  ;;  %1404 = vmatprep.mubr.bf16.mxu1 %v3559_v10  ;;  %v464_v10 = vld [vmem:[%s4418_s3 + $0x1b8] sm:$0xff]  ;;  %v542_v50 = vrot.slane %v3961_v49, %v3538_v0 }
 0x1e1   : > { %1378 = vmatprep.subr.bf16.mxu1 %v2788_v51  ;;  %v2812_v13 = vcombine.high %v460_v11, %v464_v10  ;;  %v2811_v16 = vcombine.low %v460_v11, %v464_v10  ;;  %v546_v51 = vrot.slane %v3961_v49, %v3532_v62 }
 0x1e4   : > { %1379 = vmatpush1.bf16.msra.mxu1 %v2787_v54 }
 0x1e5   : > { %1380 = vmatprep.subr.bf16.mxu1 %v2796_v55 }
 0x1e8   : > { %1381 = vmatpush1.bf16.msra.mxu1 %v2795_v1 }
 0x1e9   : > { %1382 = vmatprep.subr.bf16.mxu1 %v2804_v2 }
 0x1ec   : > { %1383 = vmatpush1.bf16.msra.mxu1 %v2803_v12 }
 0x1ed   : > { %1384 = vmatprep.subr.bf16.mxu1 %v2812_v13 }
 0x1f0   : > { %1385 = vmatpush1.bf16.msra.mxu1 %v2811_v16 }
 0x1f1   : > { %1386 = vmatprep.subr.bf16.mxu1 %v2820_v17 }
 0x1f4   : > { %1387 = vmatpush1.bf16.msra.mxu1 %v2819_v20 }
 0x1f5   : > { %1388 = vmatprep.subr.bf16.mxu1 %v2828_v58 }
 0x1f8   : > { %1389 = vmatpush1.bf16.msra.mxu1 %v2827_v22 }
 0x1f9   : > { %1390 = vmatprep.subr.bf16.mxu1 %v2836_v23 }
 0x1fc   : > { %1391 = vmatpush1.bf16.msra.mxu1 %v2835_v26 }
 0x1fd   : > { %1392 = vmatprep.subr.bf16.mxu1 %v2844_v27 }
 0x200   : > { %1393 = vmatpush1.bf16.msra.mxu1 %v2843_v60 }
 0x201   : > { %1394 = vmatprep.subr.bf16.mxu1 %v2852_v30 }
 0x204   : > { %1395 = vmatpush1.bf16.msra.mxu1 %v2851_v33 }
 0x205   : > { %1396 = vmatprep.subr.bf16.mxu1 %v2860_v34 }
 0x208   : > { %1397 = vmatpush1.bf16.msra.mxu1 %v2859_v37 }
 0x209   : > { %1398 = vmatprep.subr.bf16.mxu1 %v2868_v38 }
 0x20c   : > { %1399 = vmatpush1.bf16.msra.mxu1 %v2867_v41 }
 0x20d   : > { %1400 = vmatprep.subr.bf16.mxu1 %v2876_v43 }
 0x210   : > { %1401 = vmatpush1.bf16.msra.mxu1 %v2875_v46 }
 0x211   : > { %1402 = vmatprep.subr.bf16.mxu1 %v2884_v47 }
 0x214   : > { %1403 = vmatpush1.bf16.msra.mxu1 %v2883_v48 }
 0x217   : > { %1405 = vmatmul.mubr.bf16.vlgmr.msra.gmra.mrb[24].mxu1 %v3561_v31 }
 0x218   : > { %1414 = vmatprep.mubr.bf16.mxu1 %v3564_v59 }
 0x21f   : > { %1415 = vmatmul.mubr.bf16.gmra.mrb[28].mxu1 %v3580_v42 }
 0x22a   : > { %v1253_v52 = vpop.f32.mrb[0].mxu1 }
 0x22b   : > { %v1254_v53 = vadd.f32 %v1253_v52, %v542_v50  ;;  %v1255_v54 = vpop.f32.mrb[1].mxu1 }
 0x22c   : > { %v1256_v55 = vadd.f32 %v1255_v54, %v546_v51  ;;  %v1257_v31 = vpop.f32.mrb[2].mxu1 }
 0x22d   : > { %v1423_v56 = vmul.f32 %v1254_v53, %v1254_v53  ;;  %v1258_v59 = vadd.f32 %v1257_v31, %v542_v50  ;;  %v1259_v63 = vpop.f32.mrb[3].mxu1 }
 0x22e   : > { %v1424_v42 = vmul.f32 %v1256_v55, %v1256_v55  ;;  %v1260_v1 = vadd.f32 %v1259_v63, %v546_v51 }
 0x22f   : > { %v1447_v2 = vmul.f32 %v1423_v56, %v1254_v53  ;;  %v1431_v11 = vmul.f32 %v1258_v59, %v1258_v59 }
 0x230   : > { %v1448_v10 = vmul.f32 %v1424_v42, %v1256_v55  ;;  %v1432_v12 = vmul.f32 %v1260_v1, %v1260_v1 }
 0x231   : > { %v1471_v13 = vmul.f32 0.044715, %v1447_v2  ;;  %v1455_v14 = vmul.f32 %v1431_v11, %v1258_v59 }
 0x232   : > { %v1472_v15 = vmul.f32 0.044715, %v1448_v10  ;;  %v1456_v16 = vmul.f32 %v1432_v12, %v1260_v1  ;;  %v1263_v17 = vpop.f32.mrb[4].mxu1 }
 0x233   : > { %v1495_v18 = vadd.f32 %v1471_v13, %v1254_v53  ;;  %v1479_v19 = vmul.f32 0.044715, %v1455_v14  ;;  %v1264_v20 = vadd.f32 %v1263_v17, %v542_v50  ;;  %v1265_v58 = vpop.f32.mrb[5].mxu1  ;;  %v3108_v14 = vld [vmem:[%s4420_s5 + $0x100] ss:$8 sps:$4 sm:$0xff]  }
 0x234   : > { %v1480_v21 = vmul.f32 0.044715, %v1456_v16  ;;  %v1266_v57 = vadd.f32 %v1265_v58, %v546_v51  ;;  %v1267_v22 = vpop.f32.mrb[6].mxu1  ;;  %v1496_v23 = vadd.f32 %v1472_v15, %v1256_v55  ;;  %v3113_v16 = vld [vmem:[%s4420_s5 + $0x114] ss:$8 sps:$4 sm:$0xff]  }
 0x235   : > { %v1519_v24 = vmul.f32 0.7978846, %v1495_v18  ;;  %v1503_v25 = vadd.f32 %v1479_v19, %v1258_v59  ;;  %v1439_v26 = vmul.f32 %v1264_v20, %v1264_v20  ;;  %v1268_v27 = vpop.f32.mrb[7].mxu1  ;;  %v3114_v58 = vld [vmem:[%s4420_s5 + $0x120] ss:$8 sps:$4 sm:$0xff]  }
 0x236   : > { %v1440_v28 = vmul.f32 %v1266_v57, %v1266_v57  ;;  %v1504_v29 = vadd.f32 %v1480_v21, %v1260_v1  ;;  %v1520_v60 = vmul.f32 0.7978846, %v1496_v23  ;;  %v3119_v22 = vld [vmem:[%s4420_s5 + $0x134] ss:$8 sps:$4 sm:$0xff]   ;;  %v3120_v23 = vld [vmem:[%s4420_s5 + $0x140] ss:$8 sps:$4 sm:$0xff]  }
 0x237   : > { %3258 = vtanh.f32 %v1519_v24  ;;  %v1527_v30 = vmul.f32 0.7978846, %v1503_v25  ;;  %v1463_v9 = vmul.f32 %v1439_v26, %v1264_v20  ;;  %v3125_v24 = vld [vmem:[%s4420_s5 + $0x154] ss:$8 sps:$4 sm:$0xff]   ;;  %v3123_v25 = vld [vmem:[%s4420_s5 + $0x150] ss:$8 sps:$4 sm:$0xff]  }
 0x238   : > { %v1464_v32 = vmul.f32 %v1440_v28, %v1266_v57  ;;  %v1528_v33 = vmul.f32 0.7978846, %v1504_v29  ;;  %3260 = vtanh.f32 %v1520_v60  ;;  %v3128_v26 = vld [vmem:[%s4420_s5 + $0x164] ss:$8 sps:$4 sm:$0xff]   ;;  %v3126_v27 = vld [vmem:[%s4420_s5 + $0x160] ss:$8 sps:$4 sm:$0xff]  }
 0x239   : > { %3262 = vtanh.f32 %v1527_v30  ;;  %v1487_v34 = vmul.f32 0.044715, %v1463_v9  ;;  %v549_v28 = vsub.s32 2, %v3529_v61  ;;  %v3131_v29 = vld [vmem:[%s4420_s5 + $0x174] ss:$8 sps:$4 sm:$0xff]   ;;  %v553_v60 = vsub.s32 3, %v3529_v61 }
 0x23a   : > { %v1488_v35 = vmul.f32 0.044715, %v1464_v32  ;;  %3264 = vtanh.f32 %v1528_v33  ;;  %v3129_v9 = vld [vmem:[%s4420_s5 + $0x170] ss:$8 sps:$4 sm:$0xff]   ;;  %v3134_v33 = vld [vmem:[%s4420_s5 + $0x184] ss:$8 sps:$4 sm:$0xff]  }
 0x23b   : > { %v1511_v36 = vadd.f32 %v1487_v34, %v1264_v20  ;;  %v550_v30 = vrot.slane %v3961_v49, %v549_v28  ;;  %v554_v32 = vrot.slane %v3961_v49, %v553_v60  ;;  %v3144_v60 = vld [vmem:[%s4420_s5 + $0x1c0] ss:$8 sps:$4 sm:$0xff]  }
 0x23c   : > { %v1512_v37 = vadd.f32 %v1488_v35, %v1266_v57 }
 0x23d   : > { %v1535_v38 = vmul.f32 0.7978846, %v1511_v36 }
 0x23e   : > { %v1536_v39 = vmul.f32 0.7978846, %v1512_v37  ;;  %v3132_v37 = vld [vmem:[%s4420_s5 + $0x180] ss:$8 sps:$4 sm:$0xff]  }
 0x23f   : > { %3266 = vtanh.f32 %v1535_v38 }
 0x240   : > { %3268 = vtanh.f32 %v1536_v39 }
 0x241   : > { %v3259_v40 = vpop.eup %3258 }
 0x242   : > { %v3261_v41 = vpop.eup %3260  ;;  %v1567_v43 = vadd.f32 1.0, %v3259_v40  ;;  %v3137_v40 = vld [vmem:[%s4420_s5 + $0x194] ss:$8 sps:$4 sm:$0xff]  }
 0x243   : > { %v3263_v44 = vpop.eup %3262  ;;  %v1568_v45 = vadd.f32 1.0, %v3261_v41 }
 0x244   : > { %v3265_v46 = vpop.eup %3264  ;;  %v1575_v47 = vadd.f32 1.0, %v3263_v44  ;;  %v1591_v48 = vmul.f32 0.5, %v1567_v43 }
 0x245   : > { %v1576_v50 = vadd.f32 1.0, %v3265_v46  ;;  %v1592_v51 = vmul.f32 0.5, %v1568_v45 }
 0x246   : > { %v1599_v52 = vmul.f32 0.5, %v1575_v47  ;;  %v1615_v31 = vmul.f32 %v1591_v48, %v1254_v53 }
 0x247   : > { %v1600_v54 = vmul.f32 0.5, %v1576_v50  ;;  %v1616_v42 = vmul.f32 %v1592_v51, %v1256_v55  ;;  %v3111_v55 = vld [vmem:[%s4420_s5 + $0x110] ss:$8 sps:$4 sm:$0xff]  }
 0x248   : > { %v1623_v56 = vmul.f32 %v1599_v52, %v1258_v59  ;;  %v3135_v50 = vld [vmem:[%s4420_s5 + $0x190] ss:$8 sps:$4 sm:$0xff]  }
 0x249   : > { %v3267_v63 = vpop.eup %3266  ;;  %v1624_v2 = vmul.f32 %v1600_v54, %v1260_v1  ;;  %v3116_v1 = vld [vmem:[%s4420_s5 + $0x124] ss:$8 sps:$4 sm:$0xff]  }
 0x24a   : > { %v3269_v11 = vpop.eup %3268  ;;  %v1639_v10 = vpack.c.bf16 %v1623_v56, %v1615_v31  ;;  %v1583_v12 = vadd.f32 1.0, %v3267_v63  ;;  %v3140_v54 = vld [vmem:[%s4420_s5 + $0x1a4] ss:$8 sps:$4 sm:$0xff]  }
 0x24b   : > { %v1640_v13 = vpack.c.bf16 %v1624_v2, %v1616_v42  ;;  %v1584_v15 = vadd.f32 1.0, %v3269_v11 }
 0x24c   : > { %v1607_v17 = vmul.f32 0.5, %v1583_v12 }
 0x24d   : > { %2467 = vmatprep.mubr.bf16.mxu0 %v1640_v13  ;;  %v1608_v53 = vmul.f32 0.5, %v1584_v15 }
 0x24e   : > { %2468 = vmatmul.mubr.bf16.vlgmr.msra.gmra.mrb[0].mxu0 %v1639_v10  ;;  %v1631_v18 = vmul.f32 %v1607_v17, %v1264_v20  ;;  %v3122_v20 = vld [vmem:[%s4420_s5 + $0x144] ss:$8 sps:$4 sm:$0xff]  }
 0x24f   : > { %2487 = vmatpush1.bf16.msra.mxu0 %v3108_v14  ;;  %v1632_v59 = vmul.f32 %v1608_v53, %v1266_v57  ;;  %v3117_v57 = vld [vmem:[%s4420_s5 + $0x130] ss:$8 sps:$4 sm:$0xff]   ;;  %v3138_v14 = vld [vmem:[%s4420_s5 + $0x1a0] ss:$8 sps:$4 sm:$0xff]  }
 0x250   : > { %2488 = vmatprep.subr.bf16.mxu0 %v3113_v16  ;;  %v1647_v21 = vpack.c.bf16 %v1631_v18, %v1631_v18 }
 0x251   : > { %v1648_v19 = vpack.c.bf16 %v1632_v59, %v1632_v59 }
 0x253   : > { %2489 = vmatpush1.bf16.msra.mxu0 %v3111_v55  ;;  %2477 = vmatprep.mubr.bf16.mxu0 %v1648_v19  ;;  %v3143_v55 = vld [vmem:[%s4420_s5 + $0x1b4] ss:$8 sps:$4 sm:$0xff]  }
 0x254   : > { %2490 = vmatprep.subr.bf16.mxu0 %v3116_v1 }
 0x256   : > { %2478 = vmatmul.mubr.bf16.gmra.mrb[4].mxu0 %v1647_v21 }
 0x257   : > { %2491 = vmatpush1.bf16.msra.mxu0 %v3114_v58 }
 0x258   : > { %2492 = vmatprep.subr.bf16.mxu0 %v3119_v22 }
 0x25b   : > { %2493 = vmatpush1.bf16.msra.mxu0 %v3117_v57 }
 0x25c   : > { %2494 = vmatprep.subr.bf16.mxu0 %v3122_v20 }
 0x25f   : > { %2495 = vmatpush1.bf16.msra.mxu0 %v3120_v23  ;;  %v3141_v23 = vld [vmem:[%s4420_s5 + $0x1b0] ss:$8 sps:$4 sm:$0xff]  }
 0x260   : > { %2496 = vmatprep.subr.bf16.mxu0 %v3125_v24 }
 0x263   : > { %2497 = vmatpush1.bf16.msra.mxu0 %v3123_v25 }
 0x264   : > { %2498 = vmatprep.subr.bf16.mxu0 %v3128_v26  ;;  %v3146_v26 = vld [vmem:[%s4420_s5 + $0x1c4] ss:$8 sps:$4 sm:$0xff]  }
 0x267   : > { %2499 = vmatpush1.bf16.msra.mxu0 %v3126_v27 }
 0x268   : > { %2500 = vmatprep.subr.bf16.mxu0 %v3131_v29 }
 0x26a   : > { %v1304_v34 = vpop.f32.mrb[8].mxu1 }
 0x26b   : > { %v4019_v35 = vadd.f32 %v1304_v34, %v550_v30  ;;  %v1306_v36 = vpop.f32.mrb[9].mxu1  ;;  %2501 = vmatpush1.bf16.msra.mxu0 %v3129_v9  ;;  %v3149_v9 = vld [vmem:[%s4420_s5 + $0x1d4] ss:$8 sps:$4 sm:$0xff]   ;;  %v3147_v34 = vld [vmem:[%s4420_s5 + $0x1d0] ss:$8 sps:$4 sm:$0xff]  }
 0x26c   : > { %v4024_v38 = vadd.f32 %v1306_v36, %v554_v32  ;;  %v1308_v39 = vpop.f32.mrb[10].mxu1  ;;  %2502 = vmatprep.subr.bf16.mxu0 %v3134_v33  ;;  %v3152_v36 = vld [vmem:[%s4420_s5 + $0x1e4] ss:$8 sps:$4 sm:$0xff]  }
 0x26d   : > { %v1425_v41 = vmul.f32 %v4019_v35, %v4019_v35  ;;  %v4031_v43 = vadd.f32 %v1308_v39, %v550_v30  ;;  %v1310_v44 = vpop.f32.mrb[11].mxu1 }
 0x26e   : > { %v1426_v45 = vmul.f32 %v4024_v38, %v4024_v38  ;;  %v4035_v46 = vadd.f32 %v1310_v44, %v554_v32  ;;  %v3150_v44 = vld [vmem:[%s4420_s5 + $0x1e0] ss:$8 sps:$4 sm:$0xff]  }
 0x26f   : > { %v1449_v47 = vmul.f32 %v1425_v41, %v4019_v35  ;;  %v1433_v48 = vmul.f32 %v4031_v43, %v4031_v43  ;;  %2503 = vmatpush1.bf16.msra.mxu0 %v3132_v37 }
 0x270   : > { %v1450_v51 = vmul.f32 %v1426_v45, %v4024_v38  ;;  %v1434_v52 = vmul.f32 %v4035_v46, %v4035_v46  ;;  %2504 = vmatprep.subr.bf16.mxu0 %v3137_v40 }
 0x271   : > { %v1473_v31 = vmul.f32 0.044715, %v1449_v47  ;;  %v1457_v56 = vmul.f32 %v1433_v48, %v4031_v43 }
 0x272   : > { %v1474_v63 = vmul.f32 0.044715, %v1450_v51  ;;  %v1458_v42 = vmul.f32 %v1434_v52, %v4035_v46  ;;  %v1314_v2 = vpop.f32.mrb[12].mxu1  ;;  %v3155_v51 = vld [vmem:[%s4420_s5 + $0x1f4] ss:$8 sps:$4 sm:$0xff]  }
 0x273   : > { %v1497_v11 = vadd.f32 %v1473_v31, %v4019_v35  ;;  %v1481_v10 = vmul.f32 0.044715, %v1457_v56  ;;  %v4052_v12 = vadd.f32 %v1314_v2, %v550_v30  ;;  %v1316_v13 = vpop.f32.mrb[13].mxu1  ;;  %2505 = vmatpush1.bf16.msra.mxu0 %v3135_v50  ;;  %v3153_v56 = vld [vmem:[%s4420_s5 + $0x1f0] ss:$8 sps:$4 sm:$0xff]  }
 0x274   : > { %v1498_v15 = vadd.f32 %v1474_v63, %v4024_v38  ;;  %v1482_v16 = vmul.f32 0.044715, %v1458_v42  ;;  %v4058_v17 = vadd.f32 %v1316_v13, %v554_v32  ;;  %v1318_v53 = vpop.f32.mrb[14].mxu1  ;;  %2506 = vmatprep.subr.bf16.mxu0 %v3140_v54 }
 0x275   : > { %v1521_v59 = vmul.f32 0.7978846, %v1497_v11  ;;  %v1505_v1 = vadd.f32 %v1481_v10, %v4031_v43  ;;  %v1441_v18 = vmul.f32 %v4052_v12, %v4052_v12  ;;  %v1319_v19 = vpop.f32.mrb[15].mxu1  ;;  %v3158_v11 = vld [vmem:[%s4420_s5 + $0x204] ss:$8 sps:$4 sm:$0xff]  }
 0x276   : > { %v1522_v58 = vmul.f32 0.7978846, %v1498_v15  ;;  %v1506_v21 = vadd.f32 %v1482_v16, %v4035_v46  ;;  %v1442_v22 = vmul.f32 %v4058_v17, %v4058_v17 }
 0x277   : > { %3270 = vtanh.f32 %v1521_v59  ;;  %v1529_v57 = vmul.f32 0.7978846, %v1505_v1  ;;  %v1465_v20 = vmul.f32 %v1441_v18, %v4052_v12  ;;  %2507 = vmatpush1.bf16.msra.mxu0 %v3138_v14  ;;  %v3161_v59 = vld [vmem:[%s4420_s5 + $0x214] ss:$8 sps:$4 sm:$0xff]  }
 0x278   : > { %3272 = vtanh.f32 %v1522_v58  ;;  %v1530_v24 = vmul.f32 0.7978846, %v1506_v21  ;;  %v1466_v25 = vmul.f32 %v1442_v22, %v4058_v17  ;;  %2508 = vmatprep.subr.bf16.mxu0 %v3143_v55  ;;  %v3164_v58 = vld [vmem:[%s4420_s5 + $0x224] ss:$8 sps:$4 sm:$0xff]   ;;  %v3162_v22 = vld [vmem:[%s4420_s5 + $0x220] ss:$8 sps:$4 sm:$0xff]  }
 0x279   : > { %3274 = vtanh.f32 %v1529_v57  ;;  %v1489_v27 = vmul.f32 0.044715, %v1465_v20  ;;  %v3170_v20 = vld [vmem:[%s4420_s5 + $0x244] ss:$8 sps:$4 sm:$0xff]  }
 0x27a   : > { %3276 = vtanh.f32 %v1530_v24  ;;  %v1490_v28 = vmul.f32 0.044715, %v1466_v25  ;;  %v3173_v24 = vld [vmem:[%s4420_s5 + $0x254] ss:$8 sps:$4 sm:$0xff]   ;;  %v3171_v25 = vld [vmem:[%s4420_s5 + $0x250] ss:$8 sps:$4 sm:$0xff]  }
 0x27b   : > { %v1513_v29 = vadd.f32 %v1489_v27, %v4052_v12  ;;  %2509 = vmatpush1.bf16.msra.mxu0 %v3141_v23  ;;  %v3168_v23 = vld [vmem:[%s4420_s5 + $0x240] ss:$8 sps:$4 sm:$0xff]  }
 0x27c   : > { %v1514_v30 = vadd.f32 %v1490_v28, %v4058_v17  ;;  %2510 = vmatprep.subr.bf16.mxu0 %v3146_v26  ;;  %v3176_v26 = vld [vmem:[%s4420_s5 + $0x264] ss:$8 sps:$4 sm:$0xff]   ;;  %v3174_v27 = vld [vmem:[%s4420_s5 + $0x260] ss:$8 sps:$4 sm:$0xff]   ;;  %v557_v28 = vsub.s32 4, %v3529_v61 }
 0x27d   : > { %v1537_v32 = vmul.f32 0.7978846, %v1513_v29  ;;  %v3179_v29 = vld [vmem:[%s4420_s5 + $0x274] ss:$8 sps:$4 sm:$0xff]  }
 0x27e   : > { %v1538_v33 = vmul.f32 0.7978846, %v1514_v30  ;;  %v558_v30 = vrot.slane %v3961_v49, %v557_v28 }
 0x27f   : > { %3278 = vtanh.f32 %v1537_v32  ;;  %2511 = vmatpush1.bf16.msra.mxu0 %v3144_v60  ;;  %v561_v60 = vsub.s32 5, %v3529_v61 }
 0x280   : > { %3280 = vtanh.f32 %v1538_v33  ;;  %2512 = vmatprep.subr.bf16.mxu0 %v3149_v9  ;;  %v3177_v9 = vld [vmem:[%s4420_s5 + $0x270] ss:$8 sps:$4 sm:$0xff]   ;;  %v3182_v33 = vld [vmem:[%s4420_s5 + $0x284] ss:$8 sps:$4 sm:$0xff]  }
 0x281   : > { %v3271_v37 = vpop.eup %3270  ;;  %v562_v32 = vrot.slane %v3961_v49, %v561_v60  ;;  %v3192_v60 = vld [vmem:[%s4420_s5 + $0x2c0] ss:$8 sps:$4 sm:$0xff]  }
 0x282   : > { %v3273_v39 = vpop.eup %3272  ;;  %v1569_v40 = vadd.f32 1.0, %v3271_v37 }
 0x283   : > { %v3275_v41 = vpop.eup %3274  ;;  %2513 = vmatpush1.bf16.msra.mxu0 %v3147_v34  ;;  %v1570_v45 = vadd.f32 1.0, %v3273_v39  ;;  %v3180_v39 = vld [vmem:[%s4420_s5 + $0x280] ss:$8 sps:$4 sm:$0xff]  }
 0x284   : > { %v3277_v47 = vpop.eup %3276  ;;  %v1593_v48 = vmul.f32 0.5, %v1569_v40  ;;  %v1577_v50 = vadd.f32 1.0, %v3275_v41  ;;  %2514 = vmatprep.subr.bf16.mxu0 %v3152_v36 }
 0x285   : > { %v1578_v52 = vadd.f32 1.0, %v3277_v47  ;;  %v1594_v54 = vmul.f32 0.5, %v1570_v45 }
 0x286   : > { %v1601_v31 = vmul.f32 0.5, %v1577_v50  ;;  %v1617_v42 = vmul.f32 %v1593_v48, %v4019_v35  ;;  %v3156_v35 = vld [vmem:[%s4420_s5 + $0x200] ss:$8 sps:$4 sm:$0xff]  }
 0x287   : > { %2515 = vmatpush1.bf16.msra.mxu0 %v3150_v44  ;;  %v1602_v63 = vmul.f32 0.5, %v1578_v52  ;;  %v1618_v13 = vmul.f32 %v1594_v54, %v4024_v38  ;;  %v3185_v44 = vld [vmem:[%s4420_s5 + $0x294] ss:$8 sps:$4 sm:$0xff]  }
 0x288   : > { %v1625_v2 = vmul.f32 %v1601_v31, %v4031_v43  ;;  %2516 = vmatprep.subr.bf16.mxu0 %v3155_v51  ;;  %v3183_v31 = vld [vmem:[%s4420_s5 + $0x290] ss:$8 sps:$4 sm:$0xff]  }
 0x289   : > { %v3279_v10 = vpop.eup %3278  ;;  %v1626_v14 = vmul.f32 %v1602_v63, %v4035_v46  ;;  %v3159_v46 = vld [vmem:[%s4420_s5 + $0x210] ss:$8 sps:$4 sm:$0xff]  }
 0x28a   : > { %v3281_v15 = vpop.eup %3280  ;;  %v1641_v16 = vpack.c.bf16 %v1625_v2, %v1617_v42  ;;  %v1585_v53 = vadd.f32 1.0, %v3279_v10  ;;  %v3188_v42 = vld [vmem:[%s4420_s5 + $0x2a4] ss:$8 sps:$4 sm:$0xff]  }
 0x28b   : > { %2517 = vmatpush1.bf16.msra.mxu0 %v3153_v56  ;;  %v1642_v55 = vpack.c.bf16 %v1626_v14, %v1618_v13  ;;  %v1586_v43 = vadd.f32 1.0, %v3281_v15 }
 0x28c   : > { %2537 = vmatprep.subr.bf16.mxu0 %v3158_v11  ;;  %v1609_v1 = vmul.f32 0.5, %v1585_v53 }
 0x28d   : > { %2518 = vmatprep.mubr.bf16.mxu0 %v1642_v55  ;;  %v1610_v38 = vmul.f32 0.5, %v1586_v43 }
 0x28e   : > { %2519 = vmatmul.mubr.bf16.vlgmr.msra.gmra.mrb[0].mxu0 %v1641_v16  ;;  %v1633_v19 = vmul.f32 %v1609_v1, %v4052_v12  ;;  %v3165_v12 = vld [vmem:[%s4420_s5 + $0x230] ss:$8 sps:$4 sm:$0xff]  }
 0x28f   : > { %2538 = vmatpush1.bf16.msra.mxu0 %v3156_v35  ;;  %v1634_v18 = vmul.f32 %v1610_v38, %v4058_v17  ;;  %v3167_v17 = vld [vmem:[%s4420_s5 + $0x234] ss:$8 sps:$4 sm:$0xff]   ;;  %v3186_v35 = vld [vmem:[%s4420_s5 + $0x2a0] ss:$8 sps:$4 sm:$0xff]  }
 0x290   : > { %2539 = vmatprep.subr.bf16.mxu0 %v3161_v59  ;;  %v1649_v57 = vpack.c.bf16 %v1633_v19, %v1633_v19 }
 0x291   : > { %v1650_v21 = vpack.c.bf16 %v1634_v18, %v1634_v18 }
 0x293   : > { %2528 = vmatprep.mubr.bf16.mxu0 %v1650_v21  ;;  %2540 = vmatpush1.bf16.msra.mxu0 %v3159_v46  ;;  %v3191_v46 = vld [vmem:[%s4420_s5 + $0x2b4] ss:$8 sps:$4 sm:$0xff]  }
 0x294   : > { %2541 = vmatprep.subr.bf16.mxu0 %v3164_v58 }
 0x296   : > { %2529 = vmatmul.mubr.bf16.gmra.mrb[4].mxu0 %v1649_v57 }
 0x297   : > { %2542 = vmatpush1.bf16.msra.mxu0 %v3162_v22 }
 0x298   : > { %2543 = vmatprep.subr.bf16.mxu0 %v3167_v17 }
 0x29b   : > { %2544 = vmatpush1.bf16.msra.mxu0 %v3165_v12 }
 0x29c   : > { %2545 = vmatprep.subr.bf16.mxu0 %v3170_v20 }
 0x29f   : > { %2546 = vmatpush1.bf16.msra.mxu0 %v3168_v23  ;;  %v3189_v23 = vld [vmem:[%s4420_s5 + $0x2b0] ss:$8 sps:$4 sm:$0xff]  }
 0x2a0   : > { %2547 = vmatprep.subr.bf16.mxu0 %v3173_v24 }
 0x2a3   : > { %2548 = vmatpush1.bf16.msra.mxu0 %v3171_v25 }
 0x2a4   : > { %2549 = vmatprep.subr.bf16.mxu0 %v3176_v26  ;;  %v3194_v26 = vld [vmem:[%s4420_s5 + $0x2c4] ss:$8 sps:$4 sm:$0xff]  }
 0x2a7   : > { %2550 = vmatpush1.bf16.msra.mxu0 %v3174_v27 }
 0x2a8   : > { %2551 = vmatprep.subr.bf16.mxu0 %v3179_v29 }
 0x2aa   : > { %v1355_v34 = vpop.f32.mrb[16].mxu1 }
 0x2ab   : > { %v4161_v36 = vadd.f32 %v1355_v34, %v558_v30  ;;  %v1357_v37 = vpop.f32.mrb[17].mxu1  ;;  %2552 = vmatpush1.bf16.msra.mxu0 %v3177_v9  ;;  %v3197_v9 = vld [vmem:[%s4420_s5 + $0x2d4] ss:$8 sps:$4 sm:$0xff]   ;;  %v3195_v34 = vld [vmem:[%s4420_s5 + $0x2d0] ss:$8 sps:$4 sm:$0xff]  }
 0x2ac   : > { %v4166_v40 = vadd.f32 %v1357_v37, %v562_v32  ;;  %v1359_v41 = vpop.f32.mrb[18].mxu1  ;;  %2553 = vmatprep.subr.bf16.mxu0 %v3182_v33  ;;  %v3200_v37 = vld [vmem:[%s4420_s5 + $0x2e4] ss:$8 sps:$4 sm:$0xff]  }
 0x2ad   : > { %v1427_v45 = vmul.f32 %v4161_v36, %v4161_v36  ;;  %v4173_v47 = vadd.f32 %v1359_v41, %v558_v30  ;;  %v1361_v48 = vpop.f32.mrb[19].mxu1 }
 0x2ae   : > { %v1428_v50 = vmul.f32 %v4166_v40, %v4166_v40  ;;  %v4177_v51 = vadd.f32 %v1361_v48, %v562_v32  ;;  %v3198_v48 = vld [vmem:[%s4420_s5 + $0x2e0] ss:$8 sps:$4 sm:$0xff]  }
 0x2af   : > { %v1451_v52 = vmul.f32 %v1427_v45, %v4161_v36  ;;  %v1435_v54 = vmul.f32 %v4173_v47, %v4173_v47  ;;  %2554 = vmatpush1.bf16.msra.mxu0 %v3180_v39 }
 0x2b0   : > { %v1452_v56 = vmul.f32 %v1428_v50, %v4166_v40  ;;  %v1436_v63 = vmul.f32 %v4177_v51, %v4177_v51  ;;  %2555 = vmatprep.subr.bf16.mxu0 %v3185_v44 }
 0x2b1   : > { %v1475_v2 = vmul.f32 0.044715, %v1451_v52  ;;  %v1459_v11 = vmul.f32 %v1435_v54, %v4173_v47 }
 0x2b2   : > { %v1476_v10 = vmul.f32 0.044715, %v1452_v56  ;;  %v1460_v13 = vmul.f32 %v1436_v63, %v4177_v51  ;;  %v1365_v14 = vpop.f32.mrb[20].mxu1  ;;  %v3203_v56 = vld [vmem:[%s4420_s5 + $0x2f4] ss:$8 sps:$4 sm:$0xff]  }
 0x2b3   : > { %v1499_v15 = vadd.f32 %v1475_v2, %v4161_v36  ;;  %v1483_v16 = vmul.f32 0.044715, %v1459_v11  ;;  %v4194_v53 = vadd.f32 %v1365_v14, %v558_v30  ;;  %v1367_v55 = vpop.f32.mrb[21].mxu1  ;;  %2556 = vmatpush1.bf16.msra.mxu0 %v3183_v31  ;;  %v3201_v11 = vld [vmem:[%s4420_s5 + $0x2f0] ss:$8 sps:$4 sm:$0xff]  }
 0x2b4   : > { %v1500_v43 = vadd.f32 %v1476_v10, %v4166_v40  ;;  %v1484_v59 = vmul.f32 0.044715, %v1460_v13  ;;  %v4200_v1 = vadd.f32 %v1367_v55, %v562_v32  ;;  %v1369_v38 = vpop.f32.mrb[22].mxu1  ;;  %2557 = vmatprep.subr.bf16.mxu0 %v3188_v42 }
 0x2b5   : > { %v1523_v18 = vmul.f32 0.7978846, %v1499_v15  ;;  %v1507_v19 = vadd.f32 %v1483_v16, %v4173_v47  ;;  %v1443_v58 = vmul.f32 %v4194_v53, %v4194_v53  ;;  %v1370_v21 = vpop.f32.mrb[23].mxu1  ;;  %v3206_v15 = vld [vmem:[%s4420_s5 + $0x304] ss:$8 sps:$4 sm:$0xff]  }
 0x2b6   : > { %v1524_v22 = vmul.f32 0.7978846, %v1500_v43  ;;  %v1508_v57 = vadd.f32 %v1484_v59, %v4177_v51  ;;  %v1444_v17 = vmul.f32 %v4200_v1, %v4200_v1 }
 0x2b7   : > { %3282 = vtanh.f32 %v1523_v18  ;;  %v1531_v12 = vmul.f32 0.7978846, %v1507_v19  ;;  %v1467_v20 = vmul.f32 %v1443_v58, %v4194_v53  ;;  %2558 = vmatpush1.bf16.msra.mxu0 %v3186_v35  ;;  %v3209_v18 = vld [vmem:[%s4420_s5 + $0x314] ss:$8 sps:$4 sm:$0xff]  }
 0x2b8   : > { %3284 = vtanh.f32 %v1524_v22  ;;  %v1532_v24 = vmul.f32 0.7978846, %v1508_v57  ;;  %v1468_v25 = vmul.f32 %v1444_v17, %v4200_v1  ;;  %2559 = vmatprep.subr.bf16.mxu0 %v3191_v46  ;;  %v3212_v22 = vld [vmem:[%s4420_s5 + $0x324] ss:$8 sps:$4 sm:$0xff]   ;;  %v3210_v17 = vld [vmem:[%s4420_s5 + $0x320] ss:$8 sps:$4 sm:$0xff]  }
 0x2b9   : > { %3286 = vtanh.f32 %v1531_v12  ;;  %v1491_v27 = vmul.f32 0.044715, %v1467_v20  ;;  %v3218_v20 = vld [vmem:[%s4420_s5 + $0x344] ss:$8 sps:$4 sm:$0xff]  }
 0x2ba   : > { %3288 = vtanh.f32 %v1532_v24  ;;  %v1492_v28 = vmul.f32 0.044715, %v1468_v25  ;;  %v3221_v24 = vld [vmem:[%s4420_s5 + $0x354] ss:$8 sps:$4 sm:$0xff]   ;;  %v3219_v25 = vld [vmem:[%s4420_s5 + $0x350] ss:$8 sps:$4 sm:$0xff]  }
 0x2bb   : > { %v1515_v29 = vadd.f32 %v1491_v27, %v4194_v53  ;;  %2560 = vmatpush1.bf16.msra.mxu0 %v3189_v23  ;;  %v3216_v23 = vld [vmem:[%s4420_s5 + $0x340] ss:$8 sps:$4 sm:$0xff]  }
 0x2bc   : > { %v1516_v30 = vadd.f32 %v1492_v28, %v4200_v1  ;;  %2561 = vmatprep.subr.bf16.mxu0 %v3194_v26  ;;  %v3224_v26 = vld [vmem:[%s4420_s5 + $0x364] ss:$8 sps:$4 sm:$0xff]   ;;  %v3222_v27 = vld [vmem:[%s4420_s5 + $0x360] ss:$8 sps:$4 sm:$0xff]   ;;  %v565_v28 = vsub.s32 6, %v3529_v61 }
 0x2bd   : > { %v1539_v32 = vmul.f32 0.7978846, %v1515_v29  ;;  %v3227_v29 = vld [vmem:[%s4420_s5 + $0x374] ss:$8 sps:$4 sm:$0xff]  }
 0x2be   : > { %v1540_v33 = vmul.f32 0.7978846, %v1516_v30  ;;  %v566_v30 = vrot.slane %v3961_v49, %v565_v28  ;;  %v3240_v28 = vld [vmem:[%s4420_s5 + $0x3c0] ss:$8 sps:$4 sm:$0xff]  }
 0x2bf   : > { %3290 = vtanh.f32 %v1539_v32  ;;  %2562 = vmatpush1.bf16.msra.mxu0 %v3192_v60  ;;  %v569_v60 = vsub.s32 7, %v3529_v61  ;;  %v3228_v61 = vld [vmem:[%s4420_s5 + $0x380] ss:$8 sps:$4 sm:$0xff]  }
 0x2c0   : > { %3292 = vtanh.f32 %v1540_v33  ;;  %2563 = vmatprep.subr.bf16.mxu0 %v3197_v9  ;;  %v3225_v9 = vld [vmem:[%s4420_s5 + $0x370] ss:$8 sps:$4 sm:$0xff]   ;;  %v3230_v33 = vld [vmem:[%s4420_s5 + $0x384] ss:$8 sps:$4 sm:$0xff]  }
 0x2c1   : > { %v3283_v39 = vpop.eup %3282  ;;  %v570_v32 = vrot.slane %v3961_v49, %v569_v60  ;;  %v3233_v49 = vld [vmem:[%s4420_s5 + $0x394] ss:$8 sps:$4 sm:$0xff]  }
 0x2c2   : > { %v3285_v41 = vpop.eup %3284  ;;  %v1571_v44 = vadd.f32 1.0, %v3283_v39  ;;  %v3245_v60 = vld [vmem:[%s4420_s5 + $0x3d4] ss:$8 sps:$4 sm:$0xff]  }
 0x2c3   : > { %v3287_v45 = vpop.eup %3286  ;;  %2564 = vmatpush1.bf16.msra.mxu0 %v3195_v34  ;;  %v1572_v50 = vadd.f32 1.0, %v3285_v41 }
 0x2c4   : > { %v3289_v52 = vpop.eup %3288  ;;  %v1595_v54 = vmul.f32 0.5, %v1571_v44  ;;  %v1579_v31 = vadd.f32 1.0, %v3287_v45  ;;  %2565 = vmatprep.subr.bf16.mxu0 %v3200_v37 }
 0x2c5   : > { %v1580_v63 = vadd.f32 1.0, %v3289_v52  ;;  %v1596_v42 = vmul.f32 0.5, %v1572_v50 }
 0x2c6   : > { %v1603_v2 = vmul.f32 0.5, %v1579_v31  ;;  %v1619_v13 = vmul.f32 %v1595_v54, %v4161_v36  ;;  %v3204_v36 = vld [vmem:[%s4420_s5 + $0x300] ss:$8 sps:$4 sm:$0xff]  }
 0x2c7   : > { %2566 = vmatpush1.bf16.msra.mxu0 %v3198_v48  ;;  %v1604_v10 = vmul.f32 0.5, %v1580_v63  ;;  %v1620_v55 = vmul.f32 %v1596_v42, %v4166_v40  ;;  %v3231_v63 = vld [vmem:[%s4420_s5 + $0x390] ss:$8 sps:$4 sm:$0xff]  }
 0x2c8   : > { %v1627_v14 = vmul.f32 %v1603_v2, %v4173_v47  ;;  %2567 = vmatprep.subr.bf16.mxu0 %v3203_v56 }
 0x2c9   : > { %v3291_v16 = vpop.eup %3290  ;;  %v1628_v35 = vmul.f32 %v1604_v10, %v4177_v51  ;;  %v3207_v51 = vld [vmem:[%s4420_s5 + $0x310] ss:$8 sps:$4 sm:$0xff]  }
 0x2ca   : > { %v3293_v43 = vpop.eup %3292  ;;  %v1643_v59 = vpack.c.bf16 %v1627_v14, %v1619_v13  ;;  %v1587_v38 = vadd.f32 1.0, %v3291_v16 }
 0x2cb   : > { %2568 = vmatpush1.bf16.msra.mxu0 %v3201_v11  ;;  %v1644_v46 = vpack.c.bf16 %v1628_v35, %v1620_v55  ;;  %v1588_v47 = vadd.f32 1.0, %v3293_v43  ;;  %v3236_v11 = vld [vmem:[%s4420_s5 + $0x3a4] ss:$8 sps:$4 sm:$0xff]  }
 0x2cc   : > { %2588 = vmatprep.subr.bf16.mxu0 %v3206_v15  ;;  %v1611_v19 = vmul.f32 0.5, %v1587_v38  ;;  %v3234_v38 = vld [vmem:[%s4420_s5 + $0x3a0] ss:$8 sps:$4 sm:$0xff]  }
 0x2cd   : > { %2569 = vmatprep.mubr.bf16.mxu0 %v1644_v46  ;;  %v1612_v40 = vmul.f32 0.5, %v1588_v47 }
 0x2ce   : > { %2570 = vmatmul.mubr.bf16.vlgmr.msra.gmra.mrb[0].mxu0 %v1643_v59  ;;  %v1635_v21 = vmul.f32 %v1611_v19, %v4194_v53  ;;  %v3213_v53 = vld [vmem:[%s4420_s5 + $0x330] ss:$8 sps:$4 sm:$0xff]   ;;  %v3239_v19 = vld [vmem:[%s4420_s5 + $0x3b4] ss:$8 sps:$4 sm:$0xff]  }
 0x2cf   : > { %2589 = vmatpush1.bf16.msra.mxu0 %v3204_v36  ;;  %v1636_v58 = vmul.f32 %v1612_v40, %v4200_v1  ;;  %v3215_v1 = vld [vmem:[%s4420_s5 + $0x334] ss:$8 sps:$4 sm:$0xff]  }
 0x2d0   : > { %2590 = vmatprep.subr.bf16.mxu0 %v3209_v18  ;;  %v1651_v12 = vpack.c.bf16 %v1635_v21, %v1635_v21 }
 0x2d1   : > { %v1652_v57 = vpack.c.bf16 %v1636_v58, %v1636_v58 }
 0x2d3   : > { %2579 = vmatprep.mubr.bf16.mxu0 %v1652_v57  ;;  %2591 = vmatpush1.bf16.msra.mxu0 %v3207_v51 }
 0x2d4   : > { %2592 = vmatprep.subr.bf16.mxu0 %v3212_v22 }
 0x2d6   : > { %2580 = vmatmul.mubr.bf16.gmra.mrb[4].mxu0 %v1651_v12 }
 0x2d7   : > { %2593 = vmatpush1.bf16.msra.mxu0 %v3210_v17 }
 0x2d8   : > { %2594 = vmatprep.subr.bf16.mxu0 %v3215_v1 }
 0x2db   : > { %2595 = vmatpush1.bf16.msra.mxu0 %v3213_v53  ;;  %v3237_v53 = vld [vmem:[%s4420_s5 + $0x3b0] ss:$8 sps:$4 sm:$0xff]  }
 0x2dc   : > { %2596 = vmatprep.subr.bf16.mxu0 %v3218_v20 }
 0x2df   : > { %2597 = vmatpush1.bf16.msra.mxu0 %v3216_v23 }
 0x2e0   : > { %2598 = vmatprep.subr.bf16.mxu0 %v3221_v24  ;;  %v3242_v24 = vld [vmem:[%s4420_s5 + $0x3c4] ss:$8 sps:$4 sm:$0xff]  }
 0x2e3   : > { %2599 = vmatpush1.bf16.msra.mxu0 %v3219_v25 }
 0x2e4   : > { %2600 = vmatprep.subr.bf16.mxu0 %v3224_v26 }
 0x2e7   : > { %2601 = vmatpush1.bf16.msra.mxu0 %v3222_v27 }
 0x2e8   : > { %2602 = vmatprep.subr.bf16.mxu0 %v3227_v29 }
 0x2ea   : > { %v1406_v34 = vpop.f32.mrb[24].mxu1 }
 0x2eb   : > { %v4303_v37 = vadd.f32 %v1406_v34, %v566_v30  ;;  %v1408_v39 = vpop.f32.mrb[25].mxu1  ;;  %2603 = vmatpush1.bf16.msra.mxu0 %v3225_v9 }
 0x2ec   : > { %v4308_v41 = vadd.f32 %v1408_v39, %v570_v32  ;;  %v1410_v44 = vpop.f32.mrb[26].mxu1  ;;  %2604 = vmatprep.subr.bf16.mxu0 %v3230_v33  ;;  %v3248_v33 = vld [vmem:[%s4420_s5 + $0x3e4] ss:$8 sps:$4 sm:$0xff]  }
 0x2ed   : > { %v1429_v45 = vmul.f32 %v4303_v37, %v4303_v37  ;;  %v4315_v48 = vadd.f32 %v1410_v44, %v566_v30  ;;  %v1412_v50 = vpop.f32.mrb[27].mxu1 }
 0x2ee   : > { %v1430_v52 = vmul.f32 %v4308_v41, %v4308_v41  ;;  %v4319_v54 = vadd.f32 %v1412_v50, %v570_v32 }
 0x2ef   : > { %v1453_v31 = vmul.f32 %v1429_v45, %v4303_v37  ;;  %v1437_v56 = vmul.f32 %v4315_v48, %v4315_v48  ;;  %2605 = vmatpush1.bf16.msra.mxu0 %v3228_v61 }
 0x2f0   : > { %v1454_v42 = vmul.f32 %v1430_v52, %v4308_v41  ;;  %v1438_v2 = vmul.f32 %v4319_v54, %v4319_v54  ;;  %2606 = vmatprep.subr.bf16.mxu0 %v3233_v49  ;;  %v3246_v49 = vld [vmem:[%s4420_s5 + $0x3e0] ss:$8 sps:$4 sm:$0xff]  }
 0x2f1   : > { %v1477_v10 = vmul.f32 0.044715, %v1453_v31  ;;  %v1461_v13 = vmul.f32 %v1437_v56, %v4315_v48  ;;  %v3251_v56 = vld [vmem:[%s4420_s5 + $0x3f4] ss:$8 sps:$4 sm:$0xff]  }
 0x2f2   : > { %v1478_v14 = vmul.f32 0.044715, %v1454_v42  ;;  %v1462_v15 = vmul.f32 %v1438_v2, %v4319_v54  ;;  %v1416_v16 = vpop.f32.mrb[28].mxu1 }
 0x2f3   : > { %v1501_v55 = vadd.f32 %v1477_v10, %v4303_v37  ;;  %v1485_v35 = vmul.f32 0.044715, %v1461_v13  ;;  %v4336_v43 = vadd.f32 %v1416_v16, %v566_v30  ;;  %v1418_v59 = vpop.f32.mrb[29].mxu1  ;;  %2607 = vmatpush1.bf16.msra.mxu0 %v3231_v63 }
 0x2f4   : > { %v1502_v46 = vadd.f32 %v1478_v14, %v4308_v41  ;;  %v1486_v36 = vmul.f32 0.044715, %v1462_v15  ;;  %v4342_v47 = vadd.f32 %v1418_v59, %v570_v32  ;;  %v1420_v18 = vpop.f32.mrb[30].mxu1  ;;  %2608 = vmatprep.subr.bf16.mxu0 %v3236_v11  ;;  %v3243_v32 = vld [vmem:[%s4420_s5 + $0x3d0] ss:$8 sps:$4 sm:$0xff]  }
 0x2f5   : > { %v1525_v40 = vmul.f32 0.7978846, %v1501_v55  ;;  %v1509_v51 = vadd.f32 %v1485_v35, %v4315_v48  ;;  %v1445_v58 = vmul.f32 %v4336_v43, %v4336_v43  ;;  %v1421_v21 = vpop.f32.mrb[31].mxu1  ;;  %v3249_v11 = vld [vmem:[%s4420_s5 + $0x3f0] ss:$8 sps:$4 sm:$0xff]  }
 0x2f6   : > { %v1526_v22 = vmul.f32 0.7978846, %v1502_v46  ;;  %v1510_v57 = vadd.f32 %v1486_v36, %v4319_v54  ;;  %v1446_v17 = vmul.f32 %v4342_v47, %v4342_v47 }
 0x2f7   : > { %3294 = vtanh.f32 %v1525_v40  ;;  %v1533_v12 = vmul.f32 0.7978846, %v1509_v51  ;;  %v1469_v1 = vmul.f32 %v1445_v58, %v4336_v43  ;;  %2609 = vmatpush1.bf16.msra.mxu0 %v3234_v38 }
 0x2f8   : > { %3296 = vtanh.f32 %v1526_v22  ;;  %v1534_v20 = vmul.f32 0.7978846, %v1510_v57  ;;  %v1470_v23 = vmul.f32 %v1446_v17, %v4342_v47  ;;  %2610 = vmatprep.subr.bf16.mxu0 %v3239_v19 }
 0x2f9   : > { %3298 = vtanh.f32 %v1533_v12  ;;  %v1493_v25 = vmul.f32 0.044715, %v1469_v1 }
 0x2fa   : > { %3300 = vtanh.f32 %v1534_v20  ;;  %v1494_v26 = vmul.f32 0.044715, %v1470_v23 }
 0x2fb   : > { %v1517_v27 = vadd.f32 %v1493_v25, %v4336_v43  ;;  %2611 = vmatpush1.bf16.msra.mxu0 %v3237_v53 }
 0x2fc   : > { %v1518_v29 = vadd.f32 %v1494_v26, %v4342_v47  ;;  %2612 = vmatprep.subr.bf16.mxu0 %v3242_v24 }
 0x2fd   : > { %v1541_v30 = vmul.f32 0.7978846, %v1517_v27 }
 0x2fe   : > { %v1542_v9 = vmul.f32 0.7978846, %v1518_v29 }
 0x2ff   : > { %3302 = vtanh.f32 %v1541_v30  ;;  %2613 = vmatpush1.bf16.msra.mxu0 %v3240_v28 }
 0x300   : > { %3304 = vtanh.f32 %v1542_v9  ;;  %2614 = vmatprep.subr.bf16.mxu0 %v3245_v60 }
 0x301   : > { %v3295_v34 = vpop.eup %3294 }
 0x302   : > { %v3297_v39 = vpop.eup %3296  ;;  %v1573_v61 = vadd.f32 1.0, %v3295_v34 }
 0x303   : > { %v3299_v44 = vpop.eup %3298  ;;  %2615 = vmatpush1.bf16.msra.mxu0 %v3243_v32  ;;  %v1574_v45 = vadd.f32 1.0, %v3297_v39 }
 0x304   : > { %v3301_v50 = vpop.eup %3300  ;;  %v1597_v52 = vmul.f32 0.5, %v1573_v61  ;;  %v1581_v31 = vadd.f32 1.0, %v3299_v44  ;;  %2616 = vmatprep.subr.bf16.mxu0 %v3248_v33  ;;  %v2692_v44 = vld [vmem:[%s305_s22 + $0x10] sm:$0x11] }
 0x305   : > { %v1582_v63 = vadd.f32 1.0, %v3301_v50  ;;  %v1598_v42 = vmul.f32 0.5, %v1574_v45 }
 0x306   : > { %v1605_v2 = vmul.f32 0.5, %v1581_v31  ;;  %v1621_v13 = vmul.f32 %v1597_v52, %v4303_v37 }
 0x307   : > { %2617 = vmatpush1.bf16.msra.mxu0 %v3246_v49  ;;  %v1606_v10 = vmul.f32 0.5, %v1582_v63  ;;  %v1622_v16 = vmul.f32 %v1598_v42, %v4308_v41  ;;  %v1783_v41 = vld [vmem:[%s4421_s6] sm:$0x3] }
 0x308   : > { %v1629_v14 = vmul.f32 %v1605_v2, %v4315_v48  ;;  %2618 = vmatprep.subr.bf16.mxu0 %v3251_v56  ;;  %v1788_v58 = vrot.slane %v1783_v41, %v3538_v0  ;;  %v1792_v21 = vrot.slane %v1783_v41, %v3532_v62 }
 0x309   : > { %v3303_v15 = vpop.eup %3302  ;;  %v1630_v55 = vmul.f32 %v1606_v10, %v4319_v54  ;;  %v2639_v54 = vld [vmem:[%s4422_s7] sm:$0x3] }
 0x30a   : > { %v3305_v35 = vpop.eup %3304  ;;  %v1645_v59 = vpack.c.bf16 %v1629_v14, %v1621_v13  ;;  %v1589_v38 = vadd.f32 1.0, %v3303_v15  ;;  %v2648_v22 = vrot.slane %v2639_v54, %v3532_v62 }
 0x30b   : > { %2619 = vmatpush1.bf16.msra.mxu0 %v3249_v11  ;;  %v1646_v46 = vpack.c.bf16 %v1630_v55, %v1622_v16  ;;  %v1590_v36 = vadd.f32 1.0, %v3305_v35 }
 0x30c   : > { %v1613_v18 = vmul.f32 0.5, %v1589_v38 }
 0x30d   : > { %2620 = vmatprep.mubr.bf16.mxu0 %v1646_v46  ;;  %v1614_v19 = vmul.f32 0.5, %v1590_v36 }
 0x30e   : > { %2621 = vmatmul.mubr.bf16.vlgmr.msra.gmra.mrb[0].mxu0 %v1645_v59  ;;  %v1637_v48 = vmul.f32 %v1613_v18, %v4336_v43 }
 0x30f   : > { %v1638_v37 = vmul.f32 %v1614_v19, %v4342_v47  ;;  %v2644_v47 = vrot.slane %v2639_v54, %v3538_v0 }
 0x310   : > { %v1653_v51 = vpack.c.bf16 %v1637_v48, %v1637_v48 }
 0x311   : > { %v1654_v40 = vpack.c.bf16 %v1638_v37, %v1638_v37 }
 0x313   : > { %2630 = vmatprep.mubr.bf16.mxu0 %v1654_v40 }
 0x316   : > { %2631 = vmatmul.mubr.bf16.gmra.mrb[4].mxu0 %v1653_v51 }
 0x3e1   : > { %v2622_v43 = vpop.f32.mrb[0].mxu0 }
 0x3e2   : > { %v3021_v57 = vadd.f32 %v2622_v43, %v1788_v58  ;;  %v2624_v17 = vpop.f32.mrb[1].mxu0 }
 0x3e3   : > { %v3022_v12 = vadd.f32 %v2624_v17, %v1792_v21  ;;  %v2626_v1 = vpop.f32.mrb[2].mxu0 }
 0x3e4   : > { %v2651_v53 = vmul.f32 %v3021_v57, %v2644_v47  ;;  %v3023_v20 = vadd.f32 %v2626_v1, %v1788_v58  ;;  %v2628_v23 = vpop.f32.mrb[3].mxu0 }
 0x3e5   : > { %v2652_v24 = vmul.f32 %v3022_v12, %v2648_v22  ;;  %v3024_v25 = vadd.f32 %v2628_v23, %v1792_v21 }
 0x3e6   : > { %v2657_v26 = vadd.f32 %v2651_v53, %v3375_v3  ;;  %v2653_v27 = vmul.f32 %v3023_v20, %v2644_v47 }
 0x3e7   : > { %v2658_v28 = vadd.f32 %v2652_v24, %v3377_v4  ;;  %v2654_v29 = vmul.f32 %v3024_v25, %v2648_v22 }
 0x3e8   : > { %v2659_v62 = vadd.f32 %v2653_v27, %v3383_v7 }
 0x3e9   : > { %v3018_v0 = vpack.c.bf16 %v2658_v28, %v2657_v26  ;;  %v2660_v60 = vadd.f32 %v2654_v29, %v3385_v8  ;;  %v2632_v30 = vpop.f32.mrb[4].mxu0 }
 0x3ea   : > { %v3025_v9 = vadd.f32 %v2632_v30, %v1788_v58  ;;  %v2634_v32 = vpop.f32.mrb[5].mxu0 }
 0x3eb   : > { %2683 = vst [vmem:[%s305_s22] sm:$0xff] %v3018_v0  ;;  %v3019_v3 = vpack.c.bf16 %v2660_v60, %v2659_v62  ;;  %v3026_v4 = vadd.f32 %v2634_v32, %v1792_v21  ;;  %v2636_v33 = vpop.f32.mrb[6].mxu0 }
 0x3ec   : > { %v2655_v34 = vmul.f32 %v3025_v9, %v2644_v47  ;;  %v2637_v39 = vpop.f32.mrb[7].mxu0 }
 0x3ed   : > { %2684 = vst [vmem:[%s305_s22 + $0x8] sm:$0xff] %v3019_v3  ;;  %v2656_v61 = vmul.f32 %v3026_v4, %v2648_v22 }
 0x3ee   : > { %v2661_v7 = vadd.f32 %v2655_v34, %v3379_v5 }
 0x3ef   : > { %v2662_v8 = vadd.f32 %v2656_v61, %v3381_v6 }
 0x3f1   : > { %v3020_v49 = vpack.c.bf16 %v2662_v8, %v2661_v7 }
 0x3f3   : > { %v2693_v45 = vsel %vm2691_vm6, %v3020_v49, %v2692_v44 }
 0x3f4   : > { %2694 = vst [vmem:[%s305_s22 + $0x10] sm:$0x11] %v2693_v45 }
 0x3f5 PF: > { %s18_s27 = sadd.s32 1, %s3312_s27  }
 0x3f6   : > { %p15_p4 = scmp.ge.s32.totalorder %s18_s27, 4  }
 0x3f8   :  { %17 = sbr.rel (!%p15_p4) target bundleno = 1 (0x1), region = 82 }

</bundles_post_ra>
